<compile_context>
chip_gen: v5e
topology: v5e:2x2
jax: 0.10.0
libtpu: 0.0.40
codegen_flags: <defaults>
</compile_context>

<pallas_src>
import jax
import jax.numpy as jnp
from jax.experimental import pallas as pl
from jax.experimental.pallas import tpu as pltpu


# --------------------------------------------------------------------------
# Kernel
# --------------------------------------------------------------------------
def _encoder_block_kernel(x_ref, w1_ref, b1_ref, w2_ref, b2_ref,
                          out_ref, skip_ref, pool_ref):
    # Block shapes:
    #   x_ref    : (1, H, W, Cin)          f32
    #   w1_ref   : (9*Cin, Cp)             bf16  (im2col, BN-scale folded)
    #   w2_ref   : (9, Cp, Cp)             bf16  (per-tap,  BN-scale folded)
    #   b1/b2    : (1, Cp)                 f32   (folded BN shift)
    #   out_ref  : (1, H//2, W//2, Cp)
    #   skip_ref : (1, H, W, Cp)
    #   pool_ref : (H//2, W, Cp)           VMEM scratch for the strided pool read
    _, H, W, Cin = x_ref.shape
    Cp = w2_ref.shape[2]
    HW = H * W

    # ---- halo masks: computed ONCE, shared by both convs (hoisted) --------
    # row/col of each flattened pixel via 2D iota (no integer div/mod).
    row = jax.lax.broadcasted_iota(jnp.int32, (H, W, 1), 0).reshape(HW, 1)
    col = jax.lax.broadcasted_iota(jnp.int32, (H, W, 1), 1).reshape(HW, 1)
    r_top = row >= 1          # valid when dh == -1
    r_bot = row < H - 1       # valid when dh == +1
    c_left = col >= 1         # valid when dw == -1
    c_right = col < W - 1     # valid when dw == +1

    def _edge_mask(dh, dw):
        parts = []
        if dh == -1:
            parts.append(r_top)
        if dh == 1:
            parts.append(r_bot)
        if dw == -1:
            parts.append(c_left)
        if dw == 1:
            parts.append(c_right)
        m = parts[0]
        for p in parts[1:]:
            m = m & p
        return m

    masks = {(dh, dw): _edge_mask(dh, dw)
             for dh in (-1, 0, 1) for dw in (-1, 0, 1) if (dh, dw) != (0, 0)}

    def shifted_tap(x_flat, dh, dw):
        # x_flat[(r,c)] shifted so tap[(r,c)] == x[(r+dh, c+dw)], with the
        # out-of-image halo zeroed. Roll is an XLU sublane rotation (~free).
        if dh == 0 and dw == 0:
            return x_flat
        shift = (-(dh * W + dw)) % HW
        rolled = pltpu.roll(x_flat, shift, 0)
        return jnp.where(masks[(dh, dw)], rolled, 0.0)

    # ---- conv1 + BN + ReLU : single im2col matmul --------------------------
    x_flat = x_ref[0].reshape(HW, Cin)
    patches = jnp.concatenate(
        [shifted_tap(x_flat, kh - 1, kw - 1)
         for kh in range(3) for kw in range(3)],
        axis=1).astype(jnp.bfloat16)                      # (HW, 9*Cin) bf16
    y1 = jnp.maximum(
        jnp.dot(patches, w1_ref[...], preferred_element_type=jnp.float32)
        + b1_ref[...], 0.0)                               # (HW, Cp) f32

    # ---- conv2 + BN + ReLU : 9 shifted K=Cp matmuls, bf16 MXU operands -----
    acc = jnp.zeros((HW, Cp), jnp.float32)
    for kh in range(3):
        for kw in range(3):
            tap = shifted_tap(y1, kh - 1, kw - 1)         # f32 roll/mask
            acc = acc + jnp.dot(tap.astype(jnp.bfloat16), w2_ref[kh * 3 + kw],
                                preferred_element_type=jnp.float32)
    y2 = jnp.maximum(acc + b2_ref[...], 0.0)              # (HW, Cp) f32

    # skip connection output (lane-dense: Cp is a multiple of 128).
    skip_ref[0] = y2.reshape(H, W, Cp).astype(skip_ref.dtype)

    # ---- 2x2 max pool, stride 2 --------------------------------------------
    # Row direction: leading-dim split (layout-free).
    a = y2.reshape(H // 2, 2, W, Cp)
    m = jnp.maximum(a[:, 0], a[:, 1])                     # (H//2, W, Cp)
    # Column direction: in-register XLU roll pairs column j with j+1, then a
    # single stride-2 read of the even columns from the VMEM scratch.
    pool_ref[...] = jnp.maximum(m, pltpu.roll(m, W - 1, axis=1))
    out_ref[0] = pool_ref[:, pl.ds(0, W // 2, 2), :].astype(out_ref.dtype)


# --------------------------------------------------------------------------
# Pallas wrapper (NHWC, channel-padded, BN folded) -- production entry point
# --------------------------------------------------------------------------
def encoder_block_nhwc(x, w1_mat, b1, w2_taps, b2):
    """x: (N,H,W,Cin) f32.  w1_mat: (9*Cin, Cp) bf16.  w2_taps: (9, Cp, Cp)
    bf16.  b*: (1, Cp) f32.  Returns (out, skip) in NHWC with padded Cp."""
    N, H, W, Cin = x.shape
    Cp = w2_taps.shape[-1]
    assert H % 2 == 0 and W % 2 == 0
    assert Cp % 128 == 0
    assert w1_mat.shape == (9 * Cin, Cp)

    out, skip = pl.pallas_call(
        _encoder_block_kernel,
        out_shape=(
            jax.ShapeDtypeStruct((N, H // 2, W // 2, Cp), x.dtype),
            jax.ShapeDtypeStruct((N, H, W, Cp), x.dtype),
        ),
        grid_spec=pltpu.PrefetchScalarGridSpec(
            num_scalar_prefetch=0,
            grid=(N,),
            in_specs=[
                pl.BlockSpec((1, H, W, Cin), lambda n: (n, 0, 0, 0)),
                pl.BlockSpec((9 * Cin, Cp), lambda n: (0, 0)),
                pl.BlockSpec((1, Cp), lambda n: (0, 0)),
                pl.BlockSpec((9, Cp, Cp), lambda n: (0, 0, 0)),
                pl.BlockSpec((1, Cp), lambda n: (0, 0)),
            ],
            out_specs=[
                pl.BlockSpec((1, H // 2, W // 2, Cp), lambda n: (n, 0, 0, 0)),
                pl.BlockSpec((1, H, W, Cp), lambda n: (n, 0, 0, 0)),
            ],
            scratch_shapes=[
                pltpu.VMEM((H // 2, W, Cp), jnp.float32),
            ],
        ),
        compiler_params=pltpu.CompilerParams(
            dimension_semantics=("parallel",)),
    )(x, w1_mat, b1, w2_taps, b2)
    return out, skip


# --------------------------------------------------------------------------
# PyTorch-facing wrapper: NCHW in, (out, skip) NCHW out (boundary glue only)
# --------------------------------------------------------------------------
def _round_up(v, m):
    return (v + m - 1) // m * m


def fold_bn(conv_bias, gamma, beta, mean, var, eps=1e-5):
    """Fold conv bias + BatchNorm(eval) into per-channel scale / shift."""
    scale = gamma / jnp.sqrt(var + eps)
    shift = (conv_bias - mean) * scale + beta
    return scale, shift


def encoder_block_nchw(x_nchw, params):
    x = jnp.transpose(x_nchw, (0, 2, 3, 1)).astype(jnp.float32)   # NCHW->NHWC
    N, H, W, Cin = x.shape
    Cout = params["conv1_w"].shape[0]
    Cp = _round_up(Cout, 128)       # lane-dense channel dim inside the kernel

    s1, b1 = fold_bn(params["conv1_b"], params["bn1_g"], params["bn1_b"],
                     params["bn1_m"], params["bn1_v"])
    s2, b2 = fold_bn(params["conv2_b"], params["bn2_g"], params["bn2_b"],
                     params["bn2_m"], params["bn2_v"])

    # OIHW -> HWIO, fold BN scale into the weights, zero-pad channels to Cp,
    # flatten conv1 to an im2col matrix and conv2 to 9 taps, cast to bf16.
    w1 = jnp.transpose(params["conv1_w"], (2, 3, 1, 0)) * s1[None, None, None, :]
    w2 = jnp.transpose(params["conv2_w"], (2, 3, 1, 0)) * s2[None, None, None, :]
    w1 = jnp.pad(w1, ((0, 0), (0, 0), (0, 0), (0, Cp - Cout)))
    w2 = jnp.pad(w2, ((0, 0), (0, 0), (0, Cp - Cout), (0, Cp - Cout)))
    w1_mat = w1.reshape(9 * Cin, Cp).astype(jnp.bfloat16)
    w2_taps = w2.reshape(9, Cp, Cp).astype(jnp.bfloat16)
    b1p = jnp.pad(b1, (0, Cp - Cout)).reshape(1, Cp).astype(jnp.float32)
    b2p = jnp.pad(b2, (0, Cp - Cout)).reshape(1, Cp).astype(jnp.float32)

    out, skip = encoder_block_nhwc(x, w1_mat, b1p, w2_taps, b2p)

    out = jnp.transpose(out[..., :Cout], (0, 3, 1, 2))    # strip pad, ->NCHW
    skip = jnp.transpose(skip[..., :Cout], (0, 3, 1, 2))
    return out, skip


# --------------------------------------------------------------------------
# Pure-JAX fp32 reference (correctness check)
# --------------------------------------------------------------------------
def _ref_conv_bn_relu(x_nhwc, w_hwio, scale, shift):
    y = jax.lax.conv_general_dilated(
        x_nhwc, w_hwio, window_strides=(1, 1), padding="SAME",
        dimension_numbers=("NHWC", "HWIO", "NHWC"))
    return jnp.maximum(y * scale + shift, 0.0)


def _ref_encoder(x_nchw, params):
    x = jnp.transpose(x_nchw, (0, 2, 3, 1)).astype(jnp.float32)
    w1 = jnp.transpose(params["conv1_w"], (2, 3, 1, 0))
    w2 = jnp.transpose(params["conv2_w"], (2, 3, 1, 0))
    s1, b1 = fold_bn(params["conv1_b"], params["bn1_g"], params["bn1_b"],
                     params["bn1_m"], params["bn1_v"])
    s2, b2 = fold_bn(params["conv2_b"], params["bn2_g"], params["bn2_b"],
                     params["bn2_m"], params["bn2_v"])
    y = _ref_conv_bn_relu(x, w1, s1, b1)
    skip = _ref_conv_bn_relu(y, w2, s2, b2)
    out = jax.lax.reduce_window(skip, -jnp.inf, jax.lax.max,
                                (1, 2, 2, 1), (1, 2, 2, 1), "VALID")
    return (jnp.transpose(out, (0, 3, 1, 2)),
            jnp.transpose(skip, (0, 3, 1, 2)))


if __name__ == "__main__":
    N, Cin, Cout, H, W = 2, 4, 8, 16, 16

    key = jax.random.PRNGKey(0)
    keys = jax.random.split(key, 12)
    params = {
        "conv1_w": 0.1 * jax.random.normal(keys[0], (Cout, Cin, 3, 3), jnp.float32),
        "conv1_b": 0.1 * jax.random.normal(keys[1], (Cout,), jnp.float32),
        "bn1_g": 1.0 + 0.1 * jax.random.normal(keys[2], (Cout,), jnp.float32),
        "bn1_b": 0.1 * jax.random.normal(keys[3], (Cout,), jnp.float32),
        "bn1_m": 0.05 * jax.random.normal(keys[4], (Cout,), jnp.float32),
        "bn1_v": 0.5 + jax.random.uniform(keys[5], (Cout,), jnp.float32),
        "conv2_w": 0.1 * jax.random.normal(keys[6], (Cout, Cout, 3, 3), jnp.float32),
        "conv2_b": 0.1 * jax.random.normal(keys[7], (Cout,), jnp.float32),
        "bn2_g": 1.0 + 0.1 * jax.random.normal(keys[8], (Cout,), jnp.float32),
        "bn2_b": 0.1 * jax.random.normal(keys[9], (Cout,), jnp.float32),
        "bn2_m": 0.05 * jax.random.normal(keys[10], (Cout,), jnp.float32),
        "bn2_v": 0.5 + jax.random.uniform(keys[11], (Cout,), jnp.float32),
    }

    x = jax.random.normal(jax.random.PRNGKey(42), (N, Cin, H, W), jnp.float32)

    out, skip = jax.jit(encoder_block_nchw)(x, params)
    jax.block_until_ready((out, skip))

    ref_out, ref_skip = _ref_encoder(x, params)
    assert out.shape == (N, Cout, H // 2, W // 2) and skip.shape == (N, Cout, H, W)
    # bf16 MXU operands (f32 accumulate) vs. fp32 reference: ~1e-2 agreement.
    assert jnp.allclose(out, ref_out, rtol=5e-2, atol=5e-2)
    assert jnp.allclose(skip, ref_skip, rtol=5e-2, atol=5e-2)

    print("KERNEL_OK")
</pallas_src>

<mosaic_0001>
module attributes {stable_mosaic.version = 11 : i64} {
  func.func @_encoder_block_kernel(%arg0: i32, %arg1: memref<1x16x16x4xf32, #tpu.memory_space<vmem>>, %arg2: memref<36x128xbf16, #tpu.memory_space<vmem>>, %arg3: memref<1x128xf32, #tpu.memory_space<vmem>>, %arg4: memref<9x128x128xbf16, #tpu.memory_space<vmem>>, %arg5: memref<1x128xf32, #tpu.memory_space<vmem>>, %arg6: memref<1x8x8x128xf32, #tpu.memory_space<vmem>>, %arg7: memref<1x16x16x128xf32, #tpu.memory_space<vmem>>, %arg8: memref<8x16x128xf32, #tpu.memory_space<vmem>>) attributes {dimension_semantics = [#tpu.dimension_semantics<parallel>], iteration_bounds = array<i64: 2>, scalar_prefetch = 0 : i64, scratch_operands = 1 : i64, tpu.core_type = #tpu.core_type<tc>, window_params = [{transform_indices = @transform_0, window_bounds = array<i64: 1, 16, 16, 4>}, {pipeline_mode = #tpu.pipeline_mode<synchronous>, transform_indices = @transform_1, window_bounds = array<i64: 36, 128>}, {pipeline_mode = #tpu.pipeline_mode<synchronous>, transform_indices = @transform_2, window_bounds = array<i64: 1, 128>}, {pipeline_mode = #tpu.pipeline_mode<synchronous>, transform_indices = @transform_3, window_bounds = array<i64: 9, 128, 128>}, {pipeline_mode = #tpu.pipeline_mode<synchronous>, transform_indices = @transform_4, window_bounds = array<i64: 1, 128>}, {transform_indices = @transform_5, window_bounds = array<i64: 1, 8, 8, 128>}, {transform_indices = @transform_6, window_bounds = array<i64: 1, 16, 16, 128>}]} {
    %0 = tpu.iota {dimensions = array<i32: 0>} : vector<16x16x1xi32>
    %1 = vector.shape_cast %0 : vector<16x16x1xi32> to vector<256x1xi32>
    %2 = tpu.iota {dimensions = array<i32: 1>} : vector<16x16x1xi32>
    %3 = vector.shape_cast %2 : vector<16x16x1xi32> to vector<256x1xi32>
    %c1_i32 = arith.constant 1 : i32
    %4 = vector.broadcast %c1_i32 : i32 to vector<256x1xi32>
    %5 = arith.cmpi sge, %1, %4 : vector<256x1xi32>
    %c15_i32 = arith.constant 15 : i32
    %6 = vector.broadcast %c15_i32 : i32 to vector<256x1xi32>
    %7 = arith.cmpi slt, %1, %6 : vector<256x1xi32>
    %c1_i32_0 = arith.constant 1 : i32
    %8 = vector.broadcast %c1_i32_0 : i32 to vector<256x1xi32>
    %9 = arith.cmpi sge, %3, %8 : vector<256x1xi32>
    %c15_i32_1 = arith.constant 15 : i32
    %10 = vector.broadcast %c15_i32_1 : i32 to vector<256x1xi32>
    %11 = arith.cmpi slt, %3, %10 : vector<256x1xi32>
    %12 = arith.andi %5, %9 : vector<256x1xi1>
    %13 = arith.andi %5, %11 : vector<256x1xi1>
    %14 = arith.andi %7, %9 : vector<256x1xi1>
    %15 = arith.andi %7, %11 : vector<256x1xi1>
    %c0 = arith.constant 0 : index
    %c0_2 = arith.constant 0 : index
    %c0_3 = arith.constant 0 : index
    %c0_4 = arith.constant 0 : index
    %16 = vector.load %arg1[%c0, %c0_2, %c0_3, %c0_4] : memref<1x16x16x4xf32, #tpu.memory_space<vmem>>, vector<1x16x16x4xf32>
    %17 = vector.shape_cast %16 : vector<1x16x16x4xf32> to vector<16x16x4xf32>
    %18 = vector.shape_cast %17 : vector<16x16x4xf32> to vector<256x4xf32>
    %c17_i32 = arith.constant 17 : i32
    %19 = tpu.dynamic_rotate %18 by %c17_i32 dim 0 : vector<256x4xf32>, i32 -> vector<256x4xf32>
    %cst = arith.constant 0.000000e+00 : f32
    %20 = vector.shape_cast %12 : vector<256x1xi1> to vector<256x1xi1>
    %21 = vector.broadcast %20 : vector<256x1xi1> to vector<256x4xi1>
    %22 = vector.broadcast %cst : f32 to vector<256x4xf32>
    %23 = arith.select %21, %19, %22 : vector<256x4xi1>, vector<256x4xf32>
    %c16_i32 = arith.constant 16 : i32
    %24 = tpu.dynamic_rotate %18 by %c16_i32 dim 0 : vector<256x4xf32>, i32 -> vector<256x4xf32>
    %cst_5 = arith.constant 0.000000e+00 : f32
    %25 = vector.shape_cast %5 : vector<256x1xi1> to vector<256x1xi1>
    %26 = vector.broadcast %25 : vector<256x1xi1> to vector<256x4xi1>
    %27 = vector.broadcast %cst_5 : f32 to vector<256x4xf32>
    %28 = arith.select %26, %24, %27 : vector<256x4xi1>, vector<256x4xf32>
    %c15_i32_6 = arith.constant 15 : i32
    %29 = tpu.dynamic_rotate %18 by %c15_i32_6 dim 0 : vector<256x4xf32>, i32 -> vector<256x4xf32>
    %cst_7 = arith.constant 0.000000e+00 : f32
    %30 = vector.shape_cast %13 : vector<256x1xi1> to vector<256x1xi1>
    %31 = vector.broadcast %30 : vector<256x1xi1> to vector<256x4xi1>
    %32 = vector.broadcast %cst_7 : f32 to vector<256x4xf32>
    %33 = arith.select %31, %29, %32 : vector<256x4xi1>, vector<256x4xf32>
    %c1_i32_8 = arith.constant 1 : i32
    %34 = tpu.dynamic_rotate %18 by %c1_i32_8 dim 0 : vector<256x4xf32>, i32 -> vector<256x4xf32>
    %cst_9 = arith.constant 0.000000e+00 : f32
    %35 = vector.shape_cast %9 : vector<256x1xi1> to vector<256x1xi1>
    %36 = vector.broadcast %35 : vector<256x1xi1> to vector<256x4xi1>
    %37 = vector.broadcast %cst_9 : f32 to vector<256x4xf32>
    %38 = arith.select %36, %34, %37 : vector<256x4xi1>, vector<256x4xf32>
    %c255_i32 = arith.constant 255 : i32
    %39 = tpu.dynamic_rotate %18 by %c255_i32 dim 0 : vector<256x4xf32>, i32 -> vector<256x4xf32>
    %cst_10 = arith.constant 0.000000e+00 : f32
    %40 = vector.shape_cast %11 : vector<256x1xi1> to vector<256x1xi1>
    %41 = vector.broadcast %40 : vector<256x1xi1> to vector<256x4xi1>
    %42 = vector.broadcast %cst_10 : f32 to vector<256x4xf32>
    %43 = arith.select %41, %39, %42 : vector<256x4xi1>, vector<256x4xf32>
    %c241_i32 = arith.constant 241 : i32
    %44 = tpu.dynamic_rotate %18 by %c241_i32 dim 0 : vector<256x4xf32>, i32 -> vector<256x4xf32>
    %cst_11 = arith.constant 0.000000e+00 : f32
    %45 = vector.shape_cast %14 : vector<256x1xi1> to vector<256x1xi1>
    %46 = vector.broadcast %45 : vector<256x1xi1> to vector<256x4xi1>
    %47 = vector.broadcast %cst_11 : f32 to vector<256x4xf32>
    %48 = arith.select %46, %44, %47 : vector<256x4xi1>, vector<256x4xf32>
    %c240_i32 = arith.constant 240 : i32
    %49 = tpu.dynamic_rotate %18 by %c240_i32 dim 0 : vector<256x4xf32>, i32 -> vector<256x4xf32>
    %cst_12 = arith.constant 0.000000e+00 : f32
    %50 = vector.shape_cast %7 : vector<256x1xi1> to vector<256x1xi1>
    %51 = vector.broadcast %50 : vector<256x1xi1> to vector<256x4xi1>
    %52 = vector.broadcast %cst_12 : f32 to vector<256x4xf32>
    %53 = arith.select %51, %49, %52 : vector<256x4xi1>, vector<256x4xf32>
    %c239_i32 = arith.constant 239 : i32
    %54 = tpu.dynamic_rotate %18 by %c239_i32 dim 0 : vector<256x4xf32>, i32 -> vector<256x4xf32>
    %cst_13 = arith.constant 0.000000e+00 : f32
    %55 = vector.shape_cast %15 : vector<256x1xi1> to vector<256x1xi1>
    %56 = vector.broadcast %55 : vector<256x1xi1> to vector<256x4xi1>
    %57 = vector.broadcast %cst_13 : f32 to vector<256x4xf32>
    %58 = arith.select %56, %54, %57 : vector<256x4xi1>, vector<256x4xf32>
    %59 = tpu.concatenate %23, %28, %33, %38, %18, %43, %48, %53, %58 in 1 : vector<256x4xf32>, vector<256x4xf32>, vector<256x4xf32>, vector<256x4xf32>, vector<256x4xf32>, vector<256x4xf32>, vector<256x4xf32>, vector<256x4xf32>, vector<256x4xf32> -> vector<256x36xf32>
    %60 = arith.truncf %59 : vector<256x36xf32> to vector<256x36xbf16>
    %c0_14 = arith.constant 0 : index
    %c0_15 = arith.constant 0 : index
    %61 = vector.load %arg2[%c0_14, %c0_15] : memref<36x128xbf16, #tpu.memory_space<vmem>>, vector<36x128xbf16>
    %cst_16 = arith.constant dense<0.000000e+00> : vector<256x128xf32>
    %62 = tpu.matmul %60, %61, %cst_16 {dimension_numbers = #tpu.dot_dimension_numbers<[1], [0], [0], [1], [0, 0, 1, 1], [], []>} : vector<256x36xbf16>, vector<36x128xbf16>, vector<256x128xf32> -> vector<256x128xf32>
    %c0_17 = arith.constant 0 : index
    %c0_18 = arith.constant 0 : index
    %63 = vector.load %arg3[%c0_17, %c0_18] : memref<1x128xf32, #tpu.memory_space<vmem>>, vector<1x128xf32>
    %64 = vector.broadcast %63 : vector<1x128xf32> to vector<256x128xf32>
    %65 = arith.addf %62, %64 : vector<256x128xf32>
    %cst_19 = arith.constant 0.000000e+00 : f32
    %66 = vector.broadcast %cst_19 : f32 to vector<256x128xf32>
    %67 = arith.maximumf %65, %66 : vector<256x128xf32>
    %cst_20 = arith.constant 0.000000e+00 : f32
    %68 = vector.broadcast %cst_20 : f32 to vector<256x128xf32>
    %c17_i32_21 = arith.constant 17 : i32
    %69 = tpu.dynamic_rotate %67 by %c17_i32_21 dim 0 : vector<256x128xf32>, i32 -> vector<256x128xf32>
    %cst_22 = arith.constant 0.000000e+00 : f32
    %70 = vector.shape_cast %12 : vector<256x1xi1> to vector<256x1xi1>
    %71 = vector.broadcast %70 : vector<256x1xi1> to vector<256x128xi1>
    %72 = vector.broadcast %cst_22 : f32 to vector<256x128xf32>
    %73 = arith.select %71, %69, %72 : vector<256x128xi1>, vector<256x128xf32>
    %74 = arith.truncf %73 : vector<256x128xf32> to vector<256x128xbf16>
    %c0_23 = arith.constant 0 : index
    %c0_24 = arith.constant 0 : index
    %c0_25 = arith.constant 0 : index
    %75 = vector.load %arg4[%c0_23, %c0_24, %c0_25] : memref<9x128x128xbf16, #tpu.memory_space<vmem>>, vector<1x128x128xbf16>
    %76 = vector.shape_cast %75 : vector<1x128x128xbf16> to vector<128x128xbf16>
    %cst_26 = arith.constant dense<0.000000e+00> : vector<256x128xf32>
    %77 = tpu.matmul %74, %76, %cst_26 {dimension_numbers = #tpu.dot_dimension_numbers<[1], [0], [0], [1], [0, 0, 1, 1], [], []>} : vector<256x128xbf16>, vector<128x128xbf16>, vector<256x128xf32> -> vector<256x128xf32>
    %78 = arith.addf %68, %77 : vector<256x128xf32>
    %c16_i32_27 = arith.constant 16 : i32
    %79 = tpu.dynamic_rotate %67 by %c16_i32_27 dim 0 : vector<256x128xf32>, i32 -> vector<256x128xf32>
    %cst_28 = arith.constant 0.000000e+00 : f32
    %80 = vector.shape_cast %5 : vector<256x1xi1> to vector<256x1xi1>
    %81 = vector.broadcast %80 : vector<256x1xi1> to vector<256x128xi1>
    %82 = vector.broadcast %cst_28 : f32 to vector<256x128xf32>
    %83 = arith.select %81, %79, %82 : vector<256x128xi1>, vector<256x128xf32>
    %84 = arith.truncf %83 : vector<256x128xf32> to vector<256x128xbf16>
    %c1 = arith.constant 1 : index
    %c0_29 = arith.constant 0 : index
    %c0_30 = arith.constant 0 : index
    %85 = vector.load %arg4[%c1, %c0_29, %c0_30] : memref<9x128x128xbf16, #tpu.memory_space<vmem>>, vector<1x128x128xbf16>
    %86 = vector.shape_cast %85 : vector<1x128x128xbf16> to vector<128x128xbf16>
    %cst_31 = arith.constant dense<0.000000e+00> : vector<256x128xf32>
    %87 = tpu.matmul %84, %86, %cst_31 {dimension_numbers = #tpu.dot_dimension_numbers<[1], [0], [0], [1], [0, 0, 1, 1], [], []>} : vector<256x128xbf16>, vector<128x128xbf16>, vector<256x128xf32> -> vector<256x128xf32>
    %88 = arith.addf %78, %87 : vector<256x128xf32>
    %c15_i32_32 = arith.constant 15 : i32
    %89 = tpu.dynamic_rotate %67 by %c15_i32_32 dim 0 : vector<256x128xf32>, i32 -> vector<256x128xf32>
    %cst_33 = arith.constant 0.000000e+00 : f32
    %90 = vector.shape_cast %13 : vector<256x1xi1> to vector<256x1xi1>
    %91 = vector.broadcast %90 : vector<256x1xi1> to vector<256x128xi1>
    %92 = vector.broadcast %cst_33 : f32 to vector<256x128xf32>
    %93 = arith.select %91, %89, %92 : vector<256x128xi1>, vector<256x128xf32>
    %94 = arith.truncf %93 : vector<256x128xf32> to vector<256x128xbf16>
    %c2 = arith.constant 2 : index
    %c0_34 = arith.constant 0 : index
    %c0_35 = arith.constant 0 : index
    %95 = vector.load %arg4[%c2, %c0_34, %c0_35] : memref<9x128x128xbf16, #tpu.memory_space<vmem>>, vector<1x128x128xbf16>
    %96 = vector.shape_cast %95 : vector<1x128x128xbf16> to vector<128x128xbf16>
    %cst_36 = arith.constant dense<0.000000e+00> : vector<256x128xf32>
    %97 = tpu.matmul %94, %96, %cst_36 {dimension_numbers = #tpu.dot_dimension_numbers<[1], [0], [0], [1], [0, 0, 1, 1], [], []>} : vector<256x128xbf16>, vector<128x128xbf16>, vector<256x128xf32> -> vector<256x128xf32>
    %98 = arith.addf %88, %97 : vector<256x128xf32>
    %c1_i32_37 = arith.constant 1 : i32
    %99 = tpu.dynamic_rotate %67 by %c1_i32_37 dim 0 : vector<256x128xf32>, i32 -> vector<256x128xf32>
    %cst_38 = arith.constant 0.000000e+00 : f32
    %100 = vector.shape_cast %9 : vector<256x1xi1> to vector<256x1xi1>
    %101 = vector.broadcast %100 : vector<256x1xi1> to vector<256x128xi1>
    %102 = vector.broadcast %cst_38 : f32 to vector<256x128xf32>
    %103 = arith.select %101, %99, %102 : vector<256x128xi1>, vector<256x128xf32>
    %104 = arith.truncf %103 : vector<256x128xf32> to vector<256x128xbf16>
    %c3 = arith.constant 3 : index
    %c0_39 = arith.constant 0 : index
    %c0_40 = arith.constant 0 : index
    %105 = vector.load %arg4[%c3, %c0_39, %c0_40] : memref<9x128x128xbf16, #tpu.memory_space<vmem>>, vector<1x128x128xbf16>
    %106 = vector.shape_cast %105 : vector<1x128x128xbf16> to vector<128x128xbf16>
    %cst_41 = arith.constant dense<0.000000e+00> : vector<256x128xf32>
    %107 = tpu.matmul %104, %106, %cst_41 {dimension_numbers = #tpu.dot_dimension_numbers<[1], [0], [0], [1], [0, 0, 1, 1], [], []>} : vector<256x128xbf16>, vector<128x128xbf16>, vector<256x128xf32> -> vector<256x128xf32>
    %108 = arith.addf %98, %107 : vector<256x128xf32>
    %109 = arith.truncf %67 : vector<256x128xf32> to vector<256x128xbf16>
    %c4 = arith.constant 4 : index
    %c0_42 = arith.constant 0 : index
    %c0_43 = arith.constant 0 : index
    %110 = vector.load %arg4[%c4, %c0_42, %c0_43] : memref<9x128x128xbf16, #tpu.memory_space<vmem>>, vector<1x128x128xbf16>
    %111 = vector.shape_cast %110 : vector<1x128x128xbf16> to vector<128x128xbf16>
    %cst_44 = arith.constant dense<0.000000e+00> : vector<256x128xf32>
    %112 = tpu.matmul %109, %111, %cst_44 {dimension_numbers = #tpu.dot_dimension_numbers<[1], [0], [0], [1], [0, 0, 1, 1], [], []>} : vector<256x128xbf16>, vector<128x128xbf16>, vector<256x128xf32> -> vector<256x128xf32>
    %113 = arith.addf %108, %112 : vector<256x128xf32>
    %c255_i32_45 = arith.constant 255 : i32
    %114 = tpu.dynamic_rotate %67 by %c255_i32_45 dim 0 : vector<256x128xf32>, i32 -> vector<256x128xf32>
    %cst_46 = arith.constant 0.000000e+00 : f32
    %115 = vector.shape_cast %11 : vector<256x1xi1> to vector<256x1xi1>
    %116 = vector.broadcast %115 : vector<256x1xi1> to vector<256x128xi1>
    %117 = vector.broadcast %cst_46 : f32 to vector<256x128xf32>
    %118 = arith.select %116, %114, %117 : vector<256x128xi1>, vector<256x128xf32>
    %119 = arith.truncf %118 : vector<256x128xf32> to vector<256x128xbf16>
    %c5 = arith.constant 5 : index
    %c0_47 = arith.constant 0 : index
    %c0_48 = arith.constant 0 : index
    %120 = vector.load %arg4[%c5, %c0_47, %c0_48] : memref<9x128x128xbf16, #tpu.memory_space<vmem>>, vector<1x128x128xbf16>
    %121 = vector.shape_cast %120 : vector<1x128x128xbf16> to vector<128x128xbf16>
    %cst_49 = arith.constant dense<0.000000e+00> : vector<256x128xf32>
    %122 = tpu.matmul %119, %121, %cst_49 {dimension_numbers = #tpu.dot_dimension_numbers<[1], [0], [0], [1], [0, 0, 1, 1], [], []>} : vector<256x128xbf16>, vector<128x128xbf16>, vector<256x128xf32> -> vector<256x128xf32>
    %123 = arith.addf %113, %122 : vector<256x128xf32>
    %c241_i32_50 = arith.constant 241 : i32
    %124 = tpu.dynamic_rotate %67 by %c241_i32_50 dim 0 : vector<256x128xf32>, i32 -> vector<256x128xf32>
    %cst_51 = arith.constant 0.000000e+00 : f32
    %125 = vector.shape_cast %14 : vector<256x1xi1> to vector<256x1xi1>
    %126 = vector.broadcast %125 : vector<256x1xi1> to vector<256x128xi1>
    %127 = vector.broadcast %cst_51 : f32 to vector<256x128xf32>
    %128 = arith.select %126, %124, %127 : vector<256x128xi1>, vector<256x128xf32>
    %129 = arith.truncf %128 : vector<256x128xf32> to vector<256x128xbf16>
    %c6 = arith.constant 6 : index
    %c0_52 = arith.constant 0 : index
    %c0_53 = arith.constant 0 : index
    %130 = vector.load %arg4[%c6, %c0_52, %c0_53] : memref<9x128x128xbf16, #tpu.memory_space<vmem>>, vector<1x128x128xbf16>
    %131 = vector.shape_cast %130 : vector<1x128x128xbf16> to vector<128x128xbf16>
    %cst_54 = arith.constant dense<0.000000e+00> : vector<256x128xf32>
    %132 = tpu.matmul %129, %131, %cst_54 {dimension_numbers = #tpu.dot_dimension_numbers<[1], [0], [0], [1], [0, 0, 1, 1], [], []>} : vector<256x128xbf16>, vector<128x128xbf16>, vector<256x128xf32> -> vector<256x128xf32>
    %133 = arith.addf %123, %132 : vector<256x128xf32>
    %c240_i32_55 = arith.constant 240 : i32
    %134 = tpu.dynamic_rotate %67 by %c240_i32_55 dim 0 : vector<256x128xf32>, i32 -> vector<256x128xf32>
    %cst_56 = arith.constant 0.000000e+00 : f32
    %135 = vector.shape_cast %7 : vector<256x1xi1> to vector<256x1xi1>
    %136 = vector.broadcast %135 : vector<256x1xi1> to vector<256x128xi1>
    %137 = vector.broadcast %cst_56 : f32 to vector<256x128xf32>
    %138 = arith.select %136, %134, %137 : vector<256x128xi1>, vector<256x128xf32>
    %139 = arith.truncf %138 : vector<256x128xf32> to vector<256x128xbf16>
    %c7 = arith.constant 7 : index
    %c0_57 = arith.constant 0 : index
    %c0_58 = arith.constant 0 : index
    %140 = vector.load %arg4[%c7, %c0_57, %c0_58] : memref<9x128x128xbf16, #tpu.memory_space<vmem>>, vector<1x128x128xbf16>
    %141 = vector.shape_cast %140 : vector<1x128x128xbf16> to vector<128x128xbf16>
    %cst_59 = arith.constant dense<0.000000e+00> : vector<256x128xf32>
    %142 = tpu.matmul %139, %141, %cst_59 {dimension_numbers = #tpu.dot_dimension_numbers<[1], [0], [0], [1], [0, 0, 1, 1], [], []>} : vector<256x128xbf16>, vector<128x128xbf16>, vector<256x128xf32> -> vector<256x128xf32>
    %143 = arith.addf %133, %142 : vector<256x128xf32>
    %c239_i32_60 = arith.constant 239 : i32
    %144 = tpu.dynamic_rotate %67 by %c239_i32_60 dim 0 : vector<256x128xf32>, i32 -> vector<256x128xf32>
    %cst_61 = arith.constant 0.000000e+00 : f32
    %145 = vector.shape_cast %15 : vector<256x1xi1> to vector<256x1xi1>
    %146 = vector.broadcast %145 : vector<256x1xi1> to vector<256x128xi1>
    %147 = vector.broadcast %cst_61 : f32 to vector<256x128xf32>
    %148 = arith.select %146, %144, %147 : vector<256x128xi1>, vector<256x128xf32>
    %149 = arith.truncf %148 : vector<256x128xf32> to vector<256x128xbf16>
    %c8 = arith.constant 8 : index
    %c0_62 = arith.constant 0 : index
    %c0_63 = arith.constant 0 : index
    %150 = vector.load %arg4[%c8, %c0_62, %c0_63] : memref<9x128x128xbf16, #tpu.memory_space<vmem>>, vector<1x128x128xbf16>
    %151 = vector.shape_cast %150 : vector<1x128x128xbf16> to vector<128x128xbf16>
    %cst_64 = arith.constant dense<0.000000e+00> : vector<256x128xf32>
    %152 = tpu.matmul %149, %151, %cst_64 {dimension_numbers = #tpu.dot_dimension_numbers<[1], [0], [0], [1], [0, 0, 1, 1], [], []>} : vector<256x128xbf16>, vector<128x128xbf16>, vector<256x128xf32> -> vector<256x128xf32>
    %153 = arith.addf %143, %152 : vector<256x128xf32>
    %c0_65 = arith.constant 0 : index
    %c0_66 = arith.constant 0 : index
    %154 = vector.load %arg5[%c0_65, %c0_66] : memref<1x128xf32, #tpu.memory_space<vmem>>, vector<1x128xf32>
    %155 = vector.broadcast %154 : vector<1x128xf32> to vector<256x128xf32>
    %156 = arith.addf %153, %155 : vector<256x128xf32>
    %cst_67 = arith.constant 0.000000e+00 : f32
    %157 = vector.broadcast %cst_67 : f32 to vector<256x128xf32>
    %158 = arith.maximumf %156, %157 : vector<256x128xf32>
    %159 = vector.shape_cast %158 : vector<256x128xf32> to vector<16x16x128xf32>
    %c0_68 = arith.constant 0 : index
    %c0_69 = arith.constant 0 : index
    %c0_70 = arith.constant 0 : index
    %c0_71 = arith.constant 0 : index
    %160 = vector.load %arg7[%c0_68, %c0_69, %c0_70, %c0_71] : memref<1x16x16x128xf32, #tpu.memory_space<vmem>>, vector<1x16x16x128xf32>
    %161 = vector.shape_cast %160 : vector<1x16x16x128xf32> to vector<16x16x128xf32>
    %162 = vector.shape_cast %159 : vector<16x16x128xf32> to vector<1x16x16x128xf32>
    tpu.vector_store %arg7[%c0_68, %c0_69, %c0_70, %c0_71], %162 {strides = array<i32>} : memref<1x16x16x128xf32, #tpu.memory_space<vmem>>, vector<1x16x16x128xf32>,
    %163 = vector.shape_cast %158 : vector<256x128xf32> to vector<8x2x16x128xf32>
    %164 = vector.extract_strided_slice %163 {offsets = [0, 0, 0, 0], sizes = [8, 1, 16, 128], strides = [1, 1, 1, 1]} : vector<8x2x16x128xf32> to vector<8x1x16x128xf32>
    %165 = vector.shape_cast %164 : vector<8x1x16x128xf32> to vector<8x16x128xf32>
    %166 = vector.extract_strided_slice %163 {offsets = [0, 1, 0, 0], sizes = [8, 1, 16, 128], strides = [1, 1, 1, 1]} : vector<8x2x16x128xf32> to vector<8x1x16x128xf32>
    %167 = vector.shape_cast %166 : vector<8x1x16x128xf32> to vector<8x16x128xf32>
    %168 = arith.maximumf %165, %167 : vector<8x16x128xf32>
    %c15_i32_72 = arith.constant 15 : i32
    %169 = tpu.dynamic_rotate %168 by %c15_i32_72 dim 1 : vector<8x16x128xf32>, i32 -> vector<8x16x128xf32>
    %170 = arith.maximumf %168, %169 : vector<8x16x128xf32>
    %c0_73 = arith.constant 0 : index
    %c0_74 = arith.constant 0 : index
    %c0_75 = arith.constant 0 : index
    %171 = vector.load %arg8[%c0_73, %c0_74, %c0_75] : memref<8x16x128xf32, #tpu.memory_space<vmem>>, vector<8x16x128xf32>
    tpu.vector_store %arg8[%c0_73, %c0_74, %c0_75], %170 {strides = array<i32>} : memref<8x16x128xf32, #tpu.memory_space<vmem>>, vector<8x16x128xf32>,
    %c0_76 = arith.constant 0 : index
    %c0_77 = arith.constant 0 : index
    %c0_78 = arith.constant 0 : index
    %172 = tpu.strided_load %arg8[%c0_76, %c0_77, %c0_78] {strides = array<i32: 1, 2, 1>} : memref<8x16x128xf32, #tpu.memory_space<vmem>>, vector<8x8x128xf32>
    %c0_79 = arith.constant 0 : index
    %c0_80 = arith.constant 0 : index
    %c0_81 = arith.constant 0 : index
    %c0_82 = arith.constant 0 : index
    %173 = vector.load %arg6[%c0_79, %c0_80, %c0_81, %c0_82] : memref<1x8x8x128xf32, #tpu.memory_space<vmem>>, vector<1x8x8x128xf32>
    %174 = vector.shape_cast %173 : vector<1x8x8x128xf32> to vector<8x8x128xf32>
    %175 = vector.shape_cast %172 : vector<8x8x128xf32> to vector<1x8x8x128xf32>
    tpu.vector_store %arg6[%c0_79, %c0_80, %c0_81, %c0_82], %175 {strides = array<i32>} : memref<1x8x8x128xf32, #tpu.memory_space<vmem>>, vector<1x8x8x128xf32>,
    return
  }
  func.func @transform_0(%arg0: i32) -> (i32, i32, i32, i32) {
    %c0_i32 = arith.constant 0 : i32
    %c0_i32_0 = arith.constant 0 : i32
    %c0_i32_1 = arith.constant 0 : i32
    %c0_i32_2 = arith.constant 0 : i32
    return %arg0, %c0_i32, %c0_i32_0, %c0_i32_1 : i32, i32, i32, i32
  }
  func.func @transform_1(%arg0: i32) -> (i32, i32) {
    %c0_i32 = arith.constant 0 : i32
    %c0_i32_0 = arith.constant 0 : i32
    %c0_i32_1 = arith.constant 0 : i32
    return %c0_i32, %c0_i32_0 : i32, i32
  }
  func.func @transform_2(%arg0: i32) -> (i32, i32) {
    %c0_i32 = arith.constant 0 : i32
    %c0_i32_0 = arith.constant 0 : i32
    %c0_i32_1 = arith.constant 0 : i32
    return %c0_i32, %c0_i32_0 : i32, i32
  }
  func.func @transform_3(%arg0: i32) -> (i32, i32, i32) {
    %c0_i32 = arith.constant 0 : i32
    %c0_i32_0 = arith.constant 0 : i32
    %c0_i32_1 = arith.constant 0 : i32
    %c0_i32_2 = arith.constant 0 : i32
    return %c0_i32, %c0_i32_0, %c0_i32_1 : i32, i32, i32
  }
  func.func @transform_4(%arg0: i32) -> (i32, i32) {
    %c0_i32 = arith.constant 0 : i32
    %c0_i32_0 = arith.constant 0 : i32
    %c0_i32_1 = arith.constant 0 : i32
    return %c0_i32, %c0_i32_0 : i32, i32
  }
  func.func @transform_5(%arg0: i32) -> (i32, i32, i32, i32) {
    %c0_i32 = arith.constant 0 : i32
    %c0_i32_0 = arith.constant 0 : i32
    %c0_i32_1 = arith.constant 0 : i32
    %c0_i32_2 = arith.constant 0 : i32
    return %arg0, %c0_i32, %c0_i32_0, %c0_i32_1 : i32, i32, i32, i32
  }
  func.func @transform_6(%arg0: i32) -> (i32, i32, i32, i32) {
    %c0_i32 = arith.constant 0 : i32
    %c0_i32_0 = arith.constant 0 : i32
    %c0_i32_1 = arith.constant 0 : i32
    %c0_i32_2 = arith.constant 0 : i32
    return %arg0, %c0_i32, %c0_i32_0, %c0_i32_1 : i32, i32, i32, i32
  }
}

</mosaic_0001>

<bundles_post_ra>
// kernel: encoder_block_nchw.1
= control target key start
LH: loop header
LB: loop body
LE: loop exit
PB: predicated region body
PF: predicated region fallthrough
CT: control target
= control target key end

     0   :  { %s5483_s21 = smov 0   ;;  %s8247_s0 = inlined_call_operand.vmem [shape: f32[2,16,16,4], index: 0, kind: input, shape index: {}]   ;;  %s8248_s1 = inlined_call_operand.vmem [shape: bf16[36,128], index: 1, kind: input, shape index: {}]   ;;  %s8249_s2 = inlined_call_operand.vmem [shape: f32[1,128], index: 2, kind: input, shape index: {}]   ;;  %s8250_s3 = inlined_call_operand.vmem [shape: bf16[9,128,128], index: 3, kind: input, shape index: {}]   ;;  %s8251_s4 = inlined_call_operand.vmem [shape: f32[1,128], index: 4, kind: input, shape index: {}]   ;;  %s8252_s5 = inlined_call_operand.vmem [shape: f32[2,8,8,128], index: 5, kind: output, shape index: {0}]   ;;  %s8253_s6 = inlined_call_operand.vmem [shape: f32[2,16,16,128], index: 6, kind: output, shape index: {1}]  }
   0x1 LB: > { %s3974_s22 = sadd.s32 4294967295, %s5435_s21   ;;  %p3978_p0 = scmp.ge.s32.totalorder %s5435_s21, 1  ;;  %s5435_s21 = sphi %s5483_s21, %s17_s21  }
   0x2   : > { %p215_p1 = scmp.lt.s32.totalorder %s5435_s21, 3 }
   0x4   : > { %p216_p2 = pnand %p3978_p0, %p215_p1 }
   0x6   : > { %219 = sbr.rel (%p216_p2) target bundleno = 1280 (0x500), region = 40 }
   0xb   : > { %p250_p3 = scmp.lt.s32.totalorder %s3974_s22, 1  ;;  %v266_v0 = vlaneseq  ;;  %v5437_v7 = vmov 0.0   ;;  %s5438_s27 = smov 16   ;;  %vm1708_vm4 = vcmask 1041408   ;;  %vm1357_vm5 = vcmask 31744  }
   0xc   : > { %s5439_s28 = smov 4   ;;  %s5440_s29 = smov 20   ;;  %vm1389_vm6 = vcmask 64512   ;;  %vm1421_vm7 = vcmask 97280   ;;  %vm1454_vm8 = vcmask 130048   ;;  %vm1487_vm9 = vcmask 162816  }
   0xd   : > { %s8458_s22 = smov (!%p250_p3, %s3974_s22), 1  ;;  %v5493_v1 = vshrl.u32 %v266_v0, 7  ;;  %s5441_s30 = smov 8   ;;  %vm1520_vm10 = vcmask 195584   ;;  %vm1553_vm11 = vcmask 228352   ;;  %vm1586_vm12 = vcmask 261120  }
   0xe   : > { %s4703_s23 = sshll.u32 %s8458_s22, 8  ;;  %s5442_s7 = smov 12   ;;  %vm1659_vm13 = vcmask 293888   ;;  %vm5447_vm14 = vmmov 1  }
   0xf   : > { %8283 = vst [vmem:[#allocation3_spill] sm:$0xff] %v5493_v1  ;;  %v5497_v2 = vadd.s32 8, %v5493_v1  ;;  %s5504_s26 = scalar_lea.vmem %s8247_s0, %s4703_s23  ;;  %vm336_vm1 = vcmp.lt.s32.totalorder %v5493_v1, 1  ;;  %vm432_vm2 = vcmp.lt.s32.totalorder %v5493_v1, 7  ;;  %vm269_vm3 = vcmp.ge.s32.totalorder %v5493_v1, 1  ;;  %s5443_s8 = smov 24  }
  0x10   : > { %v5507_v3 = vld [vmem:[%s5504_s26] sm:$0xff]  ;;  %v274_v4 = vld [vmem:[%s5504_s26 + $0x8] sm:$0xff]  ;;  %v275_v5 = vld [vmem:[%s5504_s26 + $0x10] sm:$0xff]  ;;  %s5444_s9 = smov 28   ;;  %s5445_s10 = smov 32  }
  0x11   : > { %vm272_vm0 = vcmp.lt.s32.totalorder %v5497_v2, 15  ;;  %v4815_v6 = vpack.i.bf16 %v274_v4, %v5507_v3  ;;  %v4810_v8 = vpack.i.bf16 %v5507_v3, %v5437_v7  ;;  %v5518_v9 = vld [vmem:[%s5504_s26 + $0x18] sm:$0xff]  ;;  %v402_v10 = vrot.slane %v274_v4, 1  ;;  %v277_v23 = vld [vmem:[%s5504_s26 + $0x20] sm:$0xff]  ;;  %v278_v41 = vld [vmem:[%s5504_s26 + $0x28] sm:$0xff] }
  0x12   : > { %v403_v11 = vrot.slane %v275_v5, 1  ;;  %v5521_v12 = vld [vmem:[%s5504_s26 + $0xf8] sm:$0xff]  ;;  %v401_v13 = vrot.slane %v5507_v3, 1  ;;  %v305_v14 = vrot.slane %v5507_v3, 7  ;;  %v306_v15 = vrot.slane %v274_v4, 7  ;;  %v279_v46 = vld [vmem:[%s5504_s26 + $0x30] sm:$0xff]  ;;  %vm7102_vm15 = vmpackc.low %vm272_vm0, %vm5447_vm14 }
  0x13   : > { %4816 = vrot.lane.b32.xlu1 %v4815_v6, %s5438_s27  ;;  %4811 = vrot.lane.b32.xlu0 %v4810_v8, %s5439_s28  ;;  %v335_v17 = vrot.slane %v5521_v12, 7  ;;  %v307_v18 = vrot.slane %v275_v5, 7  ;;  %v308_v22 = vrot.slane %v5518_v9, 7  ;;  %v404_v24 = vrot.slane %v5518_v9, 1  ;;  %v280_v59 = vld [vmem:[%s5504_s26 + $0x38] sm:$0xff]  ;;  %v281_v61 = vld [vmem:[%s5504_s26 + $0x40] sm:$0xff] }
  0x14   : > { %v461_v16 = vsel %vm432_vm2, %v402_v10, %v403_v11  ;;  %v462_v20 = vsel %vm432_vm2, %v401_v13, %v402_v10  ;;  %v5539_v21 = vsel %vm336_vm1, %v305_v14, %v306_v15  ;;  %v405_v31 = vrot.slane %v277_v23, 1 }
  0x15   : > { %v468_v19 = vsel %vm272_vm0, %v461_v16, 0.0  ;;  %v366_v26 = vsel %vm336_vm1, %v335_v17, %v305_v14  ;;  %v364_v28 = vsel %vm336_vm1, %v306_v15, %v307_v18  ;;  %v4820_v29 = vpack.i.bf16 %v462_v20, %v5437_v7 }
  0x16   : > { %v4835_v25 = vpack.i.bf16 %v468_v19, %v462_v20  ;;  %v5550_v27 = vsel %vm269_vm3, %v366_v26, 0.0  ;;  %v5560_v32 = vsel %vm336_vm1, %v307_v18, %v308_v22  ;;  %v5564_v33 = vsel %vm269_vm3, %v364_v28, 0.0 }
  0x17   : > { %v4830_v30 = vpack.i.bf16 %v5539_v21, %v5550_v27  ;;  %v459_v34 = vsel %vm432_vm2, %v404_v24, %v405_v31  ;;  %v4840_v35 = vpack.i.bf16 %v5560_v32, %v5564_v33  ;;  %v460_v36 = vsel %vm432_vm2, %v403_v11, %v404_v24 }
  0x18   : > { %4836 = vrot.lane.b32.xlu2 %v4835_v25, %s5440_s29  ;;  %v470_v37 = vsel %vm272_vm0, %v459_v34, 0.0  ;;  %v4825_v38 = vpack.i.bf16 %v5518_v9, %v275_v5  ;;  %v4850_v40 = vpack.i.bf16 %v275_v5, %v274_v4  ;;  %v309_v42 = vrot.slane %v277_v23, 7 }
  0x19   : > { %v4845_v39 = vpack.i.bf16 %v470_v37, %v460_v36  ;;  %v4855_v43 = vpack.i.bf16 %v460_v36, %v468_v19  ;;  %v310_v44 = vrot.slane %v278_v41, 7  ;;  %v406_v49 = vrot.slane %v278_v41, 1  ;;  %v5638_v19 = vld [vmem:[%s5504_s26 + $0x48] sm:$0xff] }
  0x1a   : > { %v362_v45 = vsel %vm336_vm1, %v308_v22, %v309_v42  ;;  %v407_v50 = vrot.slane %v279_v46, 1  ;;  %v4880_v53 = vpack.i.bf16 %v278_v41, %v277_v23  ;;  %v4890_v57 = vpack.i.bf16 %v277_v23, %v5518_v9  ;;  %v283_v22 = vld [vmem:[%s5504_s26 + $0x50] sm:$0xff] }
  0x1b   : > { %4821 = vrot.lane.b32.xlu0 %v4820_v29, %s5441_s30  ;;  %4831 = vrot.lane.b32.xlu1 %v4830_v30, %s5442_s7  ;;  %v5589_v47 = vsel %vm336_vm1, %v309_v42, %v310_v44  ;;  %v5593_v48 = vsel %vm269_vm3, %v362_v45, 0.0  ;;  %v458_v54 = vsel %vm432_vm2, %v405_v31, %v406_v49  ;;  %v311_v60 = vrot.slane %v279_v46, 7  ;;  %v1639_v45 = vld [vmem:[%s8248_s1 + $0x10] sm:$0x3] }
  0x1c   : > { %v4875_v51 = vpack.i.bf16 %v5589_v47, %v5593_v48  ;;  %v457_v52 = vsel %vm432_vm2, %v406_v49, %v407_v50  ;;  %v4895_v58 = vpack.i.bf16 %v458_v54, %v470_v37  ;;  %v312_v62 = vrot.slane %v280_v59, 7 }
  0x1d   : > { %v472_v55 = vsel %vm272_vm0, %v457_v52, 0.0  ;;  %v360_v63 = vsel %vm336_vm1, %v310_v44, %v311_v60  ;;  %v408_v0 = vrot.slane %v280_v59, 1  ;;  %v409_v4 = vrot.slane %v281_v61, 1  ;;  %v5678_v44 = vld [vmem:[%s5504_s26 + $0x60] sm:$0xff] }
  0x1e   : > { %v4885_v56 = vpack.i.bf16 %v472_v55, %v458_v54  ;;  %v5619_v5 = vsel %vm336_vm1, %v311_v60, %v312_v62  ;;  %v5623_v6 = vsel %vm269_vm3, %v360_v63, 0.0  ;;  %v4920_v10 = vpack.i.bf16 %v280_v59, %v279_v46 }
  0x1f   : > { %v455_v8 = vsel %vm432_vm2, %v408_v0, %v409_v4  ;;  %v4915_v9 = vpack.i.bf16 %v5619_v5, %v5623_v6  ;;  %v456_v11 = vsel %vm432_vm2, %v407_v50, %v408_v0  ;;  %v4930_v16 = vpack.i.bf16 %v279_v46, %v278_v41  ;;  %v4706_v0 = vld [vmem:[%s8248_s1] sm:$0xff] }
  0x20   : > { %4841 = vrot.lane.b32.xlu2 %v4840_v35, %s5443_s8  ;;  %v474_v14 = vsel %vm272_vm0, %v455_v8, 0.0  ;;  %v4935_v18 = vpack.i.bf16 %v456_v11, %v472_v55  ;;  %v313_v20 = vrot.slane %v281_v61, 7  ;;  %v314_v23 = vrot.slane %v5638_v19, 7 }
  0x21   : > { %v4925_v15 = vpack.i.bf16 %v474_v14, %v456_v11  ;;  %v410_v25 = vrot.slane %v5638_v19, 1  ;;  %v411_v26 = vrot.slane %v283_v22, 1  ;;  %v4960_v36 = vpack.i.bf16 %v5638_v19, %v281_v61  ;;  %v5729_v11 = vld [vmem:[%s5504_s26 + $0x70] sm:$0xff] }
  0x22   : > { %v358_v24 = vsel %vm336_vm1, %v312_v62, %v313_v20  ;;  %v5650_v28 = vsel %vm336_vm1, %v313_v20, %v314_v23  ;;  %v1653_v50 = vunpack.c.l.b16 %v1639_v45  ;;  %v413_v52 = vrot.slane %v5678_v44, 1 }
  0x23   : > { %4826 = vrot.lane.b32.xlu0 %v4825_v38, %s5444_s9  ;;  %4846 = vrot.lane.b32.xlu1 %v4845_v39, %s5445_s10  ;;  %v5654_v29 = vsel %vm269_vm3, %v358_v24, 0.0  ;;  %v453_v30 = vsel %vm432_vm2, %v410_v25, %v411_v26  ;;  %v454_v34 = vsel %vm432_vm2, %v409_v4, %v410_v25  ;;  %v5010_v63 = vpack.i.bf16 %v283_v22, %v5638_v19 }
  0x24   : > { %v4955_v31 = vpack.i.bf16 %v5650_v28, %v5654_v29  ;;  %v4975_v41 = vpack.i.bf16 %v454_v34, %v474_v14  ;;  %v415_v19 = vrot.slane %v5729_v11, 1 }
  0x28   : > { %4851 = vrot.lane.b32.xlu2 %v4850_v40, %s5439_s28  ;;  %v315_v40 = vrot.slane %v283_v22, 7 }
  0x2b   : > { %4856 = vrot.lane.b32.xlu0 %v4855_v43, %s5441_s30  ;;  %4861 = vrot.lane.b32.xlu1 %v4840_v35, %s5442_s7  ;;  %v476_v35 = vsel %vm272_vm0, %v453_v30, 0.0  ;;  %v356_v43 = vsel %vm336_vm1, %v314_v23, %v315_v40 }
  0x2c   : > { %v4965_v37 = vpack.i.bf16 %v476_v35, %v454_v34  ;;  %v5691_v49 = vsel %vm269_vm3, %v356_v43, 0.0 }
  0x30   : > { %4866 = vrot.lane.b32.xlu2 %v4825_v38, %s5438_s27  ;;  %v4970_v38 = vpack.i.bf16 %v281_v61, %v280_v59  ;;  %v4707_v59 = vld [vmem:[%s8248_s1 + $0x8] sm:$0xff] }
  0x33   : > { %4871 = vrot.lane.b32.xlu0 %v4845_v39, %s5440_s29  ;;  %4876 = vrot.lane.b32.xlu1 %v4875_v51, %s5443_s8  ;;  %v5671_v39 = vld [vmem:[%s5504_s26 + $0x58] sm:$0xff] }
  0x34   : > { %v316_v42 = vrot.slane %v5671_v39, 7 }
  0x36   : > { %v5687_v46 = vsel %vm336_vm1, %v315_v40, %v316_v42 }
  0x37   : > { %v4995_v54 = vpack.i.bf16 %v5687_v46, %v5691_v49 }
  0x38   : > { %4881 = vrot.lane.b32.xlu2 %v4880_v53, %s5444_s9 }
  0x3b   : > { %4886 = vrot.lane.b32.xlu0 %v4885_v56, %s5445_s10  ;;  %4891 = vrot.lane.b32.xlu1 %v4890_v57, %s5439_s28 }
  0x40   : > { %4896 = vrot.lane.b32.xlu2 %v4895_v58, %s5441_s30  ;;  %v5000_v58 = vpack.i.bf16 %v5671_v39, %v283_v22 }
  0x43   : > { %4901 = vrot.lane.b32.xlu0 %v4875_v51, %s5442_s7  ;;  %4906 = vrot.lane.b32.xlu1 %v4880_v53, %s5438_s27  ;;  %v412_v51 = vrot.slane %v5671_v39, 1  ;;  %v1656_v53 = vpack.c.b16 %v1653_v50, %v1653_v50  ;;  %v5050_v50 = vpack.i.bf16 %v5678_v44, %v5671_v39 }
  0x45   : > { %v1710_v55 = vsel %vm1708_vm4, %v1656_v53, 0  ;;  %v451_v57 = vsel %vm432_vm2, %v412_v51, %v413_v52  ;;  %v452_v60 = vsel %vm432_vm2, %v411_v26, %v412_v51 }
  0x46   : > { %1717 = vmatpush.bf16.msra.mxu0 %v1710_v55  ;;  %4780 = vmatpush.bf16.msra.mxu3 %v1710_v55  ;;  %v5712_v61 = vsel %vm272_vm0, %v451_v57, 0.0  ;;  %v5015_v8 = vpack.i.bf16 %v452_v60, %v476_v35 }
  0x47   : > { %v5005_v62 = vpack.i.bf16 %v5712_v61, %v452_v60  ;;  %v319_v60 = vrot.slane %v5729_v11, 7 }
  0x48   : > { %4911 = vrot.lane.b32.xlu2 %v4885_v56, %s5440_s29 }
  0x4a   : > { %1718 = vmatpush.bf16.msra.mxu0 %v4707_v59  ;;  %4781 = vmatpush.bf16.msra.mxu3 %v4707_v59  ;;  %v5789_v59 = vld [vmem:[%s5504_s26 + $0x78] sm:$0xff] }
  0x4b   : > { %4916 = vrot.lane.b32.xlu0 %v4915_v9, %s5443_s8  ;;  %4921 = vrot.lane.b32.xlu1 %v4920_v10, %s5444_s9 }
  0x4e   : > { %1719 = vmatpush.bf16.msra.mxu0 %v4706_v0  ;;  %4782 = vmatpush.bf16.msra.mxu3 %v4706_v0 }
  0x50   : > { %4926 = vrot.lane.b32.xlu2 %v4925_v15, %s5445_s10 }
  0x53   : > { %4931 = vrot.lane.b32.xlu0 %v4930_v16, %s5439_s28  ;;  %4936 = vrot.lane.b32.xlu1 %v4935_v18, %s5441_s30 }
  0x58   : > { %4941 = vrot.lane.b32.xlu2 %v4915_v9, %s5442_s7  ;;  %v5725_v9 = vld [vmem:[%s5504_s26 + $0x68] sm:$0xff] }
  0x59   : > { %v318_v14 = vrot.slane %v5725_v9, 7  ;;  %v414_v18 = vrot.slane %v5725_v9, 1  ;;  %v5760_v30 = vpack.i.bf16 %v5725_v9, %v5678_v44 }
  0x5b   : > { %4946 = vrot.lane.b32.xlu0 %v4920_v10, %s5438_s27  ;;  %4951 = vrot.lane.b32.xlu1 %v4925_v15, %s5440_s29  ;;  %v317_v10 = vrot.slane %v5678_v44, 7  ;;  %v449_v25 = vsel %vm432_vm2, %v414_v18, %v415_v19 }
  0x5c   : > { %v5766_v34 = vsel %vm272_vm0, %v449_v25, 0.0  ;;  %v352_v25 = vsel %vm336_vm1, %v318_v14, %v319_v60 }
  0x5d   : > { %v354_v16 = vsel %vm336_vm1, %v316_v42, %v317_v10  ;;  %v5743_v20 = vsel %vm336_vm1, %v317_v10, %v318_v14 }
  0x5e   : > { %v5747_v22 = vsel %vm269_vm3, %v354_v16, 0.0 }
  0x5f   : > { %v5035_v26 = vpack.i.bf16 %v5743_v20, %v5747_v22 }
  0x60   : > { %4956 = vrot.lane.b32.xlu2 %v4955_v31, %s5443_s8 }
  0x63   : > { %4961 = vrot.lane.b32.xlu0 %v4960_v36, %s5444_s9  ;;  %4966 = vrot.lane.b32.xlu1 %v4965_v37, %s5445_s10 }
  0x68   : > { %4971 = vrot.lane.b32.xlu2 %v4970_v38, %s5439_s28 }
  0x6b   : > { %4976 = vrot.lane.b32.xlu0 %v4975_v41, %s5441_s30  ;;  %4981 = vrot.lane.b32.xlu1 %v4955_v31, %s5442_s7  ;;  %v450_v31 = vsel %vm432_vm2, %v413_v52, %v414_v18 }
  0x6c   : > { %v5055_v51 = vpack.i.bf16 %v450_v31, %v5712_v61 }
  0x70   : > { %4986 = vrot.lane.b32.xlu2 %v4960_v36, %s5438_s27 }
  0x72   : > { %v5698_v56 = vpop.permute.xlu2 %4836 }
  0x73   : > { %4991 = vrot.lane.b32.xlu0 %v4965_v37, %s5440_s29  ;;  %4996 = vrot.lane.b32.xlu1 %v4995_v54, %s5443_s8  ;;  %v5045_v37 = vpack.i.bf16 %v5766_v34, %v450_v31  ;;  %v4838_v39 = vunpack.i.l.bf16 %v5698_v56  ;;  %v416_v31 = vrot.slane %v5789_v59, 1 }
  0x78   : > { %5001 = vrot.lane.b32.xlu2 %v5000_v58, %s5444_s9 }
  0x7a   : > { %v5720_v4 = vpop.permute.xlu2 %4841 }
  0x7b   : > { %5006 = vrot.lane.b32.xlu0 %v5005_v62, %s5445_s10  ;;  %5011 = vrot.lane.b32.xlu1 %v5010_v63, %s5439_s28  ;;  %v5797_v63 = vld [vmem:[%s5504_s26 + $0x80] sm:$0xff]  ;;  %v4844_v0 = vunpack.i.h.bf16 %v5720_v4  ;;  %v4843_v16 = vunpack.i.l.bf16 %v5720_v4 }
  0x80   : > { %5016 = vrot.lane.b32.xlu2 %v5015_v8, %s5441_s30 }
  0x82   : > { %v5733_v15 = vpop.permute.xlu2 %4851 }
  0x83   : > { %5021 = vrot.lane.b32.xlu0 %v4995_v54, %s5442_s7  ;;  %5026 = vrot.lane.b32.xlu1 %v5000_v58, %s5438_s27 }
  0x85   : > { %v4817_v23 = vpop.permute.xlu1 %4816  ;;  %v5749_v24 = vpop.permute.xlu0 %4811 }
  0x86   : > { %v4813_v36 = vunpack.i.l.bf16 %v5749_v24  ;;  %v4819_v52 = vunpack.i.h.bf16 %v4817_v23  ;;  %v4818_v53 = vunpack.i.l.bf16 %v4817_v23 }
  0x88   : > { %5031 = vrot.lane.b32.xlu2 %v5005_v62, %s5440_s29  ;;  %v1358_v45 = vsel %vm1357_vm5, 0.0, %v4813_v36  ;;  %v4839_v62 = vunpack.i.h.bf16 %v5698_v56  ;;  %v320_v56 = vrot.slane %v5789_v59, 7  ;;  %v417_v36 = vrot.slane %v5797_v63, 1 }
  0x8a   : > { %v5768_v35 = vpop.permute.xlu2 %4866  ;;  %v5819_v14 = vsel %vm336_vm1, %v319_v60, %v320_v56 }
  0x8b   : > { %5036 = vrot.lane.b32.xlu0 %v5035_v26, %s5443_s8  ;;  %5041 = vrot.lane.b32.xlu1 %v5760_v30, %s5444_s9 }
  0x8d   : > { %v5775_v38 = vpop.permute.xlu0 %4821  ;;  %v4832_v40 = vpop.permute.xlu1 %4831 }
  0x8e   : > { %v4823_v41 = vunpack.i.l.bf16 %v5775_v38  ;;  %v4834_v42 = vunpack.i.h.bf16 %v4832_v40  ;;  %v4833_v43 = vunpack.i.l.bf16 %v4832_v40 }
  0x90   : > { %5046 = vrot.lane.b32.xlu2 %v5045_v37, %s5445_s10  ;;  %v1390_v54 = vsel %vm1389_vm6, %v1358_v45, %v4823_v41 }
  0x91   : > { %v1423_v55 = vsel %vm1421_vm7, %v1390_v54, %v4834_v42  ;;  %v1422_v57 = vsel %vm1421_vm7, %v1390_v54, %v4833_v43 }
  0x92   : > { %v5786_v58 = vpop.permute.xlu2 %4881  ;;  %v1456_v44 = vsel %vm1454_vm8, %v1423_v55, %v4819_v52  ;;  %v1455_v61 = vsel %vm1454_vm8, %v1422_v57, %v4818_v53  ;;  %v5823_v52 = vsel %vm269_vm3, %v352_v25, 0.0  ;;  %v447_v55 = vsel %vm432_vm2, %v416_v31, %v417_v36 }
  0x93   : > { %5051 = vrot.lane.b32.xlu0 %v5050_v50, %s5439_s28  ;;  %5056 = vrot.lane.b32.xlu1 %v5055_v51, %s5441_s30  ;;  %v1488_v8 = vsel %vm1487_vm9, %v1455_v61, %v4838_v39  ;;  %v1489_v10 = vsel %vm1487_vm9, %v1456_v44, %v4839_v62  ;;  %v5075_v60 = vpack.i.bf16 %v5819_v14, %v5823_v52  ;;  %v5845_v39 = vsel %vm272_vm0, %v447_v55, 0.0 }
  0x94   : > { %v1521_v45 = vsel %vm1520_vm10, %v1488_v8, %v4843_v16  ;;  %v1522_v50 = vsel %vm1520_vm10, %v1489_v10, %v4844_v0  ;;  %v448_v62 = vsel %vm432_vm2, %v415_v19, %v416_v31  ;;  %v4853_v44 = vunpack.i.l.bf16 %v5733_v15 }
  0x95   : > { %v4827_v18 = vpop.permute.xlu0 %4826  ;;  %v4847_v23 = vpop.permute.xlu1 %4846  ;;  %v4814_v0 = vunpack.i.h.bf16 %v5749_v24  ;;  %v5080_v8 = vpack.i.bf16 %v5789_v59, %v5729_v11  ;;  %v5085_v19 = vpack.i.bf16 %v5845_v39, %v448_v62  ;;  %v4824_v10 = vunpack.i.h.bf16 %v5775_v38 }
  0x96   : > { %v4829_v40 = vunpack.i.h.bf16 %v4827_v18  ;;  %v4828_v41 = vunpack.i.l.bf16 %v4827_v18  ;;  %v4849_v42 = vunpack.i.h.bf16 %v4847_v23  ;;  %v4848_v43 = vunpack.i.l.bf16 %v4847_v23 }
  0x97   : > { %v1360_v16 = vsel %vm1357_vm5, %v5539_v21, %v4853_v44  ;;  %v1359_v24 = vsel %vm1357_vm5, %v5550_v27, %v4814_v0  ;;  %v4869_v38 = vunpack.i.h.bf16 %v5768_v35  ;;  %v4868_v21 = vunpack.i.l.bf16 %v5768_v35 }
  0x98   : > { %5061 = vrot.lane.b32.xlu2 %v5035_v26, %s5442_s7  ;;  %v1554_v4 = vsel %vm1553_vm11, %v1521_v45, %v4828_v41  ;;  %v1555_v51 = vsel %vm1553_vm11, %v1522_v50, %v4829_v40  ;;  %v5090_v40 = vpack.i.bf16 %v5729_v11, %v5725_v9  ;;  %v1391_v41 = vsel %vm1389_vm6, %v1359_v24, %v4824_v10 }
  0x99   : > { %v1587_v54 = vsel %vm1586_vm12, %v1554_v4, %v4848_v43  ;;  %v1588_v26 = vsel %vm1586_vm12, %v1555_v51, %v4849_v42  ;;  %v5872_v42 = vld [vmem:[%s5504_s26 + $0x88] sm:$0xff]  ;;  %v321_v4 = vrot.slane %v5797_v63, 7  ;;  %v5095_v9 = vpack.i.bf16 %v448_v62, %v5766_v34  ;;  %v5891_v34 = vld [vmem:[%s5504_s26 + $0x90] sm:$0xff] }
  0x9a   : > { %v5825_v53 = vpop.permute.xlu2 %4896  ;;  %v1619_v57 = vpack.c.bf16 %v1588_v26, %v1587_v54  ;;  %v322_v11 = vrot.slane %v5872_v42, 7  ;;  %v4884_v62 = vunpack.i.h.bf16 %v5786_v58  ;;  %v4883_v10 = vunpack.i.l.bf16 %v5786_v58 }
  0x9b   : > { %5066 = vrot.lane.b32.xlu0 %v5760_v30, %s5438_s27  ;;  %5071 = vrot.lane.b32.xlu1 %v5045_v37, %s5440_s29  ;;  %v350_v0 = vsel %vm336_vm1, %v320_v56, %v321_v4  ;;  %v418_v24 = vrot.slane %v5872_v42, 1 }
  0x9c   : > { %3993 = vmatmul.msk.bf16.vlgmr.msra.gmra.mxu0 %vm1659_vm13, %v1619_v57  ;;  %v5907_v56 = vsel %vm269_vm3, %v350_v0, 0.0 }
  0x9d   : > { %v5848_v61 = vpop.permute.xlu0 %4856  ;;  %v4862_v30 = vpop.permute.xlu1 %4861 }
  0x9e   : > { %v4858_v37 = vunpack.i.l.bf16 %v5848_v61  ;;  %v4864_v18 = vunpack.i.h.bf16 %v4862_v30  ;;  %v4863_v23 = vunpack.i.l.bf16 %v4862_v30 }
  0xa0   : > { %5076 = vrot.lane.b32.xlu2 %v5075_v60, %s5443_s8  ;;  %v1392_v31 = vsel %vm1389_vm6, %v1360_v16, %v4858_v37  ;;  %v1424_v43 = vsel %vm1421_vm7, %v1391_v41, %v4863_v23  ;;  %v5903_v23 = vsel %vm336_vm1, %v321_v4, %v322_v11 }
  0xa1   : > { %v1425_v45 = vsel %vm1421_vm7, %v1392_v31, %v4864_v18  ;;  %v1457_v35 = vsel %vm1454_vm8, %v1424_v43, %v4868_v21  ;;  %v5916_v21 = vpack.i.bf16 %v5903_v23, %v5907_v56 }
  0xa2   : > { %v5859_v25 = vpop.permute.xlu2 %4911  ;;  %v1458_v26 = vsel %vm1454_vm8, %v1425_v45, %v4869_v38 }
  0xa3   : > { %5081 = vrot.lane.b32.xlu0 %v5080_v8, %s5444_s9  ;;  %5086 = vrot.lane.b32.xlu1 %v5085_v19, %s5445_s10 }
  0xa5   : > { %v4872_v27 = vpop.permute.xlu0 %4871  ;;  %v4877_v50 = vpop.permute.xlu1 %4876 }
  0xa6   : > { %v4874_v51 = vunpack.i.h.bf16 %v4872_v27  ;;  %v4873_v54 = vunpack.i.l.bf16 %v4872_v27  ;;  %v4879_v55 = vunpack.i.h.bf16 %v4877_v50  ;;  %v4878_v57 = vunpack.i.l.bf16 %v4877_v50 }
  0xa8   : > { %5091 = vrot.lane.b32.xlu2 %v5090_v40, %s5439_s28  ;;  %v1490_v44 = vsel %vm1487_vm9, %v1457_v35, %v4873_v54  ;;  %v1491_v30 = vsel %vm1487_vm9, %v1458_v26, %v4874_v51  ;;  %v4854_v54 = vunpack.i.h.bf16 %v5733_v15  ;;  %v4898_v35 = vunpack.i.l.bf16 %v5825_v53 }
  0xa9   : > { %v1523_v16 = vsel %vm1520_vm10, %v1490_v44, %v4878_v57  ;;  %v1524_v18 = vsel %vm1520_vm10, %v1491_v30, %v4879_v55  ;;  %v4859_v26 = vunpack.i.h.bf16 %v5848_v61  ;;  %v446_v55 = vsel %vm432_vm2, %v417_v36, %v418_v24 }
  0xaa   : > { %v5884_v37 = vpop.permute.xlu2 %4926  ;;  %v1556_v41 = vsel %vm1553_vm11, %v1523_v16, %v4883_v10  ;;  %v1557_v43 = vsel %vm1553_vm11, %v1524_v18, %v4884_v62  ;;  %v1361_v61 = vsel %vm1357_vm5, %v5564_v33, %v4854_v54  ;;  %v5130_v36 = vpack.i.bf16 %v5797_v63, %v5789_v59 }
  0xab   : > { %5096 = vrot.lane.b32.xlu0 %v5095_v9, %s5441_s30  ;;  %5101 = vrot.lane.b32.xlu1 %v5075_v60, %s5442_s7  ;;  %v419_v60 = vrot.slane %v5891_v34, 1  ;;  %v5120_v9 = vpack.i.bf16 %v5872_v42, %v5797_v63  ;;  %v1393_v10 = vsel %vm1389_vm6, %v1361_v61, %v4859_v26  ;;  %v4914_v33 = vunpack.i.h.bf16 %v5859_v25 }
  0xac   : > { %v5135_v59 = vpack.i.bf16 %v446_v55, %v5845_v39 }
  0xad   : > { %v4887_v31 = vpop.permute.xlu0 %4886  ;;  %v5909_v58 = vpop.permute.xlu1 %4891 }
  0xae   : > { %v4889_v40 = vunpack.i.h.bf16 %v4887_v31  ;;  %v4888_v38 = vunpack.i.l.bf16 %v4887_v31  ;;  %v4893_v50 = vunpack.i.l.bf16 %v5909_v58 }
  0xb0   : > { %5106 = vrot.lane.b32.xlu2 %v5080_v8, %s5438_s27  ;;  %v1589_v45 = vsel %vm1586_vm12, %v1556_v41, %v4888_v38  ;;  %v1590_v27 = vsel %vm1586_vm12, %v1557_v43, %v4889_v40  ;;  %v445_v8 = vsel %vm432_vm2, %v418_v24, %v419_v60  ;;  %v4913_v38 = vunpack.i.l.bf16 %v5859_v25  ;;  %v5971_v25 = vld [vmem:[%s5504_s26 + $0x98] sm:$0xff] }
  0xb1   : > { %v1620_v51 = vpack.c.bf16 %v1590_v27, %v1589_v45  ;;  %v5944_v15 = vsel %vm272_vm0, %v445_v8, 0.0  ;;  %v323_v43 = vrot.slane %v5891_v34, 7  ;;  %v4929_v45 = vunpack.i.h.bf16 %v5884_v37 }
  0xb2   : > { %v5923_v4 = vpop.permute.xlu2 %4941  ;;  %v5125_v62 = vpack.i.bf16 %v5944_v15, %v446_v55  ;;  %v4928_v27 = vunpack.i.l.bf16 %v5884_v37 }
  0xb3   : > { %5111 = vrot.lane.b32.xlu0 %v5085_v19, %s5440_s29  ;;  %5116 = vrot.lane.b32.xlu1 %v5916_v21, %s5443_s8  ;;  %v1362_v19 = vsel %vm1357_vm5, %v5560_v32, %v4893_v50 }
  0xb4   : > { %3994 = vmatmul.msk.bf16.gmra.mxu0 %vm1659_vm13, %v1620_v51  ;;  %v1394_v16 = vsel %vm1389_vm6, %v1362_v19, %v4898_v35  ;;  %v5974_v19 = vld [vmem:[%s5504_s26 + $0xa0] sm:$0xff] }
  0xb5   : > { %v4902_v57 = vpop.permute.xlu0 %4901  ;;  %v4907_v44 = vpop.permute.xlu1 %4906 }
  0xb6   : > { %v4904_v30 = vunpack.i.h.bf16 %v4902_v57  ;;  %v4903_v0 = vunpack.i.l.bf16 %v4902_v57  ;;  %v4909_v18 = vunpack.i.h.bf16 %v4907_v44  ;;  %v4908_v32 = vunpack.i.l.bf16 %v4907_v44 }
  0xb7   : > { %v324_v44 = vrot.slane %v5971_v25, 7 }
  0xb8   : > { %5121 = vrot.lane.b32.xlu2 %v5120_v9, %s5444_s9  ;;  %v1426_v31 = vsel %vm1421_vm7, %v1393_v10, %v4903_v0  ;;  %v1427_v24 = vsel %vm1421_vm7, %v1394_v16, %v4904_v30  ;;  %v348_v30 = vsel %vm336_vm1, %v322_v11, %v323_v43  ;;  %v420_v10 = vrot.slane %v5971_v25, 1 }
  0xb9   : > { %v1459_v63 = vsel %vm1454_vm8, %v1426_v31, %v4908_v32  ;;  %v1460_v41 = vsel %vm1454_vm8, %v1427_v24, %v4909_v18  ;;  %v421_v16 = vrot.slane %v5974_v19, 1  ;;  %v6001_v31 = vsel %vm336_vm1, %v323_v43, %v324_v44 }
  0xba   : > { %v5958_v40 = vpop.permute.xlu2 %4956  ;;  %v1492_v39 = vsel %vm1487_vm9, %v1459_v63, %v4913_v38  ;;  %v1493_v55 = vsel %vm1487_vm9, %v1460_v41, %v4914_v33  ;;  %v6005_v24 = vsel %vm269_vm3, %v348_v30, 0.0  ;;  %v5160_v41 = vpack.i.bf16 %v5971_v25, %v5891_v34 }
  0xbb   : > { %5126 = vrot.lane.b32.xlu0 %v5125_v62, %s5445_s10  ;;  %5131 = vrot.lane.b32.xlu1 %v5130_v36, %s5439_s28  ;;  %v5155_v63 = vpack.i.bf16 %v6001_v31, %v6005_v24  ;;  %v444_v43 = vsel %vm432_vm2, %v419_v60, %v420_v10 }
  0xbd   : > { %v4917_v50 = vpop.permute.xlu0 %4916  ;;  %v4922_v51 = vpop.permute.xlu1 %4921 }
  0xbe   : > { %v4919_v8 = vunpack.i.h.bf16 %v4917_v50  ;;  %v4918_v54 = vunpack.i.l.bf16 %v4917_v50  ;;  %v4924_v35 = vunpack.i.h.bf16 %v4922_v51  ;;  %v4923_v26 = vunpack.i.l.bf16 %v4922_v51 }
  0xc0   : > { %5136 = vrot.lane.b32.xlu2 %v5135_v59, %s5441_s30  ;;  %v1525_v57 = vsel %vm1520_vm10, %v1492_v39, %v4918_v54  ;;  %v1526_v37 = vsel %vm1520_vm10, %v1493_v55, %v4919_v8  ;;  %v4944_v8 = vunpack.i.h.bf16 %v5923_v4  ;;  %v5170_v55 = vpack.i.bf16 %v5891_v34, %v5872_v42 }
  0xc1   : > { %v1558_v0 = vsel %vm1553_vm11, %v1525_v57, %v4923_v26  ;;  %v1559_v61 = vsel %vm1553_vm11, %v1526_v37, %v4924_v35  ;;  %v5175_v57 = vpack.i.bf16 %v444_v43, %v5944_v15  ;;  %v4959_v42 = vunpack.i.h.bf16 %v5958_v40 }
  0xc2   : > { %v5988_v36 = vpop.permute.xlu2 %4971  ;;  %v1591_v18 = vsel %vm1586_vm12, %v1558_v0, %v4928_v27  ;;  %v1592_v32 = vsel %vm1586_vm12, %v1559_v61, %v4929_v45  ;;  %v4958_v34 = vunpack.i.l.bf16 %v5958_v40 }
  0xc3   : > { %5141 = vrot.lane.b32.xlu0 %v5916_v21, %s5442_s7  ;;  %5146 = vrot.lane.b32.xlu1 %v5120_v9, %s5438_s27  ;;  %v1621_v11 = vpack.c.bf16 %v1592_v32, %v1591_v18  ;;  %v443_v21 = vsel %vm432_vm2, %v420_v10, %v421_v16  ;;  %v4894_v9 = vunpack.i.h.bf16 %v5909_v58  ;;  %v4899_v58 = vunpack.i.h.bf16 %v5825_v53  ;;  %v6057_v32 = vld [vmem:[%s5504_s26 + $0xa8] sm:$0xff] }
  0xc4   : > { %v6029_v45 = vsel %vm272_vm0, %v443_v21, 0.0  ;;  %v4943_v53 = vunpack.i.l.bf16 %v5923_v4  ;;  %v6061_v21 = vld [vmem:[%s5504_s26 + $0xb0] sm:$0xff] }
  0xc5   : > { %v6007_v33 = vpop.permute.xlu0 %4931  ;;  %v6009_v38 = vpop.permute.xlu1 %4936  ;;  %3995 = vmatmul.msk.bf16.gmra.mxu0 %vm1659_vm13, %v1621_v11  ;;  %v1363_v50 = vsel %vm1357_vm5, %v5593_v48, %v4894_v9  ;;  %v5165_v60 = vpack.i.bf16 %v6029_v45, %v444_v43  ;;  %v325_v11 = vrot.slane %v5974_v19, 7  ;;  %v423_v40 = vrot.slane %v6061_v21, 1 }
  0xc6   : > { %v4933_v59 = vunpack.i.l.bf16 %v6007_v33  ;;  %v4938_v27 = vunpack.i.l.bf16 %v6009_v38  ;;  %v1395_v54 = vsel %vm1389_vm6, %v1363_v50, %v4899_v58  ;;  %v422_v50 = vrot.slane %v6057_v32, 1 }
  0xc7   : > { %v1428_v37 = vsel %vm1421_vm7, %v1395_v54, %v4943_v53 }
  0xc8   : > { %5151 = vrot.lane.b32.xlu2 %v5125_v62, %s5440_s29  ;;  %v1364_v51 = vsel %vm1357_vm5, %v5589_v47, %v4933_v59  ;;  %v326_v59 = vrot.slane %v6057_v32, 7 }
  0xc9   : > { %v1396_v35 = vsel %vm1389_vm6, %v1364_v51, %v4938_v27  ;;  %v346_v27 = vsel %vm336_vm1, %v324_v44, %v325_v11 }
  0xca   : > { %v6033_v62 = vpop.permute.xlu2 %4986  ;;  %v1429_v4 = vsel %vm1421_vm7, %v1396_v35, %v4944_v8  ;;  %v6085_v44 = vsel %vm336_vm1, %v325_v11, %v326_v59 }
  0xcb   : > { %5156 = vrot.lane.b32.xlu0 %v5155_v63, %s5443_s8  ;;  %5161 = vrot.lane.b32.xlu1 %v5160_v41, %s5444_s9 }
  0xcd   : > { %v4947_v26 = vpop.permute.xlu0 %4946  ;;  %v4952_v48 = vpop.permute.xlu1 %4951 }
  0xce   : > { %v4949_v39 = vunpack.i.h.bf16 %v4947_v26  ;;  %v4948_v47 = vunpack.i.l.bf16 %v4947_v26  ;;  %v4954_v30 = vunpack.i.h.bf16 %v4952_v48  ;;  %v4953_v0 = vunpack.i.l.bf16 %v4952_v48 }
  0xd0   : > { %5166 = vrot.lane.b32.xlu2 %v5165_v60, %s5445_s10  ;;  %v1461_v61 = vsel %vm1454_vm8, %v1428_v37, %v4948_v47  ;;  %v1462_v10 = vsel %vm1454_vm8, %v1429_v4, %v4949_v39  ;;  %v6089_v47 = vsel %vm269_vm3, %v346_v27, 0.0  ;;  %v441_v4 = vsel %vm432_vm2, %v422_v50, %v423_v40 }
  0xd1   : > { %v1494_v15 = vsel %vm1487_vm9, %v1461_v61, %v4953_v0  ;;  %v1495_v9 = vsel %vm1487_vm9, %v1462_v10, %v4954_v30  ;;  %v5195_v0 = vpack.i.bf16 %v6085_v44, %v6089_v47  ;;  %v4722_v61 = vld [vmem:[%s8250_s3 + $0x70] sm:$0xff]  ;;  %v442_v10 = vsel %vm432_vm2, %v421_v16, %v422_v50 }
  0xd2   : > { %v6054_v18 = vpop.permute.xlu2 %5001  ;;  %v1527_v35 = vsel %vm1520_vm10, %v1494_v15, %v4958_v34  ;;  %v1528_v26 = vsel %vm1520_vm10, %v1495_v9, %v4959_v42  ;;  %v6116_v11 = vsel %vm272_vm0, %v441_v4, 0.0  ;;  %v5200_v16 = vpack.i.bf16 %v6057_v32, %v5974_v19 }
  0xd3   : > { %5171 = vrot.lane.b32.xlu0 %v5170_v55, %s5439_s28  ;;  %5176 = vrot.lane.b32.xlu1 %v5175_v57, %s5441_s30  ;;  %v4723_v55 = vld [vmem:[%s8250_s3 + $0x78] sm:$0xff]  ;;  %v6127_v9 = vpack.i.bf16 %v6116_v11, %v442_v10 }
  0xd4   : > { %2036 = vmatpush.bf16.msra.mxu1 %v4723_v55  ;;  %4783 = vmatpush.bf16.msra.mxu2 %v4723_v55 }
  0xd5   : > { %v4962_v43 = vpop.permute.xlu0 %4961  ;;  %v4967_v58 = vpop.permute.xlu1 %4966 }
  0xd6   : > { %v4964_v51 = vunpack.i.h.bf16 %v4962_v43  ;;  %v4963_v8 = vunpack.i.l.bf16 %v4962_v43  ;;  %v4969_v53 = vunpack.i.h.bf16 %v4967_v58  ;;  %v4968_v54 = vunpack.i.l.bf16 %v4967_v58 }
  0xd7   : > { %v4939_v43 = vunpack.i.h.bf16 %v6009_v38  ;;  %v5210_v38 = vpack.i.bf16 %v5974_v19, %v5971_v25  ;;  %v327_v25 = vrot.slane %v6061_v21, 7 }
  0xd8   : > { %5181 = vrot.lane.b32.xlu2 %v5155_v63, %s5442_s7  ;;  %v1560_v48 = vsel %vm1553_vm11, %v1527_v35, %v4963_v8  ;;  %v1561_v39 = vsel %vm1553_vm11, %v1528_v26, %v4964_v51  ;;  %2037 = vmatpush.bf16.msra.mxu1 %v4722_v61  ;;  %v6149_v35 = vld [vmem:[%s5504_s26 + $0xb8] sm:$0xff]  ;;  %v4720_v26 = vld [vmem:[%s8250_s3 + $0x60] sm:$0xff] }
  0xd9   : > { %v1593_v63 = vsel %vm1586_vm12, %v1560_v48, %v4968_v54  ;;  %v1594_v37 = vsel %vm1586_vm12, %v1561_v39, %v4969_v53  ;;  %4784 = vmatpush.bf16.msra.mxu2 %v4722_v61  ;;  %v4988_v54 = vunpack.i.l.bf16 %v6033_v62  ;;  %v328_v4 = vrot.slane %v6149_v35, 7 }
  0xda   : > { %v6094_v57 = vpop.permute.xlu2 %5016  ;;  %v1622_v30 = vpack.c.bf16 %v1594_v37, %v1593_v63 }
  0xdb   : > { %5186 = vrot.lane.b32.xlu0 %v5160_v41, %s5438_s27  ;;  %5191 = vrot.lane.b32.xlu1 %v5165_v60, %s5440_s29  ;;  %v4973_v41 = vunpack.i.l.bf16 %v5988_v36  ;;  %v4934_v60 = vunpack.i.h.bf16 %v6007_v33  ;;  %v4721_v33 = vld [vmem:[%s8250_s3 + $0x68] sm:$0xff] }
  0xdc   : > { %3996 = vmatmul.msk.bf16.gmra.mxu0 %vm1659_vm13, %v1622_v30  ;;  %2038 = vmatpush.bf16.msra.mxu1 %v4721_v33 }
  0xdd   : > { %v6120_v42 = vpop.permute.xlu0 %4976  ;;  %v4982_v34 = vpop.permute.xlu1 %4981  ;;  %v1366_v58 = vsel %vm1357_vm5, %v5619_v5, %v4973_v41  ;;  %v1365_v27 = vsel %vm1357_vm5, %v5623_v6, %v4934_v60  ;;  %4785 = vmatpush.bf16.msra.mxu2 %v4721_v33  ;;  %v4989_v6 = vunpack.i.h.bf16 %v6033_v62  ;;  %v5215_v62 = vpack.i.bf16 %v442_v10, %v6029_v45  ;;  %v6174_v10 = vld [vmem:[%s5504_s26 + $0xc0] sm:$0xff] }
  0xde   : > { %v4978_v15 = vunpack.i.l.bf16 %v6120_v42  ;;  %v4984_v50 = vunpack.i.h.bf16 %v4982_v34  ;;  %v4983_v51 = vunpack.i.l.bf16 %v4982_v34  ;;  %v1397_v5 = vsel %vm1389_vm6, %v1365_v27, %v4939_v43  ;;  %v4719_v34 = vld [vmem:[%s8250_s3 + $0x58] sm:$0xff] }
  0xdf   : > { %v344_v45 = vsel %vm336_vm1, %v326_v59, %v327_v25  ;;  %v5003_v27 = vunpack.i.l.bf16 %v6054_v18 }
  0xe0   : > { %5196 = vrot.lane.b32.xlu2 %v5195_v0, %s5443_s8  ;;  %v1398_v53 = vsel %vm1389_vm6, %v1366_v58, %v4978_v15  ;;  %v1430_v39 = vsel %vm1421_vm7, %v1397_v5, %v4983_v51  ;;  %2039 = vmatpush.bf16.msra.mxu1 %v4720_v26  ;;  %v5004_v58 = vunpack.i.h.bf16 %v6054_v18  ;;  %v6193_v18 = vsel %vm269_vm3, %v344_v45, 0.0 }
  0xe1   : > { %v1431_v48 = vsel %vm1421_vm7, %v1398_v53, %v4984_v50  ;;  %4786 = vmatpush.bf16.msra.mxu2 %v4720_v26  ;;  %v1463_v30 = vsel %vm1454_vm8, %v1430_v39, %v4988_v54  ;;  %v4718_v50 = vld [vmem:[%s8250_s3 + $0x50] sm:$0xff]  ;;  %v6189_v53 = vsel %vm336_vm1, %v327_v25, %v328_v4  ;;  %v424_v5 = vrot.slane %v6149_v35, 1 }
  0xe2   : > { %v6137_v8 = vpop.permute.xlu2 %5031  ;;  %v1464_v61 = vsel %vm1454_vm8, %v1431_v48, %v4989_v6  ;;  %v425_v6 = vrot.slane %v6174_v10, 1  ;;  %v6202_v48 = vpack.i.bf16 %v6189_v53, %v6193_v18 }
  0xe3   : > { %5201 = vrot.lane.b32.xlu0 %v5200_v16, %s5444_s9  ;;  %5206 = vrot.lane.b32.xlu1 %v6127_v9, %s5445_s10 }
  0xe4   : > { %2040 = vmatpush.bf16.msra.mxu1 %v4719_v34 }
  0xe5   : > { %v4992_v55 = vpop.permute.xlu0 %4991  ;;  %v4997_v63 = vpop.permute.xlu1 %4996  ;;  %4787 = vmatpush.bf16.msra.mxu2 %v4719_v34  ;;  %v4716_v34 = vld [vmem:[%s8250_s3 + $0x40] sm:$0xff] }
  0xe6   : > { %v4994_v19 = vunpack.i.h.bf16 %v4992_v55  ;;  %v4993_v37 = vunpack.i.l.bf16 %v4992_v55  ;;  %v4999_v41 = vunpack.i.h.bf16 %v4997_v63  ;;  %v4998_v60 = vunpack.i.l.bf16 %v4997_v63 }
  0xe8   : > { %5211 = vrot.lane.b32.xlu2 %v5210_v38, %s5439_s28  ;;  %v1496_v15 = vsel %vm1487_vm9, %v1463_v30, %v4993_v37  ;;  %v1497_v43 = vsel %vm1487_vm9, %v1464_v61, %v4994_v19  ;;  %2041 = vmatpush.bf16.msra.mxu1 %v4718_v50  ;;  %v4717_v19 = vld [vmem:[%s8250_s3 + $0x48] sm:$0xff]  ;;  %v439_v30 = vsel %vm432_vm2, %v424_v5, %v425_v6  ;;  %v4974_v61 = vunpack.i.h.bf16 %v5988_v36 }
  0xe9   : > { %v1529_v51 = vsel %vm1520_vm10, %v1496_v15, %v4998_v60  ;;  %v1530_v59 = vsel %vm1520_vm10, %v1497_v43, %v4999_v41  ;;  %4788 = vmatpush.bf16.msra.mxu2 %v4718_v50  ;;  %v4979_v41 = vunpack.i.h.bf16 %v6120_v42  ;;  %v5240_v60 = vpack.i.bf16 %v6149_v35, %v6061_v21 }
  0xea   : > { %v6167_v33 = vpop.permute.xlu2 %5046  ;;  %v1562_v39 = vsel %vm1553_vm11, %v1529_v51, %v5003_v27  ;;  %v1563_v55 = vsel %vm1553_vm11, %v1530_v59, %v5004_v58  ;;  %v5018_v15 = vunpack.i.l.bf16 %v6094_v57  ;;  %v440_v36 = vsel %vm432_vm2, %v423_v40, %v424_v5 }
  0xeb   : > { %5216 = vrot.lane.b32.xlu0 %v5215_v62, %s5441_s30  ;;  %5221 = vrot.lane.b32.xlu1 %v5195_v0, %s5442_s7  ;;  %v6237_v42 = vsel %vm272_vm0, %v439_v30, 0.0  ;;  %v1367_v58 = vsel %vm1357_vm5, %v5654_v29, %v4974_v61  ;;  %v5250_v59 = vpack.i.bf16 %v6061_v21, %v6057_v32  ;;  %v5255_v32 = vpack.i.bf16 %v440_v36, %v6116_v11 }
  0xec   : > { %2042 = vmatpush.bf16.msra.mxu1 %v4717_v19  ;;  %v1399_v51 = vsel %vm1389_vm6, %v1367_v58, %v4979_v41  ;;  %v5245_v40 = vpack.i.bf16 %v6237_v42, %v440_v36 }
  0xed   : > { %v5007_v38 = vpop.permute.xlu0 %5006  ;;  %v6195_v0 = vpop.permute.xlu1 %5011  ;;  %4789 = vmatpush.bf16.msra.mxu2 %v4717_v19  ;;  %v329_v19 = vrot.slane %v6174_v10, 7 }
  0xee   : > { %v5009_v54 = vunpack.i.h.bf16 %v5007_v38  ;;  %v5008_v26 = vunpack.i.l.bf16 %v5007_v38  ;;  %v5013_v37 = vunpack.i.l.bf16 %v6195_v0 }
  0xf0   : > { %5226 = vrot.lane.b32.xlu2 %v5200_v16, %s5438_s27  ;;  %v1595_v63 = vsel %vm1586_vm12, %v1562_v39, %v5008_v26  ;;  %v1596_v25 = vsel %vm1586_vm12, %v1563_v55, %v5009_v54  ;;  %2043 = vmatpush.bf16.msra.mxu1 %v4716_v34  ;;  %v8256_v39 = vmov 0.0|0.0   ;;  %v5034_v55 = vunpack.i.h.bf16 %v6137_v8 }
  0xf1   : > { %v1623_v16 = vpack.c.bf16 %v1596_v25, %v1595_v63  ;;  %4790 = vmatpush.bf16.msra.mxu2 %v4716_v34  ;;  %v5033_v63 = vunpack.i.l.bf16 %v6137_v8  ;;  %v6265_v8 = vld [vmem:[%s5504_s26 + $0xc8] sm:$0xff] }
  0xf2   : > { %v6212_v62 = vpop.permute.xlu2 %5061  ;;  %v330_v58 = vrot.slane %v6265_v8, 7 }
  0xf3   : > { %5231 = vrot.lane.b32.xlu0 %v6127_v9, %s5440_s29  ;;  %5236 = vrot.lane.b32.xlu1 %v6202_v48, %s5443_s8  ;;  %v1368_v9 = vsel %vm1357_vm5, %v5650_v28, %v5013_v37  ;;  %v5049_v37 = vunpack.i.h.bf16 %v6167_v33 }
  0xf4   : > { %3997 = vmatmul.msk.bf16.gmra.mxu0 %vm1659_vm13, %v1623_v16  ;;  %v1400_v28 = vsel %vm1389_vm6, %v1368_v9, %v5018_v15  ;;  %2044 = vmatmul.bf16.vlgmr.msra.gmra.mxu1 %v8256_v39  ;;  %v5048_v16 = vunpack.i.l.bf16 %v6167_v33 }
  0xf5   : > { %v5022_v43 = vpop.permute.xlu0 %5021  ;;  %v5027_v45 = vpop.permute.xlu1 %5026 }
  0xf6   : > { %v5024_v27 = vunpack.i.h.bf16 %v5022_v43  ;;  %v5023_v50 = vunpack.i.l.bf16 %v5022_v43  ;;  %v5029_v38 = vunpack.i.h.bf16 %v5027_v45  ;;  %v5028_v5 = vunpack.i.l.bf16 %v5027_v45  ;;  %v6268_v43 = vld [vmem:[%s5504_s26 + $0xd0] sm:$0xff] }
  0xf8   : > { %5241 = vrot.lane.b32.xlu2 %v5240_v60, %s5444_s9  ;;  %v1432_v54 = vsel %vm1421_vm7, %v1399_v51, %v5023_v50  ;;  %v1433_v29 = vsel %vm1421_vm7, %v1400_v28, %v5024_v27  ;;  %v342_v27 = vsel %vm336_vm1, %v328_v4, %v329_v19  ;;  %v426_v28 = vrot.slane %v6265_v8, 1 }
  0xf9   : > { %v1465_v21 = vsel %vm1454_vm8, %v1432_v54, %v5028_v5  ;;  %v1466_v25 = vsel %vm1454_vm8, %v1433_v29, %v5029_v38  ;;  %v427_v38 = vrot.slane %v6268_v43, 1  ;;  %v6295_v29 = vsel %vm336_vm1, %v329_v19, %v330_v58 }
  0xfa   : > { %v6251_v26 = vpop.permute.xlu2 %5076  ;;  %v1498_v11 = vsel %vm1487_vm9, %v1465_v21, %v5033_v63  ;;  %v1499_v36 = vsel %vm1487_vm9, %v1466_v25, %v5034_v55  ;;  %v6299_v55 = vsel %vm269_vm3, %v342_v27, 0.0  ;;  %v5280_v19 = vpack.i.bf16 %v6265_v8, %v6174_v10 }
  0xfb   : > { %5246 = vrot.lane.b32.xlu0 %v5245_v40, %s5445_s10  ;;  %5251 = vrot.lane.b32.xlu1 %v5250_v59, %s5439_s28  ;;  %v5275_v25 = vpack.i.bf16 %v6295_v29, %v6299_v55 }
  0xfd   : > { %v5037_v30 = vpop.permute.xlu0 %5036  ;;  %v5042_v61 = vpop.permute.xlu1 %5041 }
  0xfe   : > { %v5039_v41 = vunpack.i.h.bf16 %v5037_v30  ;;  %v5038_v34 = vunpack.i.l.bf16 %v5037_v30  ;;  %v5044_v15 = vunpack.i.h.bf16 %v5042_v61  ;;  %v5043_v9 = vunpack.i.l.bf16 %v5042_v61 }
 0x100   : > { %5256 = vrot.lane.b32.xlu2 %v5255_v32, %s5441_s30  ;;  %v1531_v45 = vsel %vm1520_vm10, %v1498_v11, %v5038_v34  ;;  %v1532_v33 = vsel %vm1520_vm10, %v1499_v36, %v5039_v41  ;;  %v5064_v34 = vunpack.i.h.bf16 %v6212_v62 }
 0x101   : > { %v1564_v50 = vsel %vm1553_vm11, %v1531_v45, %v5043_v9  ;;  %v1565_v51 = vsel %vm1553_vm11, %v1532_v33, %v5044_v15  ;;  %v5290_v45 = vpack.i.bf16 %v6174_v10, %v6149_v35  ;;  %v5079_v35 = vunpack.i.h.bf16 %v6251_v26 }
 0x102   : > { %v6282_v59 = vpop.permute.xlu2 %5091  ;;  %v1597_v5 = vsel %vm1586_vm12, %v1564_v50, %v5048_v16  ;;  %v1598_v54 = vsel %vm1586_vm12, %v1565_v51, %v5049_v37  ;;  %v438_v37 = vsel %vm432_vm2, %v425_v6, %v426_v28  ;;  %v5078_v10 = vunpack.i.l.bf16 %v6251_v26 }
 0x103   : > { %5261 = vrot.lane.b32.xlu0 %v6202_v48, %s5442_s7  ;;  %5266 = vrot.lane.b32.xlu1 %v5240_v60, %s5438_s27  ;;  %v1624_v4 = vpack.c.bf16 %v1598_v54, %v1597_v5  ;;  %v437_v48 = vsel %vm432_vm2, %v426_v28, %v427_v38  ;;  %v5014_v60 = vunpack.i.h.bf16 %v6195_v0  ;;  %v5019_v0 = vunpack.i.h.bf16 %v6094_v57 }
 0x104   : > { %v6323_v16 = vsel %vm272_vm0, %v437_v48, 0.0  ;;  %v5063_v57 = vunpack.i.l.bf16 %v6212_v62  ;;  %v5295_v33 = vpack.i.bf16 %v438_v37, %v6237_v42  ;;  %v331_v48 = vrot.slane %v6268_v43, 7 }
 0x105   : > { %v6301_v63 = vpop.permute.xlu0 %5051  ;;  %v6303_v32 = vpop.permute.xlu1 %5056  ;;  %3998 = vmatmul.msk.bf16.gmra.mxu0 %vm1659_vm13, %v1624_v4  ;;  %v1369_v61 = vsel %vm1357_vm5, %v5691_v49, %v5014_v60  ;;  %v5285_v6 = vpack.i.bf16 %v6323_v16, %v438_v37  ;;  %v6351_v4 = vld [vmem:[%s5504_s26 + $0xd8] sm:$0xff]  ;;  %v6355_v60 = vld [vmem:[%s5504_s26 + $0xe0] sm:$0xff] }
 0x106   : > { %v5053_v21 = vunpack.i.l.bf16 %v6301_v63  ;;  %v5058_v30 = vunpack.i.l.bf16 %v6303_v32  ;;  %v1401_v15 = vsel %vm1389_vm6, %v1369_v61, %v5019_v0  ;;  %v332_v37 = vrot.slane %v6351_v4, 7 }
 0x107   : > { %v1434_v27 = vsel %vm1421_vm7, %v1401_v15, %v5063_v57  ;;  %v340_v61 = vsel %vm336_vm1, %v330_v58, %v331_v48  ;;  %v429_v26 = vrot.slane %v6355_v60, 1 }
 0x108   : > { %5271 = vrot.lane.b32.xlu2 %v5245_v40, %s5440_s29  ;;  %v1370_v41 = vsel %vm1357_vm5, %v5687_v46, %v5053_v21  ;;  %v6379_v58 = vsel %vm336_vm1, %v331_v48, %v332_v37 }
 0x109   : > { %v1402_v9 = vsel %vm1389_vm6, %v1370_v41, %v5058_v30  ;;  %v428_v41 = vrot.slane %v6351_v4, 1 }
 0x10a   : > { %v6327_v40 = vpop.permute.xlu2 %5106  ;;  %v1435_v62 = vsel %vm1421_vm7, %v1402_v9, %v5064_v34 }
 0x10b   : > { %5276 = vrot.lane.b32.xlu0 %v5275_v25, %s5443_s8  ;;  %5281 = vrot.lane.b32.xlu1 %v5280_v19, %s5444_s9  ;;  %v436_v48 = vsel %vm432_vm2, %v427_v38, %v428_v41  ;;  %v5320_v38 = vpack.i.bf16 %v6351_v4, %v6268_v43 }
 0x10d   : > { %v5067_v11 = vpop.permute.xlu0 %5066  ;;  %v5072_v49 = vpop.permute.xlu1 %5071 }
 0x10e   : > { %v5069_v36 = vunpack.i.h.bf16 %v5067_v11  ;;  %v5068_v46 = vunpack.i.l.bf16 %v5067_v11  ;;  %v5074_v50 = vunpack.i.h.bf16 %v5072_v49  ;;  %v5073_v51 = vunpack.i.l.bf16 %v5072_v49 }
 0x110   : > { %5286 = vrot.lane.b32.xlu2 %v5285_v6, %s5445_s10  ;;  %v1467_v28 = vsel %vm1454_vm8, %v1434_v27, %v5068_v46  ;;  %v1468_v5 = vsel %vm1454_vm8, %v1435_v62, %v5069_v36 }
 0x111   : > { %v1500_v42 = vsel %vm1487_vm9, %v1467_v28, %v5073_v51  ;;  %v1501_v21 = vsel %vm1487_vm9, %v1468_v5, %v5074_v50  ;;  %v435_v50 = vsel %vm432_vm2, %v428_v41, %v429_v26  ;;  %v6396_v28 = vld [vmem:[%s8249_s2] ss:$0 sm:$0xff] }
 0x112   : > { %v6348_v54 = vpop.permute.xlu2 %5121  ;;  %v1533_v11 = vsel %vm1520_vm10, %v1500_v42, %v5078_v10  ;;  %v1534_v49 = vsel %vm1520_vm10, %v1501_v21, %v5079_v35  ;;  %v6409_v35 = vsel %vm272_vm0, %v435_v50, 0.0  ;;  %v5093_v10 = vunpack.i.l.bf16 %v6282_v59 }
 0x113   : > { %5291 = vrot.lane.b32.xlu0 %v5290_v45, %s5439_s28  ;;  %5296 = vrot.lane.b32.xlu1 %v5295_v33, %s5441_s30  ;;  %v6383_v45 = vsel %vm269_vm3, %v340_v61, 0.0  ;;  %v5059_v61 = vunpack.i.h.bf16 %v6303_v32  ;;  %v5109_v32 = vunpack.i.h.bf16 %v6327_v40 }
 0x114   : > { %v5315_v5 = vpack.i.bf16 %v6379_v58, %v6383_v45 }
 0x115   : > { %v5082_v0 = vpop.permute.xlu0 %5081  ;;  %v5087_v30 = vpop.permute.xlu1 %5086 }
 0x116   : > { %v5084_v34 = vunpack.i.h.bf16 %v5082_v0  ;;  %v5083_v57 = vunpack.i.l.bf16 %v5082_v0  ;;  %v5089_v15 = vunpack.i.h.bf16 %v5087_v30  ;;  %v5088_v9 = vunpack.i.l.bf16 %v5087_v30 }
 0x117   : > { %v6421_v30 = vpack.i.bf16 %v6409_v35, %v436_v48 }
 0x118   : > { %5301 = vrot.lane.b32.xlu2 %v5275_v25, %s5442_s7  ;;  %v1566_v36 = vsel %vm1553_vm11, %v1533_v11, %v5083_v57  ;;  %v1567_v46 = vsel %vm1553_vm11, %v1534_v49, %v5084_v34 }
 0x119   : > { %v1721_v27 = vpop.f32.mrf.mxu0  ;;  %v1599_v62 = vsel %vm1586_vm12, %v1566_v36, %v5088_v9  ;;  %v1600_v25 = vsel %vm1586_vm12, %v1567_v46, %v5089_v15  ;;  %v5108_v46 = vunpack.i.l.bf16 %v6327_v40 }
 0x11a   : > { %v6385_v33 = vpop.permute.xlu2 %5136  ;;  %v1625_v51 = vpack.c.bf16 %v1600_v25, %v1599_v62  ;;  %v1722_v0 = vadd.f32 %v6396_v28, %v1721_v27 }
 0x11b   : > { %5306 = vrot.lane.b32.xlu0 %v5280_v19, %s5438_s27  ;;  %5311 = vrot.lane.b32.xlu1 %v5285_v6, %s5440_s29  ;;  %v5054_v19 = vunpack.i.h.bf16 %v6301_v63  ;;  %v1372_v63 = vsel %vm1357_vm5, %v5743_v20, %v5093_v10  ;;  %v5330_v20 = vpack.i.bf16 %v6268_v43, %v6265_v8  ;;  %v6448_v8 = vld [vmem:[%s5504_s26 + $0xe8] sm:$0xff]  ;;  %v333_v43 = vrot.slane %v6355_v60, 7 }
 0x11c   : > { %3999 = vmatmul.msk.bf16.gmra.mxu0 %vm1659_vm13, %v1625_v51  ;;  %v6432_v36 = vmax.f32 %v1722_v0, 0.0  ;;  %v5335_v0 = vpack.i.bf16 %v436_v48, %v6323_v16 }
 0x11d   : > { %v6413_v42 = vpop.permute.xlu0 %5096  ;;  %v5102_v6 = vpop.permute.xlu1 %5101  ;;  %v1371_v41 = vsel %vm1357_vm5, %v5747_v22, %v5054_v19  ;;  %v338_v48 = vsel %vm336_vm1, %v332_v37, %v333_v43 }
 0x11e   : > { %v5098_v21 = vunpack.i.l.bf16 %v6413_v42  ;;  %v5104_v34 = vunpack.i.h.bf16 %v5102_v6  ;;  %v5103_v57 = vunpack.i.l.bf16 %v5102_v6  ;;  %v1403_v22 = vsel %vm1389_vm6, %v1371_v41, %v5059_v61 }
 0x11f   : > { %v6499_v37 = vsel %vm269_vm3, %v338_v48, 0.0 }
 0x120   : > { %5316 = vrot.lane.b32.xlu2 %v5315_v5, %s5443_s8  ;;  %v1404_v11 = vsel %vm1389_vm6, %v1372_v63, %v5098_v21  ;;  %v1436_v25 = vsel %vm1421_vm7, %v1403_v22, %v5103_v57  ;;  %v8254_v21 = vrot.slane %v6432_v36, 7  ;;  %v6461_v57 = vld [vmem:[%s5504_s26 + $0xf0] sm:$0xff]  ;;  %v5124_v22 = vunpack.i.h.bf16 %v6348_v54 }
 0x121   : > { %v1723_v9 = vpop.f32.mrf.mxu0  ;;  %v1437_v62 = vsel %vm1421_vm7, %v1404_v11, %v5104_v34  ;;  %v1469_v61 = vsel %vm1454_vm8, %v1436_v25, %v5108_v46  ;;  %v430_v46 = vrot.slane %v6448_v8, 1 }
 0x122   : > { %v6428_v15 = vpop.permute.xlu2 %5151  ;;  %v1724_v49 = vadd.f32 %v6396_v28, %v1723_v9  ;;  %v1470_v63 = vsel %vm1454_vm8, %v1437_v62, %v5109_v32  ;;  %v5123_v32 = vunpack.i.l.bf16 %v6348_v54  ;;  %v431_v62 = vrot.slane %v6461_v57, 1 }
 0x123   : > { %5321 = vrot.lane.b32.xlu0 %v5320_v38, %s5444_s9  ;;  %5326 = vrot.lane.b32.xlu1 %v6421_v30, %s5445_s10 }
 0x124   : > { %v6442_v27 = vmax.f32 %v1724_v49, 0.0 }
 0x125   : > { %v5112_v50 = vpop.permute.xlu0 %5111  ;;  %v5117_v51 = vpop.permute.xlu1 %5116 }
 0x126   : > { %v1834_v10 = vrot.slane %v6442_v27, 7  ;;  %v5114_v19 = vunpack.i.h.bf16 %v5112_v50  ;;  %v5113_v6 = vunpack.i.l.bf16 %v5112_v50  ;;  %v6455_v40 = vpack.c.bf16 %v6442_v27, %v6432_v36 }
 0x127   : > { %v5119_v41 = vunpack.i.h.bf16 %v5117_v51  ;;  %v5118_v34 = vunpack.i.l.bf16 %v5117_v51 }
 0x128   : > { %5331 = vrot.lane.b32.xlu2 %v5330_v20, %s5439_s28  ;;  %v1502_v9 = vsel %vm1487_vm9, %v1469_v61, %v5113_v6  ;;  %v1503_v11 = vsel %vm1487_vm9, %v1470_v63, %v5114_v19  ;;  %2049 = vmatmul.bf16.gmra.mxu1 %v6455_v40  ;;  %v334_v20 = vrot.slane %v6448_v8, 7  ;;  %v6475_v16 = vsel %vm336_vm1, %v8254_v21, %v1834_v10 }
 0x129   : > { %v1535_v25 = vsel %vm1520_vm10, %v1502_v9, %v5118_v34  ;;  %v1536_v50 = vsel %vm1520_vm10, %v1503_v11, %v5119_v41  ;;  %v433_v63 = vsel %vm432_vm2, %v430_v46, %v431_v62 }
 0x12a   : > { %v6466_v49 = vpop.permute.xlu2 %5166  ;;  %v6495_v54 = vsel %vm336_vm1, %v333_v43, %v334_v20  ;;  %v1569_v61 = vsel %vm1553_vm11, %v1536_v50, %v5124_v22  ;;  %v6525_v50 = vsel %vm272_vm0, %v433_v63, 0.0 }
 0x12b   : > { %5336 = vrot.lane.b32.xlu0 %v5335_v0, %s5441_s30  ;;  %5341 = vrot.lane.b32.xlu1 %v5315_v5, %s5442_s7  ;;  %v1568_v0 = vsel %vm1553_vm11, %v1535_v25, %v5123_v32  ;;  %v6513_v9 = vpack.i.bf16 %v6495_v54, %v6499_v37  ;;  %v434_v25 = vsel %vm432_vm2, %v429_v26, %v430_v46 }
 0x12c   : > { %v6545_v63 = vpack.i.bf16 %v6525_v50, %v434_v25 }
 0x12d   : > { %v5127_v51 = vpop.permute.xlu0 %5126  ;;  %v6489_v19 = vpop.permute.xlu1 %5131 }
 0x12e   : > { %v5129_v5 = vunpack.i.h.bf16 %v5127_v51  ;;  %v5128_v6 = vunpack.i.l.bf16 %v5127_v51  ;;  %v5133_v43 = vunpack.i.l.bf16 %v6489_v19  ;;  %v5138_v51 = vunpack.i.l.bf16 %v6385_v33 }
 0x12f   : > { %v5134_v12 = vunpack.i.h.bf16 %v6489_v19  ;;  %v5139_v19 = vunpack.i.h.bf16 %v6385_v33 }
 0x130   : > { %5346 = vrot.lane.b32.xlu2 %v5320_v38, %s5438_s27  ;;  %v1601_v41 = vsel %vm1586_vm12, %v1568_v0, %v5128_v6  ;;  %v1602_v34 = vsel %vm1586_vm12, %v1569_v61, %v5129_v5  ;;  %v5094_v38 = vunpack.i.h.bf16 %v6282_v59  ;;  %v5099_v5 = vunpack.i.h.bf16 %v6413_v42 }
 0x131   : > { %v1726_v11 = vpop.f32.mrf.mxu0  ;;  %v1626_v22 = vpack.c.bf16 %v1602_v34, %v1601_v41  ;;  %v2263_v59 = vrot.slane %v6442_v27, 1  ;;  %v6535_v6 = vpack.i.bf16 %v6448_v8, %v6355_v60  ;;  %v1374_v26 = vsel %vm1357_vm5, %v5819_v14, %v5133_v43 }
 0x132   : > { %v6516_v48 = vpop.permute.xlu2 %5181  ;;  %v1727_v32 = vadd.f32 %v6396_v28, %v1726_v11  ;;  %v1373_v42 = vsel %vm1357_vm5, %v5823_v52, %v5094_v38  ;;  %v8255_v0 = vrot.slane %v6432_v36, 1  ;;  %v5370_v41 = vpack.i.bf16 %v6355_v60, %v6351_v4 }
 0x133   : > { %5351 = vrot.lane.b32.xlu0 %v6421_v30, %s5440_s29  ;;  %4000 = vmatmul.msk.bf16.gmra.mxu0 %vm1659_vm13, %v1626_v22  ;;  %v1405_v22 = vsel %vm1389_vm6, %v1373_v42, %v5099_v5  ;;  %v5153_v5 = vunpack.i.l.bf16 %v6428_v15  ;;  %v5154_v27 = vunpack.i.h.bf16 %v6428_v15 }
 0x134   : > { %v1803_v46 = vmax.f32 %v1727_v32, 0.0  ;;  %5356 = vrot.lane.b32.xlu1 %v6513_v9, %s5443_s8  ;;  %v1406_v32 = vsel %vm1389_vm6, %v1374_v26, %v5138_v51  ;;  %v2322_v52 = vsel %vm432_vm2, %v8255_v0, %v2263_v59  ;;  %v497_v0 = vrot.slane %v6461_v57, 7 }
 0x135   : > { %v5142_v61 = vpop.permute.xlu0 %5141  ;;  %v5147_v30 = vpop.permute.xlu1 %5146 }
 0x136   : > { %v1835_v34 = vrot.slane %v1803_v46, 7  ;;  %v2264_v11 = vrot.slane %v1803_v46, 1  ;;  %v5144_v14 = vunpack.i.h.bf16 %v5142_v61  ;;  %v5143_v43 = vunpack.i.l.bf16 %v5142_v61 }
 0x137   : > { %v5148_v21 = vunpack.i.l.bf16 %v5147_v30  ;;  %v5149_v4 = vunpack.i.h.bf16 %v5147_v30  ;;  %v499_v15 = vsel %vm336_vm1, %v334_v20, %v497_v0 }
 0x138   : > { %5361 = vrot.lane.b32.xlu2 %v6535_v6, %s5444_s9  ;;  %v1438_v38 = vsel %vm1421_vm7, %v1405_v22, %v5143_v43  ;;  %v2321_v60 = vsel %vm432_vm2, %v2263_v59, %v2264_v11  ;;  %v1891_v51 = vsel %vm336_vm1, %v1834_v10, %v1835_v34  ;;  %v1439_v26 = vsel %vm1421_vm7, %v1406_v32, %v5144_v14 }
 0x139   : > { %v1728_v42 = vpop.f32.mrf.mxu0  ;;  %v6569_v39 = vpack.c.bf16 %v2321_v60, %v2322_v52  ;;  %v1471_v30 = vsel %vm1454_vm8, %v1438_v38, %v5148_v21  ;;  %v5375_v10 = vpack.i.bf16 %v434_v25, %v6409_v35  ;;  %v1472_v14 = vsel %vm1454_vm8, %v1439_v26, %v5149_v4 }
 0x13a   : > { %v6566_v61 = vpop.permute.xlu2 %5196  ;;  %v1729_v59 = vadd.f32 %v6396_v28, %v1728_v42  ;;  %v5169_v22 = vunpack.i.h.bf16 %v6466_v49  ;;  %v5168_v32 = vunpack.i.l.bf16 %v6466_v49  ;;  %v1504_v21 = vsel %vm1487_vm9, %v1471_v30, %v5153_v5 }
 0x13b   : > { %8284 = vst [vmem:[#allocation4_spill] sm:$0xff] %v6569_v39  ;;  %5366 = vrot.lane.b32.xlu0 %v6545_v63, %s5445_s10 }
 0x13c   : > { %v1804_v43 = vmax.f32 %v1729_v59, 0.0  ;;  %5371 = vrot.lane.b32.xlu1 %v5370_v41, %s5439_s28  ;;  %v1505_v41 = vsel %vm1487_vm9, %v1472_v14, %v5154_v27 }
 0x13d   : > { %v5157_v52 = vpop.permute.xlu0 %5156  ;;  %v5162_v38 = vpop.permute.xlu1 %5161 }
 0x13e   : > { %v1836_v60 = vrot.slane %v1804_v43, 7  ;;  %v2265_v35 = vrot.slane %v1804_v43, 1  ;;  %v5159_v25 = vunpack.i.h.bf16 %v5157_v52  ;;  %v5158_v4 = vunpack.i.l.bf16 %v5157_v52 }
 0x13f   : > { %v5164_v26 = vunpack.i.h.bf16 %v5162_v38  ;;  %v5163_v42 = vunpack.i.l.bf16 %v5162_v38  ;;  %v6588_v49 = vpack.c.bf16 %v1804_v43, %v1803_v46  ;;  %v5427_v46 = vld [vmem:[%s5504_s26 + $0xf8] sm:$0xff] }
 0x140   : > { %5376 = vrot.lane.b32.xlu2 %v5375_v10, %s5441_s30  ;;  %v1537_v5 = vsel %vm1520_vm10, %v1504_v21, %v5158_v4  ;;  %v1538_v30 = vsel %vm1520_vm10, %v1505_v41, %v5159_v25  ;;  %v2320_v20 = vsel %vm432_vm2, %v2264_v11, %v2265_v35  ;;  %v1890_v59 = vsel %vm336_vm1, %v1835_v34, %v1836_v60 }
 0x141   : > { %8285 = vst [vmem:[#allocation5_spill] sm:$0xff] %v6588_v49  ;;  %v1570_v52 = vsel %vm1553_vm11, %v1537_v5, %v5163_v42  ;;  %v1571_v27 = vsel %vm1553_vm11, %v1538_v30, %v5164_v26  ;;  %2054 = vmatmul.bf16.gmra.mxu1 %v6588_v49  ;;  %v502_v10 = vrot.slane %v5427_v46, 1  ;;  %v6602_v43 = vpack.c.bf16 %v1890_v59, %v1891_v51 }
 0x142   : > { %v6599_v14 = vpop.permute.xlu2 %5211  ;;  %v1731_v21 = vpop.f32.mrf.mxu0  ;;  %v1603_v38 = vsel %vm1586_vm12, %v1570_v52, %v5168_v32  ;;  %v1604_v11 = vsel %vm1586_vm12, %v1571_v27, %v5169_v22  ;;  %v498_v51 = vsel %vm336_vm1, %v497_v0, %v335_v17  ;;  %v500_v4 = vsel %vm269_vm3, %v499_v15, 0.0 }
 0x143   : > { %v1732_v25 = vadd.f32 %v6396_v28, %v1731_v21  ;;  %5381 = vrot.lane.b32.xlu0 %v6513_v9, %s5442_s7  ;;  %v1627_v34 = vpack.c.bf16 %v1604_v11, %v1603_v38  ;;  %v504_v9 = vsel %vm432_vm2, %v502_v10, %v401_v13  ;;  %v5395_v15 = vpack.i.bf16 %v498_v51, %v500_v4 }
 0x144   : > { %5386 = vrot.lane.b32.xlu1 %v6535_v6, %s5438_s27  ;;  %v6631_v26 = vpack.i.bf16 %v5427_v46, %v6461_v57  ;;  %v503_v3 = vsel %vm432_vm2, %v431_v62, %v502_v10  ;;  %v506_v13 = vsel %vm272_vm0, %v504_v9, 0.0  ;;  %v1375_v57 = vsel %vm1357_vm5, %v5907_v56, %v5134_v12  ;;  %vm7323_vm0 = vmpackc.low %vm5447_vm14, %vm269_vm3 }
 0x145   : > { %v1805_v32 = vmax.f32 %v1732_v25, 0.0  ;;  %v6617_v41 = vpop.permute.xlu0 %5171  ;;  %v6619_v22 = vpop.permute.xlu1 %5176  ;;  %4001 = vmatmul.msk.bf16.gmra.mxu0 %vm1659_vm13, %v1627_v34  ;;  %v5405_v27 = vpack.i.bf16 %v506_v13, %v503_v3  ;;  %v5184_v46 = vunpack.i.h.bf16 %v6516_v48  ;;  %v1407_v56 = vsel %vm1389_vm6, %v1375_v57, %v5139_v19 }
 0x146   : > { %v5173_v6 = vunpack.i.l.bf16 %v6617_v41  ;;  %v5178_v42 = vunpack.i.l.bf16 %v6619_v22  ;;  %v5199_v19 = vunpack.i.h.bf16 %v6566_v61 }
 0x147   : > { %v1837_v17 = vrot.slane %v1805_v32, 7  ;;  %v2266_v0 = vrot.slane %v1805_v32, 1 }
 0x148   : > { %5391 = vrot.lane.b32.xlu2 %v6545_v63, %s5440_s29  ;;  %v1376_v62 = vsel %vm1357_vm5, %v5903_v23, %v5173_v6 }
 0x149   : > { %v2319_v63 = vsel %vm432_vm2, %v2265_v35, %v2266_v0  ;;  %v1889_v30 = vsel %vm336_vm1, %v1836_v60, %v1837_v17  ;;  %v5183_v35 = vunpack.i.l.bf16 %v6516_v48  ;;  %v1408_v60 = vsel %vm1389_vm6, %v1376_v62, %v5178_v42 }
 0x14a   : > { %v6641_v5 = vpop.permute.xlu2 %5226  ;;  %v1733_v59 = vpop.f32.mrf.mxu0  ;;  %v6651_v52 = vpack.c.bf16 %v2319_v63, %v2320_v20  ;;  %v1441_v51 = vsel %vm1421_vm7, %v1408_v60, %v5184_v46  ;;  %v5198_v42 = vunpack.i.l.bf16 %v6566_v61 }
 0x14b   : > { %v1734_v33 = vadd.f32 %v6396_v28, %v1733_v59  ;;  %5396 = vrot.lane.b32.xlu0 %v5395_v15, %s5443_s8  ;;  %v1440_v34 = vsel %vm1421_vm7, %v1407_v56, %v5183_v35 }
 0x14c   : > { %5401 = vrot.lane.b32.xlu1 %v6631_v26, %s5444_s9 }
 0x14d   : > { %v6661_v23 = vmax.f32 %v1734_v33, 0.0  ;;  %v5187_v20 = vpop.permute.xlu0 %5186  ;;  %v5192_v10 = vpop.permute.xlu1 %5191 }
 0x14e   : > { %v5189_v21 = vunpack.i.h.bf16 %v5187_v20  ;;  %v5188_v38 = vunpack.i.l.bf16 %v5187_v20  ;;  %v5194_v4 = vunpack.i.h.bf16 %v5192_v10  ;;  %v5193_v9 = vunpack.i.l.bf16 %v5192_v10 }
 0x14f   : > { %v1838_v11 = vrot.slane %v6661_v23, 7  ;;  %v2267_v25 = vrot.slane %v6661_v23, 1  ;;  %v6667_v48 = vpack.c.bf16 %v6661_v23, %v1805_v32 }
 0x150   : > { %5406 = vrot.lane.b32.xlu2 %v5405_v27, %s5445_s10  ;;  %v1473_v12 = vsel %vm1454_vm8, %v1440_v34, %v5188_v38  ;;  %v1474_v6 = vsel %vm1454_vm8, %v1441_v51, %v5189_v21  ;;  %v5213_v38 = vunpack.i.l.bf16 %v6599_v14  ;;  %v5174_v34 = vunpack.i.h.bf16 %v6617_v41 }
 0x151   : > { %8286 = vst [vmem:[#allocation6_spill] sm:$0xff] %v6667_v48  ;;  %2059 = vmatmul.bf16.gmra.mxu1 %v6667_v48  ;;  %v2318_v13 = vsel %vm432_vm2, %v2266_v0, %v2267_v25  ;;  %v1888_v32 = vsel %vm336_vm1, %v1837_v17, %v1838_v11  ;;  %v1506_v57 = vsel %vm1487_vm9, %v1473_v12, %v5193_v9 }
 0x152   : > { %v6673_v3 = vpop.permute.xlu2 %5241  ;;  %v6684_v63 = vpack.c.bf16 %v1888_v32, %v1889_v30  ;;  %v1507_v62 = vsel %vm1487_vm9, %v1474_v6, %v5194_v4  ;;  %v1539_v61 = vsel %vm1520_vm10, %v1506_v57, %v5198_v42  ;;  %v1378_v32 = vsel %vm1357_vm5, %v6001_v31, %v5213_v38 }
 0x153   : > { %598 = vrot.lane.b32.xlu0 %v6448_v8, %s5439_s28  ;;  %v1540_v56 = vsel %vm1520_vm10, %v1507_v62, %v5199_v19  ;;  %v1377_v41 = vsel %vm1357_vm5, %v6005_v24, %v5174_v34 }
 0x154   : > { %721 = vrot.lane.b32.xlu1 %v6525_v50, %s5441_s30 }
 0x155   : > { %v5202_v0 = vpop.permute.xlu0 %5201  ;;  %v5207_v59 = vpop.permute.xlu1 %5206 }
 0x156   : > { %v5204_v33 = vunpack.i.h.bf16 %v5202_v0  ;;  %v5203_v17 = vunpack.i.l.bf16 %v5202_v0  ;;  %v5209_v46 = vunpack.i.h.bf16 %v5207_v59  ;;  %v5208_v35 = vunpack.i.l.bf16 %v5207_v59 }
 0x158   : > { %5411 = vrot.lane.b32.xlu2 %v5395_v15, %s5442_s7  ;;  %v1572_v8 = vsel %vm1553_vm11, %v1539_v61, %v5203_v17  ;;  %v1573_v30 = vsel %vm1553_vm11, %v1540_v56, %v5204_v33  ;;  %v5229_v33 = vunpack.i.h.bf16 %v6641_v5  ;;  %v5228_v17 = vunpack.i.l.bf16 %v6641_v5 }
 0x159   : > { %v1736_v23 = vpop.f32.mrf.mxu0  ;;  %v1605_v50 = vsel %vm1586_vm12, %v1572_v8, %v5208_v35  ;;  %v1606_v20 = vsel %vm1586_vm12, %v1573_v30, %v5209_v46 }
 0x15a   : > { %v6695_v60 = vpop.permute.xlu2 %5256  ;;  %v1737_v10 = vadd.f32 %v6396_v28, %v1736_v23  ;;  %v1628_v21 = vpack.c.bf16 %v1606_v20, %v1605_v50 }
 0x15b   : > { %5416 = vrot.lane.b32.xlu0 %v6631_v26, %s5438_s27  ;;  %v5179_v26 = vunpack.i.h.bf16 %v6619_v22 }
 0x15c   : > { %v1807_v15 = vmax.f32 %v1737_v10, 0.0  ;;  %5421 = vrot.lane.b32.xlu1 %v5405_v27, %s5440_s29  ;;  %4002 = vmatmul.msk.bf16.vlgmr.msra.gmra.mxu3 %vm1659_vm13, %v1628_v21 }
 0x15d   : > { %v6706_v51 = vpop.permute.xlu0 %5216  ;;  %v5222_v4 = vpop.permute.xlu1 %5221  ;;  %v1409_v22 = vsel %vm1389_vm6, %v1377_v41, %v5179_v26 }
 0x15e   : > { %v1839_v9 = vrot.slane %v1807_v15, 7  ;;  %v2268_v12 = vrot.slane %v1807_v15, 1  ;;  %v5218_v6 = vunpack.i.l.bf16 %v6706_v51  ;;  %v5224_v27 = vunpack.i.h.bf16 %v5222_v4 }
 0x15f   : > { %v5223_v19 = vunpack.i.l.bf16 %v5222_v4 }
 0x160   : > { %1138 = vrot.lane.b32.xlu2 %v5437_v7, %s5443_s8  ;;  %v2317_v42 = vsel %vm432_vm2, %v2267_v25, %v2268_v12  ;;  %v1887_v57 = vsel %vm336_vm1, %v1838_v11, %v1839_v9  ;;  %v1410_v62 = vsel %vm1389_vm6, %v1378_v32, %v5218_v6  ;;  %v5243_v32 = vunpack.i.l.bf16 %v6673_v3 }
 0x161   : > { %v1738_v31 = vpop.f32.mrf.mxu0  ;;  %v6723_v59 = vpack.c.bf16 %v2317_v42, %v2318_v13  ;;  %v1443_v11 = vsel %vm1421_vm7, %v1410_v62, %v5224_v27  ;;  %v1442_v25 = vsel %vm1421_vm7, %v1409_v22, %v5223_v19 }
 0x162   : > { %v6721_v0 = vpop.permute.xlu2 %5271  ;;  %v1739_v24 = vadd.f32 %v6396_v28, %v1738_v31  ;;  %v1475_v23 = vsel %vm1454_vm8, %v1442_v25, %v5228_v17  ;;  %v1476_v5 = vsel %vm1454_vm8, %v1443_v11, %v5229_v33  ;;  %v5258_v11 = vunpack.i.l.bf16 %v6695_v60 }
 0x163   : > { %1231 = vrot.lane.b32.xlu0 %v5437_v7, %s5444_s9  ;;  %v5219_v25 = vunpack.i.h.bf16 %v6706_v51 }
 0x164   : > { %v1808_v46 = vmax.f32 %v1739_v24, 0.0  ;;  %1324 = vrot.lane.b32.xlu1 %v5437_v7, %s5445_s10  ;;  %s7989_s10 = scalar_lea.vmem %s8253_s6, %s4703_s23  ;;  %s4704_s23 = sshll.u32 %s8458_s22, 6 }
 0x165   : > { %v5232_v13 = vpop.permute.xlu0 %5231  ;;  %v5237_v35 = vpop.permute.xlu1 %5236  ;;  %s8052_s13 = scalar_lea.vmem %s8252_s5, %s4704_s23 }
 0x166   : > { %v1840_v61 = vrot.slane %v1808_v46, 7  ;;  %v2269_v56 = vrot.slane %v1808_v46, 1  ;;  %v5234_v8 = vunpack.i.h.bf16 %v5232_v13  ;;  %v5233_v30 = vunpack.i.l.bf16 %v5232_v13 }
 0x167   : > { %v6737_v50 = vpack.c.bf16 %v1808_v46, %v1807_v15  ;;  %v5239_v20 = vunpack.i.h.bf16 %v5237_v35  ;;  %v5238_v10 = vunpack.i.l.bf16 %v5237_v35  ;;  %v5244_v15 = vunpack.i.h.bf16 %v6673_v3 }
 0x168   : > { %v2316_v21 = vsel %vm432_vm2, %v2268_v12, %v2269_v56  ;;  %v1886_v7 = vsel %vm336_vm1, %v1839_v9, %v1840_v61  ;;  %v1508_v38 = vsel %vm1487_vm9, %v1475_v23, %v5233_v30  ;;  %v1509_v34 = vsel %vm1487_vm9, %v1476_v5, %v5234_v8 }
 0x169   : > { %8287 = vst [vmem:[#allocation7_spill] sm:$0xff] %v6737_v50  ;;  %2064 = vmatmul.bf16.gmra.mxu1 %v6737_v50  ;;  %v6746_v4 = vpack.c.bf16 %v1886_v7, %v1887_v57  ;;  %v1541_v41 = vsel %vm1520_vm10, %v1508_v38, %v5238_v10  ;;  %v1542_v12 = vsel %vm1520_vm10, %v1509_v34, %v5239_v20  ;;  %v5214_v3 = vunpack.i.h.bf16 %v6599_v14 }
 0x16a   : > { %v6748_v6 = vpop.permute.xlu2 %5286  ;;  %v1574_v42 = vsel %vm1553_vm11, %v1541_v41, %v5243_v32  ;;  %v1575_v57 = vsel %vm1553_vm11, %v1542_v12, %v5244_v15  ;;  %v4747_v15 = vld [vmem:[%s8250_s3 + $0x138] sm:$0xff]  ;;  %v5273_v41 = vunpack.i.l.bf16 %v6721_v0 }
 0x16b   : > { %v1379_v8 = vsel %vm1357_vm5, %v6089_v47, %v5214_v3  ;;  %2812 = vmatpush.bf16.msrb.mxu1 %v4747_v15 }
 0x16c   : > { %v1411_v7 = vsel %vm1389_vm6, %v1379_v8, %v5219_v25 }
 0x16d   : > { %v5247_v26 = vpop.permute.xlu0 %5246  ;;  %v6754_v9 = vpop.permute.xlu1 %5251 }
 0x16e   : > { %v5249_v27 = vunpack.i.h.bf16 %v5247_v26  ;;  %v5248_v19 = vunpack.i.l.bf16 %v5247_v26  ;;  %v5253_v62 = vunpack.i.l.bf16 %v6754_v9 }
 0x170   : > { %v1607_v31 = vsel %vm1586_vm12, %v1574_v42, %v5248_v19  ;;  %v1608_v24 = vsel %vm1586_vm12, %v1575_v57, %v5249_v27  ;;  %v1380_v46 = vsel %vm1357_vm5, %v6085_v44, %v5253_v62  ;;  %v5274_v57 = vunpack.i.h.bf16 %v6721_v0 }
 0x171   : > { %v1741_v22 = vpop.f32.mrf.mxu0  ;;  %v1629_v33 = vpack.c.bf16 %v1608_v24, %v1607_v31  ;;  %v1412_v51 = vsel %vm1389_vm6, %v1380_v46, %v5258_v11  ;;  %v5289_v31 = vunpack.i.h.bf16 %v6748_v6 }
 0x172   : > { %v1742_v17 = vadd.f32 %v6396_v28, %v1741_v22  ;;  %v6768_v35 = vpop.permute.xlu2 %5301 }
 0x173   : > { %4003 = vmatmul.msk.bf16.gmra.mxu3 %vm1659_vm13, %v1629_v33 }
 0x174   : > { %v1809_v13 = vmax.f32 %v1742_v17, 0.0 }
 0x175   : > { %v5262_v14 = vpop.permute.xlu0 %5261  ;;  %v5267_v30 = vpop.permute.xlu1 %5266 }
 0x176   : > { %v1841_v23 = vrot.slane %v1809_v13, 7  ;;  %v2270_v5 = vrot.slane %v1809_v13, 1  ;;  %v5264_v20 = vunpack.i.h.bf16 %v5262_v14  ;;  %v5263_v10 = vunpack.i.l.bf16 %v5262_v14 }
 0x177   : > { %v5268_v38 = vunpack.i.l.bf16 %v5267_v30  ;;  %v5269_v44 = vunpack.i.h.bf16 %v5267_v30 }
 0x178   : > { %v1444_v34 = vsel %vm1421_vm7, %v1411_v7, %v5263_v10  ;;  %v2315_v47 = vsel %vm432_vm2, %v2269_v56, %v2270_v5  ;;  %v1885_v32 = vsel %vm336_vm1, %v1840_v61, %v1841_v23  ;;  %v1445_v12 = vsel %vm1421_vm7, %v1412_v51, %v5264_v20 }
 0x179   : > { %v1743_v26 = vpop.f32.mrf.mxu0  ;;  %v6784_v27 = vpack.c.bf16 %v2315_v47, %v2316_v21  ;;  %v1477_v19 = vsel %vm1454_vm8, %v1444_v34, %v5268_v38  ;;  %v1478_v62 = vsel %vm1454_vm8, %v1445_v12, %v5269_v44  ;;  %v5288_v61 = vunpack.i.l.bf16 %v6748_v6  ;;  %v4746_v21 = vld [vmem:[%s8250_s3 + $0x130] sm:$0xff] }
 0x17a   : > { %v1744_v42 = vadd.f32 %v6396_v28, %v1743_v26  ;;  %v1510_v3 = vsel %vm1487_vm9, %v1477_v19, %v5273_v41  ;;  %v6796_v11 = vpop.permute.xlu2 %5316  ;;  %v1511_v46 = vsel %vm1487_vm9, %v1478_v62, %v5274_v57  ;;  %2813 = vmatpush.bf16.msrb.mxu1 %v4746_v21  ;;  %v5254_v19 = vunpack.i.h.bf16 %v6754_v9 }
 0x17b   : > { %8288 = vst [vmem:[#allocation8_spill] sm:$0xff] %v6784_v27 }
 0x17c   : > { %v1810_v56 = vmax.f32 %v1744_v42, 0.0 }
 0x17d   : > { %v5277_v24 = vpop.permute.xlu0 %5276  ;;  %v5282_v22 = vpop.permute.xlu1 %5281 }
 0x17e   : > { %v1842_v33 = vrot.slane %v1810_v56, 7  ;;  %v2271_v17 = vrot.slane %v1810_v56, 1  ;;  %v5279_v0 = vunpack.i.h.bf16 %v5277_v24  ;;  %v5278_v25 = vunpack.i.l.bf16 %v5277_v24  ;;  %v4743_v24 = vld [vmem:[%s8250_s3 + $0x118] sm:$0xff] }
 0x17f   : > { %v5284_v8 = vunpack.i.h.bf16 %v5282_v22  ;;  %v5283_v14 = vunpack.i.l.bf16 %v5282_v22  ;;  %v6799_v30 = vpack.c.bf16 %v1810_v56, %v1809_v13  ;;  %v4745_v13 = vld [vmem:[%s8250_s3 + $0x128] sm:$0xff]  ;;  %v1381_v22 = vsel %vm1357_vm5, %v6193_v18, %v5254_v19 }
 0x180   : > { %v1543_v6 = vsel %vm1520_vm10, %v1510_v3, %v5278_v25  ;;  %v1544_v20 = vsel %vm1520_vm10, %v1511_v46, %v5279_v0  ;;  %v2314_v10 = vsel %vm432_vm2, %v2270_v5, %v2271_v17  ;;  %v1884_v7 = vsel %vm336_vm1, %v1841_v23, %v1842_v33  ;;  %2814 = vmatpush.bf16.msrb.mxu1 %v4745_v13  ;;  %v4742_v46 = vld [vmem:[%s8250_s3 + $0x110] sm:$0xff] }
 0x181   : > { %8289 = vst [vmem:[#allocation9_spill] sm:$0xff] %v6799_v30  ;;  %v1576_v51 = vsel %vm1553_vm11, %v1543_v6, %v5283_v14  ;;  %v1577_v38 = vsel %vm1553_vm11, %v1544_v20, %v5284_v8  ;;  %2069 = vmatmul.bf16.gmra.mxu1 %v6799_v30  ;;  %v6813_v34 = vpack.c.bf16 %v1884_v7, %v1885_v32  ;;  %v4744_v32 = vld [vmem:[%s8250_s3 + $0x120] sm:$0xff] }
 0x182   : > { %v1746_v44 = vpop.f32.mrf.mxu0  ;;  %v1609_v15 = vsel %vm1586_vm12, %v1576_v51, %v5288_v61  ;;  %v1610_v5 = vsel %vm1586_vm12, %v1577_v38, %v5289_v31  ;;  %v6828_v56 = vpop.permute.xlu2 %5331  ;;  %v5259_v31 = vunpack.i.h.bf16 %v6695_v60 }
 0x183   : > { %v1747_v47 = vadd.f32 %v6396_v28, %v1746_v44  ;;  %v1630_v23 = vpack.c.bf16 %v1610_v5, %v1609_v15 }
 0x184   : > { %2815 = vmatpush.bf16.msrb.mxu1 %v4744_v32  ;;  %v1413_v8 = vsel %vm1389_vm6, %v1381_v22, %v5259_v31  ;;  %v5318_v31 = vunpack.i.l.bf16 %v6796_v11 }
 0x185   : > { %v1811_v41 = vmax.f32 %v1747_v47, 0.0  ;;  %v6818_v12 = vpop.permute.xlu0 %5291  ;;  %v6820_v26 = vpop.permute.xlu1 %5296  ;;  %4004 = vmatmul.msk.bf16.gmra.mxu3 %vm1659_vm13, %v1630_v23  ;;  %v4741_v23 = vld [vmem:[%s8250_s3 + $0x108] sm:$0xff] }
 0x186   : > { %v5293_v42 = vunpack.i.l.bf16 %v6818_v12  ;;  %v5298_v61 = vunpack.i.l.bf16 %v6820_v26 }
 0x187   : > { %v1843_v57 = vrot.slane %v1811_v41, 7  ;;  %v2272_v62 = vrot.slane %v1811_v41, 1 }
 0x188   : > { %v1382_v21 = vsel %vm1357_vm5, %v6189_v53, %v5293_v42  ;;  %2816 = vmatpush.bf16.msrb.mxu1 %v4743_v24  ;;  %v5319_v42 = vunpack.i.h.bf16 %v6796_v11 }
 0x189   : > { %v2313_v3 = vsel %vm432_vm2, %v2271_v17, %v2272_v62  ;;  %v1883_v9 = vsel %vm336_vm1, %v1842_v33, %v1843_v57  ;;  %v5304_v17 = vunpack.i.h.bf16 %v6768_v35  ;;  %v5303_v33 = vunpack.i.l.bf16 %v6768_v35 }
 0x18a   : > { %v1748_v0 = vpop.f32.mrf.mxu0  ;;  %v6843_v60 = vpack.c.bf16 %v2313_v3, %v2314_v10  ;;  %v1414_v18 = vsel %vm1389_vm6, %v1382_v21, %v5298_v61  ;;  %v5347_v19 = vpop.permute.xlu2 %5346 }
 0x18b   : > { %v1749_v25 = vadd.f32 %v6396_v28, %v1748_v0  ;;  %v1446_v13 = vsel %vm1421_vm7, %v1413_v8, %v5303_v33  ;;  %v1447_v44 = vsel %vm1421_vm7, %v1414_v18, %v5304_v17 }
 0x18c   : > { %8290 = vst [vmem:[#allocation10_spill] sm:$0xff] %v6843_v60  ;;  %2817 = vmatpush.bf16.msrb.mxu1 %v4742_v46 }
 0x18d   : > { %v1812_v14 = vmax.f32 %v1749_v25, 0.0  ;;  %v5307_v53 = vpop.permute.xlu0 %5306  ;;  %v5312_v6 = vpop.permute.xlu1 %5311 }
 0x18e   : > { %v5309_v20 = vunpack.i.h.bf16 %v5307_v53  ;;  %v5308_v10 = vunpack.i.l.bf16 %v5307_v53  ;;  %v5314_v15 = vunpack.i.h.bf16 %v5312_v6  ;;  %v5313_v35 = vunpack.i.l.bf16 %v5312_v6 }
 0x18f   : > { %v1844_v7 = vrot.slane %v1812_v14, 7  ;;  %v2273_v51 = vrot.slane %v1812_v14, 1  ;;  %v6853_v38 = vpack.c.bf16 %v1812_v14, %v1811_v41 }
 0x190   : > { %v1479_v5 = vsel %vm1454_vm8, %v1446_v13, %v5308_v10  ;;  %v1480_v47 = vsel %vm1454_vm8, %v1447_v44, %v5309_v20  ;;  %2818 = vmatpush.bf16.msrb.mxu1 %v4741_v23  ;;  %v5333_v20 = vunpack.i.l.bf16 %v6828_v56  ;;  %v5294_v10 = vunpack.i.h.bf16 %v6818_v12 }
 0x191   : > { %8291 = vst [vmem:[#allocation11_spill] sm:$0xff] %v6853_v38  ;;  %2074 = vmatmul.bf16.gmra.mxu1 %v6853_v38  ;;  %v2312_v41 = vsel %vm432_vm2, %v2272_v62, %v2273_v51  ;;  %v1882_v32 = vsel %vm336_vm1, %v1843_v57, %v1844_v7  ;;  %v1512_v24 = vsel %vm1487_vm9, %v1479_v5, %v5313_v35  ;;  %v4740_v62 = vld [vmem:[%s8250_s3 + $0x100] sm:$0xff] }
 0x192   : > { %v6869_v61 = vpack.c.bf16 %v1882_v32, %v1883_v9  ;;  %v1513_v3 = vsel %vm1487_vm9, %v1480_v47, %v5314_v15  ;;  %v1545_v17 = vsel %vm1520_vm10, %v1512_v24, %v5318_v31  ;;  %v5362_v13 = vpop.permute.xlu2 %5361  ;;  %v1384_v32 = vsel %vm1357_vm5, %v6295_v29, %v5333_v20 }
 0x193   : > { %v1546_v11 = vsel %vm1520_vm10, %v1513_v3, %v5319_v42  ;;  %v1383_v42 = vsel %vm1357_vm5, %v6299_v55, %v5294_v10  ;;  %v5299_v31 = vunpack.i.h.bf16 %v6820_v26  ;;  %v5349_v55 = vunpack.i.h.bf16 %v5347_v19 }
 0x194   : > { %2819 = vmatpush.bf16.msrb.mxu1 %v4740_v62 }
 0x195   : > { %v5322_v22 = vpop.permute.xlu0 %5321  ;;  %v5327_v21 = vpop.permute.xlu1 %5326 }
 0x196   : > { %v5324_v0 = vunpack.i.h.bf16 %v5322_v22  ;;  %v5323_v57 = vunpack.i.l.bf16 %v5322_v22  ;;  %v5329_v25 = vunpack.i.h.bf16 %v5327_v21  ;;  %v5328_v46 = vunpack.i.l.bf16 %v5327_v21 }
 0x198   : > { %v1578_v9 = vsel %vm1553_vm11, %v1545_v17, %v5323_v57  ;;  %v1579_v33 = vsel %vm1553_vm11, %v1546_v11, %v5324_v0  ;;  %v1415_v57 = vsel %vm1389_vm6, %v1383_v42, %v5299_v31  ;;  %v6907_v11 = vpop.f32.mrf.mxu1  ;;  %v5364_v31 = vunpack.i.h.bf16 %v5362_v13 }
 0x199   : > { %v1751_v8 = vpop.f32.mrf.mxu0  ;;  %v1611_v18 = vsel %vm1586_vm12, %v1578_v9, %v5328_v46  ;;  %v1612_v14 = vsel %vm1586_vm12, %v1579_v33, %v5329_v25  ;;  %v5348_v25 = vunpack.i.l.bf16 %v5347_v19 }
 0x19a   : > { %v1752_v53 = vadd.f32 %v6396_v28, %v1751_v8  ;;  %v1631_v6 = vpack.c.bf16 %v1612_v14, %v1611_v18  ;;  %v6911_v18 = vpop.permute.xlu2 %5376 }
 0x19c   : > { %v1813_v44 = vmax.f32 %v1752_v53, 0.0  ;;  %4005 = vmatmul.msk.bf16.gmra.mxu3 %vm1659_vm13, %v1631_v6 }
 0x19d   : > { %v6886_v15 = vpop.permute.xlu0 %5336  ;;  %v5342_v35 = vpop.permute.xlu1 %5341 }
 0x19e   : > { %v1845_v5 = vrot.slane %v1813_v44, 7  ;;  %v2274_v47 = vrot.slane %v1813_v44, 1  ;;  %v5338_v23 = vunpack.i.l.bf16 %v6886_v15  ;;  %v5344_v12 = vunpack.i.h.bf16 %v5342_v35 }
 0x19f   : > { %v5343_v24 = vunpack.i.l.bf16 %v5342_v35 }
 0x1a0   : > { %v2311_v3 = vsel %vm432_vm2, %v2273_v51, %v2274_v47  ;;  %v1881_v22 = vsel %vm336_vm1, %v1844_v7, %v1845_v5  ;;  %v1416_v21 = vsel %vm1389_vm6, %v1384_v32, %v5338_v23 }
 0x1a1   : > { %v1753_v62 = vpop.f32.mrf.mxu0  ;;  %v6899_v0 = vpack.c.bf16 %v2311_v3, %v2312_v41  ;;  %v1449_v26 = vsel %vm1421_vm7, %v1416_v21, %v5344_v12  ;;  %v1448_v46 = vsel %vm1421_vm7, %v1415_v57, %v5343_v24  ;;  %v5363_v12 = vunpack.i.l.bf16 %v5362_v13  ;;  %v4730_v57 = vld [vmem:[%s8250_s3 + $0xb0] sm:$0xff] }
 0x1a2   : > { %v1754_v29 = vadd.f32 %v6396_v28, %v1753_v62  ;;  %v1481_v19 = vsel %vm1454_vm8, %v1448_v46, %v5348_v25  ;;  %v1482_v14 = vsel %vm1454_vm8, %v1449_v26, %v5349_v55  ;;  %v6940_v55 = vpop.f32.mrf.mxu1 }
 0x1a4   : > { %v6905_v17 = vmax.f32 %v1754_v29, 0.0 }
 0x1a5   : > { %v5352_v51 = vpop.permute.xlu0 %5351 }
 0x1a6   : > { %v1846_v7 = vrot.slane %v6905_v17, 7  ;;  %v2275_v41 = vrot.slane %v6905_v17, 1  ;;  %v5354_v9 = vunpack.i.h.bf16 %v5352_v51  ;;  %v5353_v33 = vunpack.i.l.bf16 %v5352_v51  ;;  %v5357_v8 = vpop.permute.xlu1 %5356  ;;  %v5392_v51 = vpop.permute.xlu2 %5391 }
 0x1a7   : > { %v6916_v53 = vpack.c.bf16 %v6905_v17, %v1813_v44  ;;  %v5359_v6 = vunpack.i.h.bf16 %v5357_v8  ;;  %v5358_v20 = vunpack.i.l.bf16 %v5357_v8  ;;  %v4731_v44 = vld [vmem:[%s8250_s3 + $0xb8] sm:$0xff]  ;;  %v5334_v17 = vunpack.i.h.bf16 %v6828_v56 }
 0x1a8   : > { %v2310_v10 = vsel %vm432_vm2, %v2274_v47, %v2275_v41  ;;  %v1880_v35 = vsel %vm336_vm1, %v1845_v5, %v1846_v7  ;;  %v1514_v23 = vsel %vm1487_vm9, %v1481_v19, %v5353_v33  ;;  %v1515_v32 = vsel %vm1487_vm9, %v1482_v14, %v5354_v9  ;;  %2433 = vmatpush.bf16.msrb.mxu3 %v4731_v44  ;;  %v4729_v14 = vld [vmem:[%s8250_s3 + $0xa8] sm:$0xff] }
 0x1a9   : > { %8292 = vst [vmem:[#allocation12_spill] sm:$0xff] %v6916_v53  ;;  %2079 = vmatmul.bf16.gmra.mxu1 %v6916_v53  ;;  %v6925_v42 = vpack.c.bf16 %v1880_v35, %v1881_v22  ;;  %v1547_v24 = vsel %vm1520_vm10, %v1514_v23, %v5358_v20  ;;  %v1548_v47 = vsel %vm1520_vm10, %v1515_v32, %v5359_v6  ;;  %v5378_v8 = vunpack.i.l.bf16 %v6911_v18 }
 0x1aa   : > { %v1580_v22 = vsel %vm1553_vm11, %v1547_v24, %v5363_v12  ;;  %v1581_v13 = vsel %vm1553_vm11, %v1548_v47, %v5364_v31  ;;  %v5339_v19 = vunpack.i.h.bf16 %v6886_v15  ;;  %v1385_v56 = vsel %vm1357_vm5, %v6383_v45, %v5334_v17 }
 0x1ac   : > { %2434 = vmatpush.bf16.msrb.mxu3 %v4730_v57  ;;  %v1417_v32 = vsel %vm1389_vm6, %v1385_v56, %v5339_v19 }
 0x1ad   : > { %v5367_v3 = vpop.permute.xlu0 %5366 }
 0x1ae   : > { %v5369_v5 = vunpack.i.h.bf16 %v5367_v3  ;;  %v5368_v21 = vunpack.i.l.bf16 %v5367_v3  ;;  %v6932_v62 = vpop.permute.xlu1 %5371 }
 0x1af   : > { %v5373_v29 = vunpack.i.l.bf16 %v6932_v62 }
 0x1b0   : > { %v1756_v25 = vpop.f32.mrf.mxu0  ;;  %v1613_v26 = vsel %vm1586_vm12, %v1580_v22, %v5368_v21  ;;  %v1614_v46 = vsel %vm1586_vm12, %v1581_v13, %v5369_v5  ;;  %2435 = vmatpush.bf16.msrb.mxu3 %v4729_v14  ;;  %v6972_v13 = vld [vmem:[%s8249_s2] ss:$0 sm:$0xff] }
 0x1b1   : > { %v1757_v9 = vadd.f32 %v6396_v28, %v1756_v25  ;;  %v1632_v33 = vpack.c.bf16 %v1614_v46, %v1613_v26  ;;  %v1386_v6 = vsel %vm1357_vm5, %v6379_v58, %v5373_v29  ;;  %v4728_v58 = vld [vmem:[%s8250_s3 + $0xa0] sm:$0xff]  ;;  %v5393_v25 = vunpack.i.l.bf16 %v5392_v51  ;;  %v4727_v26 = vld [vmem:[%s8250_s3 + $0x98] sm:$0xff] }
 0x1b2   : > { %v1418_v12 = vsel %vm1389_vm6, %v1386_v6, %v5378_v8 }
 0x1b3   : > { %v1815_v20 = vmax.f32 %v1757_v9, 0.0  ;;  %4006 = vmatmul.msk.bf16.gmra.mxu3 %vm1659_vm13, %v1632_v33 }
 0x1b4   : > { %2436 = vmatpush.bf16.msrb.mxu3 %v4728_v58 }
 0x1b5   : > { %v1847_v28 = vrot.slane %v1815_v20, 7  ;;  %v2276_v35 = vrot.slane %v1815_v20, 1  ;;  %v5382_v23 = vpop.permute.xlu0 %5381 }
 0x1b6   : > { %v5384_v15 = vunpack.i.h.bf16 %v5382_v23  ;;  %v5383_v31 = vunpack.i.l.bf16 %v5382_v23  ;;  %v5387_v44 = vpop.permute.xlu1 %5386 }
 0x1b7   : > { %v5389_v24 = vunpack.i.h.bf16 %v5387_v44  ;;  %v5388_v47 = vunpack.i.l.bf16 %v5387_v44  ;;  %v2309_v45 = vsel %vm432_vm2, %v2275_v41, %v2276_v35  ;;  %v1879_v3 = vsel %vm336_vm1, %v1846_v7, %v1847_v28  ;;  %v6976_v7 = vpop.f32.mrf.mxu1  ;;  %v4726_v44 = vld [vmem:[%s8250_s3 + $0x90] sm:$0xff] }
 0x1b8   : > { %v1450_v5 = vsel %vm1421_vm7, %v1417_v32, %v5383_v31  ;;  %v1451_v21 = vsel %vm1421_vm7, %v1418_v12, %v5384_v15  ;;  %v1758_v29 = vpop.f32.mrf.mxu0  ;;  %v6967_v22 = vpack.c.bf16 %v2309_v45, %v2310_v10  ;;  %v5394_v41 = vunpack.i.h.bf16 %v5392_v51  ;;  %v5407_v10 = vpop.permute.xlu2 %5406  ;;  %2437 = vmatpush.bf16.msrb.mxu3 %v4727_v26 }
 0x1b9   : > { %v1759_v57 = vadd.f32 %v6972_v13, %v1758_v29  ;;  %2820 = vmatmul.bf16.vlgmr.msrb.gmra.mxu1 %v6455_v40  ;;  %v1483_v46 = vsel %vm1454_vm8, %v1450_v5, %v5388_v47  ;;  %v1484_v17 = vsel %vm1454_vm8, %v1451_v21, %v5389_v24  ;;  %v5409_v33 = vunpack.i.h.bf16 %v5407_v10 }
 0x1ba   : > { %v5408_v8 = vunpack.i.l.bf16 %v5407_v10  ;;  %v1516_v23 = vsel %vm1487_vm9, %v1483_v46, %v5393_v25  ;;  %v1517_v32 = vsel %vm1487_vm9, %v1484_v17, %v5394_v41  ;;  %v4739_v10 = vld [vmem:[%s8250_s3 + $0xf8] sm:$0xff] }
 0x1bb   : > { %v1816_v9 = vmax.f32 %v1759_v57, 0.0  ;;  %2625 = vmatpush.bf16.msrb.mxu0 %v4739_v10 }
 0x1bc   : > { %2438 = vmatpush.bf16.msrb.mxu3 %v4726_v44 }
 0x1bd   : > { %v1848_v19 = vrot.slane %v1816_v9, 7  ;;  %v2277_v14 = vrot.slane %v1816_v9, 1  ;;  %v5397_v40 = vpop.permute.xlu0 %5396  ;;  %v6983_v6 = vpack.c.bf16 %v1816_v9, %v1815_v20 }
 0x1be   : > { %v5399_v51 = vunpack.i.h.bf16 %v5397_v40  ;;  %v5398_v56 = vunpack.i.l.bf16 %v5397_v40  ;;  %v5402_v15 = vpop.permute.xlu1 %5401 }
 0x1bf   : > { %8293 = vst [vmem:[#allocation13_spill] sm:$0xff] %v6983_v6  ;;  %v5404_v31 = vunpack.i.h.bf16 %v5402_v15  ;;  %v5403_v12 = vunpack.i.l.bf16 %v5402_v15  ;;  %2084 = vmatmul.bf16.vlgmr.msra.gmra.mxu2 %v6983_v6  ;;  %v2308_v20 = vsel %vm432_vm2, %v2276_v35, %v2277_v14  ;;  %v1878_v24 = vsel %vm336_vm1, %v1847_v28, %v1848_v19  ;;  %v4725_v28 = vld [vmem:[%s8250_s3 + $0x88] sm:$0xff]  ;;  %v7007_v26 = vpop.f32.mrf.mxu1 }
 0x1c0   : > { %v1549_v47 = vsel %vm1520_vm10, %v1516_v23, %v5398_v56  ;;  %v1550_v58 = vsel %vm1520_vm10, %v1517_v32, %v5399_v51  ;;  %v6997_v45 = vpack.c.bf16 %v1878_v24, %v1879_v3  ;;  %v5374_v3 = vunpack.i.h.bf16 %v6932_v62  ;;  %2439 = vmatpush.bf16.msrb.mxu3 %v4725_v28  ;;  %v4724_v62 = vld [vmem:[%s8250_s3 + $0x80] sm:$0xff] }
 0x1c1   : > { %v1582_v5 = vsel %vm1553_vm11, %v1549_v47, %v5403_v12  ;;  %v1583_v21 = vsel %vm1553_vm11, %v1550_v58, %v5404_v31 }
 0x1c2   : > { %v1761_v29 = vpop.f32.mrf.mxu0  ;;  %v1615_v57 = vsel %vm1586_vm12, %v1582_v5, %v5408_v8  ;;  %v1616_v41 = vsel %vm1586_vm12, %v1583_v21, %v5409_v33  ;;  %v5379_v33 = vunpack.i.h.bf16 %v6911_v18  ;;  %v5412_v8 = vpop.permute.xlu2 %5411  ;;  %v1387_v56 = vsel %vm1357_vm5, %v6499_v37, %v5374_v3 }
 0x1c3   : > { %v1762_v35 = vadd.f32 %v6972_v13, %v1761_v29  ;;  %v1633_v25 = vpack.c.bf16 %v1616_v41, %v1615_v57  ;;  %v5414_v15 = vunpack.i.h.bf16 %v5412_v8  ;;  %v5413_v31 = vunpack.i.l.bf16 %v5412_v8  ;;  %v4738_v41 = vld [vmem:[%s8250_s3 + $0xf0] sm:$0xff] }
 0x1c4   : > { %2440 = vmatpush.bf16.msrb.mxu3 %v4724_v62  ;;  %v1419_v24 = vsel %vm1389_vm6, %v1387_v56, %v5379_v33  ;;  %2626 = vmatpush.bf16.msrb.mxu0 %v4738_v41  ;;  %v4713_v41 = vld [vmem:[%s8250_s3 + $0x28] sm:$0xff] }
 0x1c5   : > { %v1817_v46 = vmax.f32 %v1762_v35, 0.0  ;;  %v599_v17 = vpop.permute.xlu0 %598  ;;  %4007 = vmatmul.msk.bf16.gmra.mxu3 %vm1659_vm13, %v1633_v25  ;;  %v1452_v5 = vsel %vm1421_vm7, %v1419_v24, %v5413_v31 }
 0x1c6   : > { %v722_v9 = vpop.permute.xlu1 %721  ;;  %v1388_v23 = vsel %vm1357_vm5, %v6495_v54, %v599_v17 }
 0x1c7   : > { %v1849_v40 = vrot.slane %v1817_v46, 7  ;;  %v2278_v51 = vrot.slane %v1817_v46, 1  ;;  %v1420_v37 = vsel %vm1389_vm6, %v1388_v23, %v722_v9  ;;  %v7032_v47 = vpop.f32.mrf.mxu1 }
 0x1c8   : > { %v1453_v21 = vsel %vm1421_vm7, %v1420_v37, %v5414_v15 }
 0x1c9   : > { %2825 = vmatmul.bf16.gmra.mxu1 %v6588_v49  ;;  %v2307_v32 = vsel %vm432_vm2, %v2277_v14, %v2278_v51  ;;  %v1877_v18 = vsel %vm336_vm1, %v1848_v19, %v1849_v40  ;;  %v4715_v14 = vld [vmem:[%s8250_s3 + $0x38] sm:$0xff] }
 0x1ca   : > { %v1763_v12 = vpop.f32.mrf.mxu0  ;;  %v7027_v44 = vpack.c.bf16 %v2307_v32, %v2308_v20  ;;  %2173 = vmatpush.bf16.msrb.mxu2 %v4715_v14  ;;  %v1139_v62 = vpop.permute.xlu2 %1138 }
 0x1cb   : > { %v1764_v54 = vadd.f32 %v6972_v13, %v1763_v12 }
 0x1cd   : > { %v1818_v58 = vmax.f32 %v1764_v54, 0.0  ;;  %v5417_v19 = vpop.permute.xlu0 %5416 }
 0x1ce   : > { %v5419_v20 = vunpack.i.h.bf16 %v5417_v19  ;;  %v5418_v29 = vunpack.i.l.bf16 %v5417_v19  ;;  %v5422_v57 = vpop.permute.xlu1 %5421 }
 0x1cf   : > { %v1850_v35 = vrot.slane %v1818_v58, 7  ;;  %v2279_v25 = vrot.slane %v1818_v58, 1  ;;  %v5424_v28 = vunpack.i.h.bf16 %v5422_v57  ;;  %v5423_v3 = vunpack.i.l.bf16 %v5422_v57  ;;  %v7057_v12 = vpop.f32.mrf.mxu1  ;;  %v4737_v57 = vld [vmem:[%s8250_s3 + $0xe8] sm:$0xff] }
 0x1d0   : > { %v1485_v10 = vsel %vm1454_vm8, %v1452_v5, %v5418_v29  ;;  %v1486_v17 = vsel %vm1454_vm8, %v1453_v21, %v5419_v20  ;;  %v7044_v9 = vpack.c.bf16 %v1818_v58, %v1817_v46  ;;  %2627 = vmatpush.bf16.msrb.mxu0 %v4737_v57 }
 0x1d1   : > { %v2306_v33 = vsel %vm432_vm2, %v2278_v51, %v2279_v25  ;;  %v1876_v8 = vsel %vm336_vm1, %v1849_v40, %v1850_v35  ;;  %v1518_v56 = vsel %vm1487_vm9, %v1485_v10, %v5423_v3  ;;  %v1519_v23 = vsel %vm1487_vm9, %v1486_v17, %v5424_v28 }
 0x1d2   : > { %8294 = vst [vmem:[#allocation14_spill] sm:$0xff] %v7044_v9  ;;  %2089 = vmatmul.bf16.gmra.mxu2 %v7044_v9  ;;  %v7053_v32 = vpack.c.bf16 %v1876_v8, %v1877_v18  ;;  %v1551_v15 = vsel %vm1520_vm10, %v1518_v56, %v1139_v62  ;;  %v1552_v46 = vsel %vm1520_vm10, %v1519_v23, %v1139_v62  ;;  %v4714_v18 = vld [vmem:[%s8250_s3 + $0x30] sm:$0xff]  ;;  %v8295_v23 = vmov 0.0|0.0  }
 0x1d3   : > { %2174 = vmatpush.bf16.msrb.mxu2 %v4714_v18 }
 0x1d5   : > { %v1232_v31 = vpop.permute.xlu0 %1231 }
 0x1d6   : > { %v1584_v51 = vsel %vm1553_vm11, %v1551_v15, %v1232_v31  ;;  %v1585_v40 = vsel %vm1553_vm11, %v1552_v46, %v1232_v31  ;;  %v1325_v24 = vpop.permute.xlu1 %1324 }
 0x1d7   : > { %v1617_v37 = vsel %vm1586_vm12, %v1584_v51, %v1325_v24  ;;  %v1618_v54 = vsel %vm1586_vm12, %v1585_v40, %v1325_v24  ;;  %v7068_v58 = vpop.f32.mrf.mxu1  ;;  %2175 = vmatpush.bf16.msrb.mxu2 %v4713_v41 }
 0x1d8   : > { %v1634_v14 = vpack.c.bf16 %v1618_v54, %v1617_v37  ;;  %v4712_v54 = vld [vmem:[%s8250_s3 + $0x20] sm:$0xff] }
 0x1d9   : > { %2830 = vmatmul.bf16.gmra.mxu1 %v6667_v48 }
 0x1da   : > { %4008 = vmatmul.msk.bf16.gmra.mxu3 %vm1659_vm13, %v1634_v14  ;;  %v4736_v14 = vld [vmem:[%s8250_s3 + $0xe0] sm:$0xff] }
 0x1db   : > { %2176 = vmatpush.bf16.msrb.mxu2 %v4712_v54  ;;  %2628 = vmatpush.bf16.msrb.mxu0 %v4736_v14  ;;  %v4711_v14 = vld [vmem:[%s8250_s3 + $0x18] sm:$0xff] }
 0x1df   : > { %v1766_v19 = vpop.f32.mrf.mxu3  ;;  %v7083_v8 = vpop.f32.mrf.mxu1  ;;  %2177 = vmatpush.bf16.msrb.mxu2 %v4711_v14 }
 0x1e0   : > { %v1767_v5 = vadd.f32 %v6972_v13, %v1766_v19 }
 0x1e2   : > { %v1819_v21 = vmax.f32 %v1767_v5, 0.0 }
 0x1e4   : > { %v1851_v20 = vrot.slane %v1819_v21, 7  ;;  %v2280_v29 = vrot.slane %v1819_v21, 1 }
 0x1e6   : > { %v2305_v28 = vsel %vm432_vm2, %v2279_v25, %v2280_v29  ;;  %v1875_v3 = vsel %vm336_vm1, %v1850_v35, %v1851_v20 }
 0x1e7   : > { %v1768_v10 = vpop.f32.mrf.mxu3  ;;  %v7081_v17 = vpack.c.bf16 %v2305_v28, %v2306_v33  ;;  %v7097_v51 = vpop.f32.mrf.mxu1 }
 0x1e8   : > { %v1769_v62 = vadd.f32 %v6972_v13, %v1768_v10 }
 0x1e9   : > { %2835 = vmatmul.bf16.gmra.mxu1 %v6737_v50 }
 0x1ea   : > { %v1820_v56 = vmax.f32 %v1769_v62, 0.0  ;;  %2441 = vmatmul.bf16.vlgmr.msrb.gmra.mxu3 %v8295_v23 }
 0x1ec   : > { %v1852_v15 = vrot.slane %v1820_v56, 7  ;;  %v2281_v46 = vrot.slane %v1820_v56, 1  ;;  %v7088_v25 = vpack.c.bf16 %v1820_v56, %v1819_v21 }
 0x1ee   : > { %8296 = vst [vmem:[#allocation15_spill] sm:$0xff] %v7088_v25  ;;  %2094 = vmatmul.bf16.gmra.mxu2 %v7088_v25  ;;  %v2304_v35 = vsel %vm432_vm2, %v2280_v29, %v2281_v46  ;;  %v1874_v33 = vsel %vm336_vm1, %v1851_v20, %v1852_v15 }
 0x1ef   : > { %v7095_v31 = vpack.c.bf16 %v1874_v33, %v1875_v3  ;;  %v7114_v19 = vpop.f32.mrf.mxu1 }
 0x1f6   : > { %v1771_v40 = vpop.f32.mrf.mxu3 }
 0x1f7   : > { %v1772_v37 = vadd.f32 %v6972_v13, %v1771_v40 }
 0x1f9   : > { %v1821_v18 = vmax.f32 %v1772_v37, 0.0  ;;  %2840 = vmatmul.bf16.gmra.mxu1 %v6799_v30 }
 0x1fa   : > { %4184 = vmatmul.msk.bf16.gmra.mxu3 %vm7102_vm15, %v6569_v39 }
 0x1fb   : > { %v1853_v2 = vrot.slane %v1821_v18, 7  ;;  %v2282_v5 = vrot.slane %v1821_v18, 1 }
 0x1fd   : > { %v2303_v21 = vsel %vm432_vm2, %v2281_v46, %v2282_v5  ;;  %v1873_v20 = vsel %vm336_vm1, %v1852_v15, %v1853_v2 }
 0x1fe   : > { %v1773_v29 = vpop.f32.mrf.mxu3  ;;  %v7123_v57 = vpack.c.bf16 %v2303_v21, %v2304_v35  ;;  %v7126_v3 = vpop.f32.mrf.mxu1 }
 0x1ff   : > { %v1774_v41 = vadd.f32 %v6972_v13, %v1773_v29 }
 0x201   : > { %v1822_v28 = vmax.f32 %v1774_v41, 0.0 }
 0x203   : > { %v1854_v10 = vrot.slane %v1822_v28, 7  ;;  %v2283_v62 = vrot.slane %v1822_v28, 1  ;;  %v7128_v56 = vpack.c.bf16 %v1822_v28, %v1821_v18  ;;  %v4735_v18 = vld [vmem:[%s8250_s3 + $0xd8] sm:$0xff] }
 0x204   : > { %2629 = vmatpush.bf16.msrb.mxu0 %v4735_v18 }
 0x205   : > { %8299 = vst [vmem:[#allocation16_spill] sm:$0xff] %v7128_v56  ;;  %2099 = vmatmul.bf16.gmra.mxu2 %v7128_v56  ;;  %v2302_v46 = vsel %vm432_vm2, %v2282_v5, %v2283_v62  ;;  %v1872_v15 = vsel %vm336_vm1, %v1853_v2, %v1854_v10 }
 0x206   : > { %v7135_v33 = vpack.c.bf16 %v1872_v15, %v1873_v20  ;;  %v7142_v54 = vpop.f32.mrf.mxu1 }
 0x207   : > { %8300 = vst [vmem:[#allocation17_spill] sm:$0xff] %v7142_v54 }
 0x208   : > { %v1776_v35 = vpop.f32.mrf.mxu3 }
 0x209   : > { %v1777_v40 = vadd.f32 %v6972_v13, %v1776_v35  ;;  %2845 = vmatmul.bf16.gmra.mxu1 %v6853_v38 }
 0x20a   : > { %4187 = vmatmul.msk.bf16.gmra.mxu3 %vm7102_vm15, %v6651_v52 }
 0x20b   : > { %v1823_v37 = vmax.f32 %v1777_v40, 0.0 }
 0x20d   : > { %v1855_v2 = vrot.slane %v1823_v37, 7  ;;  %v2284_v5 = vrot.slane %v1823_v37, 1 }
 0x20e   : > { %v7157_v35 = vpop.f32.mrf.mxu1 }
 0x20f   : > { %v2301_v21 = vsel %vm432_vm2, %v2283_v62, %v2284_v5  ;;  %v1871_v20 = vsel %vm336_vm1, %v1854_v10, %v1855_v2  ;;  %8301 = vst [vmem:[#allocation18_spill] sm:$0xff] %v7157_v35 }
 0x210   : > { %v1778_v29 = vpop.f32.mrf.mxu3  ;;  %v7154_v41 = vpack.c.bf16 %v2301_v21, %v2302_v46  ;;  %v4710_v46 = vld [vmem:[%s8250_s3 + $0x10] sm:$0xff] }
 0x211   : > { %v1779_v28 = vadd.f32 %v6972_v13, %v1778_v29  ;;  %2178 = vmatpush.bf16.msrb.mxu2 %v4710_v46 }
 0x213   : > { %v1824_v15 = vmax.f32 %v1779_v28, 0.0 }
 0x215   : > { %v1856_v40 = vrot.slane %v1824_v15, 7  ;;  %v2285_v38 = vrot.slane %v1824_v15, 1  ;;  %v7159_v30 = vpack.c.bf16 %v1824_v15, %v1823_v37  ;;  %v4734_v37 = vld [vmem:[%s8250_s3 + $0xd0] sm:$0xff]  ;;  %v4709_v15 = vld [vmem:[%s8250_s3 + $0x8] sm:$0xff] }
 0x216   : > { %2630 = vmatpush.bf16.msrb.mxu0 %v4734_v37  ;;  %v7178_v18 = vpop.f32.mrf.mxu1  ;;  %2179 = vmatpush.bf16.msrb.mxu2 %v4709_v15 }
 0x217   : > { %8302 = vst [vmem:[#allocation19_spill] sm:$0xff] %v7159_v30  ;;  %2104 = vmatmul.bf16.gmra.mxu2 %v7159_v30  ;;  %v2300_v62 = vsel %vm432_vm2, %v2284_v5, %v2285_v38  ;;  %v1870_v10 = vsel %vm336_vm1, %v1855_v2, %v1856_v40 }
 0x218   : > { %v7166_v14 = vpack.c.bf16 %v1870_v10, %v1871_v20  ;;  %8303 = vst [vmem:[#allocation20_spill] sm:$0xff] %v7178_v18 }
 0x219   : > { %2850 = vmatmul.bf16.gmra.mxu1 %v6916_v53 }
 0x21a   : > { %4190 = vmatmul.msk.bf16.gmra.mxu3 %vm7102_vm15, %v6723_v59 }
 0x21f   : > { %v1781_v2 = vpop.f32.mrf.mxu3 }
 0x220   : > { %v1782_v5 = vadd.f32 %v6972_v13, %v1781_v2 }
 0x222   : > { %v1825_v21 = vmax.f32 %v1782_v5, 0.0 }
 0x224   : > { %v1857_v20 = vrot.slane %v1825_v21, 7  ;;  %v2286_v29 = vrot.slane %v1825_v21, 1 }
 0x226   : > { %v7181_v28 = vpop.f32.mrf.mxu1  ;;  %v2299_v10 = vsel %vm432_vm2, %v2285_v38, %v2286_v29  ;;  %v1869_v46 = vsel %vm336_vm1, %v1856_v40, %v1857_v20  ;;  %v4733_v38 = vld [vmem:[%s8250_s3 + $0xc8] sm:$0xff] }
 0x227   : > { %8304 = vst [vmem:[#allocation21_spill] sm:$0xff] %v7181_v28  ;;  %v1783_v37 = vpop.f32.mrf.mxu3  ;;  %v7190_v53 = vpack.c.bf16 %v2299_v10, %v2300_v62  ;;  %2631 = vmatpush.bf16.msrb.mxu0 %v4733_v38 }
 0x228   : > { %v1784_v2 = vadd.f32 %v6972_v13, %v1783_v37 }
 0x229   : > { %2855 = vmatmul.bf16.gmra.mxu1 %v6983_v6 }
 0x22a   : > { %v1826_v5 = vmax.f32 %v1784_v2, 0.0  ;;  %4193 = vmatmul.msk.bf16.gmra.mxu3 %vm7102_vm15, %v6784_v27 }
 0x22c   : > { %v1858_v50 = vrot.slane %v1826_v5, 7  ;;  %v2287_v48 = vrot.slane %v1826_v5, 1  ;;  %v7197_v49 = vpack.c.bf16 %v1826_v5, %v1825_v21  ;;  %v4708_v5 = vld [vmem:[%s8250_s3] sm:$0xff] }
 0x22d   : > { %2180 = vmatpush.bf16.msrb.mxu2 %v4708_v5 }
 0x22e   : > { %8305 = vst [vmem:[#allocation22_spill] sm:$0xff] %v7197_v49  ;;  %v7202_v40 = vpop.f32.mrf.mxu1  ;;  %2109 = vmatmul.bf16.gmra.mxu2 %v7197_v49  ;;  %v2298_v62 = vsel %vm432_vm2, %v2286_v29, %v2287_v48  ;;  %v1868_v15 = vsel %vm336_vm1, %v1857_v20, %v1858_v50 }
 0x22f   : > { %8306 = vst [vmem:[#allocation23_spill] sm:$0xff] %v7202_v40  ;;  %v7209_v10 = vpack.c.bf16 %v1868_v15, %v1869_v46 }
 0x236   : > { %v7211_v37 = vpop.f32.mrf.mxu1  ;;  %v1786_v21 = vpop.f32.mrf.mxu3 }
 0x237   : > { %8307 = vst [vmem:[#allocation24_spill] sm:$0xff] %v7211_v37  ;;  %v1787_v2 = vadd.f32 %v6972_v13, %v1786_v21 }
 0x239   : > { %v1827_v6 = vmax.f32 %v1787_v2, 0.0  ;;  %2860 = vmatmul.bf16.gmra.mxu1 %v7044_v9  ;;  %v4732_v9 = vld [vmem:[%s8250_s3 + $0xc0] sm:$0xff] }
 0x23a   : > { %4196 = vmatmul.msk.bf16.gmra.mxu3 %vm7102_vm15, %v6843_v60  ;;  %2632 = vmatpush.bf16.msrb.mxu0 %v4732_v9  ;;  %v4763_v9 = vld [vmem:[%s8250_s3 + $0x1b8] sm:$0xff] }
 0x23b   : > { %v1859_v20 = vrot.slane %v1827_v6, 7  ;;  %v2288_v29 = vrot.slane %v1827_v6, 1  ;;  %3190 = vmatpush.bf16.msra.mxu3 %v4763_v9 }
 0x23d   : > { %v2297_v46 = vsel %vm432_vm2, %v2287_v48, %v2288_v29  ;;  %v1867_v38 = vsel %vm336_vm1, %v1858_v50, %v1859_v20 }
 0x23e   : > { %v7225_v15 = vpop.f32.mrf.mxu1  ;;  %v1788_v21 = vpop.f32.mrf.mxu3  ;;  %v7227_v37 = vpack.c.bf16 %v2297_v46, %v2298_v62 }
 0x23f   : > { %8308 = vst [vmem:[#allocation25_spill] sm:$0xff] %v7225_v15  ;;  %v1789_v2 = vadd.f32 %v6972_v13, %v1788_v21 }
 0x241   : > { %v1828_v5 = vmax.f32 %v1789_v2, 0.0 }
 0x243   : > { %v1860_v39 = vrot.slane %v1828_v5, 7  ;;  %v2289_v40 = vrot.slane %v1828_v5, 1  ;;  %v7233_v28 = vpack.c.bf16 %v1828_v5, %v1827_v6  ;;  %v4755_v6 = vld [vmem:[%s8250_s3 + $0x178] sm:$0xff] }
 0x244   : > { %3004 = vmatpush.bf16.msra.mxu2 %v4755_v6  ;;  %v4779_v6 = vld [vmem:[%s8250_s3 + $0x238] sm:$0xff] }
 0x245   : > { %8309 = vst [vmem:[#allocation26_spill] sm:$0xff] %v7233_v28  ;;  %2114 = vmatmul.bf16.gmra.mxu2 %v7233_v28  ;;  %v2296_v48 = vsel %vm432_vm2, %v2288_v29, %v2289_v40  ;;  %v1866_v50 = vsel %vm336_vm1, %v1859_v20, %v1860_v39  ;;  %3562 = vmatpush.bf16.msra.mxu1 %v4779_v6 }
 0x246   : > { %v7240_v62 = vpop.f32.mrf.mxu1  ;;  %v7242_v46 = vpack.c.bf16 %v1866_v50, %v1867_v38 }
 0x247   : > { %8310 = vst [vmem:[#allocation27_spill] sm:$0xff] %v7240_v62 }
 0x248   : > { %v1791_v21 = vpop.f32.mrf.mxu3 }
 0x249   : > { %v1792_v2 = vadd.f32 %v6972_v13, %v1791_v21  ;;  %2865 = vmatmul.bf16.gmra.mxu1 %v7088_v25 }
 0x24a   : > { %4199 = vmatmul.msk.bf16.gmra.mxu3 %vm7102_vm15, %v6899_v0 }
 0x24b   : > { %v1829_v20 = vmax.f32 %v1792_v2, 0.0  ;;  %v4771_v2 = vld [vmem:[%s8250_s3 + $0x1f8] sm:$0xff] }
 0x24c   : > { %3376 = vmatpush.bf16.msra.mxu0 %v4771_v2 }
 0x24d   : > { %v1861_v29 = vrot.slane %v1829_v20, 7  ;;  %v2290_v38 = vrot.slane %v1829_v20, 1 }
 0x24e   : > { %v7255_v5 = vpop.f32.mrf.mxu1 }
 0x24f   : > { %8311 = vst [vmem:[#allocation28_spill] sm:$0xff] %v7255_v5  ;;  %v2295_v50 = vsel %vm432_vm2, %v2289_v40, %v2290_v38  ;;  %v1865_v21 = vsel %vm336_vm1, %v1860_v39, %v1861_v29 }
 0x250   : > { %v1793_v62 = vpop.f32.mrf.mxu3  ;;  %v7261_v15 = vpack.c.bf16 %v2295_v50, %v2296_v48 }
 0x251   : > { %v1794_v25 = vadd.f32 %v6972_v13, %v1793_v62 }
 0x253   : > { %v1830_v9 = vmax.f32 %v1794_v25, 0.0  ;;  %v7285_v25 = vpop.f32.mrf.mxu2 }
 0x254   : > { %8315 = vst [vmem:[#allocation32_spill] sm:$0xff] %v7285_v25 }
 0x255   : > { %v1862_v40 = vrot.slane %v1830_v9, 7  ;;  %v2291_v5 = vrot.slane %v1830_v9, 1  ;;  %v7270_v18 = vpack.c.bf16 %v1830_v9, %v1829_v20 }
 0x256   : > { %v7272_v39 = vpop.f32.mrf.mxu1 }
 0x257   : > { %8312 = vst [vmem:[#allocation29_spill] sm:$0xff] %v7270_v18  ;;  %2119 = vmatmul.bf16.gmra.mxu2 %v7270_v18  ;;  %v2294_v48 = vsel %vm432_vm2, %v2290_v38, %v2291_v5  ;;  %v1864_v62 = vsel %vm336_vm1, %v1861_v29, %v1862_v40 }
 0x258   : > { %8313 = vst [vmem:[#allocation30_spill] sm:$0xff] %v7272_v39  ;;  %v7279_v50 = vpack.c.bf16 %v1864_v62, %v1865_v21 }
 0x259   : > { %2870 = vmatmul.bf16.gmra.mxu1 %v7128_v56 }
 0x25a   : > { %8314 = vst [vmem:[#allocation31_spill] sm:$0xff] %v7279_v50  ;;  %4202 = vmatmul.msk.bf16.gmra.mxu3 %vm7102_vm15, %v6967_v22 }
 0x25b   : > { %v7300_v25 = vpop.f32.mrf.mxu2 }
 0x25c   : > { %8318 = vst [vmem:[#allocation35_spill] sm:$0xff] %v7300_v25 }
 0x25d   : > { %v1796_v20 = vpop.f32.mrf.mxu3 }
 0x25e   : > { %v1797_v2 = vadd.f32 %v6972_v13, %v1796_v20  ;;  %v7288_v6 = vpop.f32.mrf.mxu1 }
 0x25f   : > { %8316 = vst [vmem:[#allocation33_spill] sm:$0xff] %v7288_v6 }
 0x260   : > { %v7290_v9 = vmax.f32 %v1797_v2, 0.0  ;;  %v4754_v2 = vld [vmem:[%s8250_s3 + $0x170] sm:$0xff] }
 0x261   : > { %3005 = vmatpush.bf16.msra.mxu2 %v4754_v2 }
 0x262   : > { %v2292_v38 = vrot.slane %v7290_v9, 1  ;;  %v2554_v29 = vrot.slane %v7290_v9, 7 }
 0x264   : > { %v2293_v21 = vsel %vm432_vm2, %v2291_v5, %v2292_v38  ;;  %v2556_v62 = vsel %vm336_vm1, %v1862_v40, %v2554_v29  ;;  %v4762_v5 = vld [vmem:[%s8250_s3 + $0x1b0] sm:$0xff] }
 0x265   : > { %v1798_v39 = vpop.f32.mrf.mxu3  ;;  %v7298_v56 = vpack.c.bf16 %v2293_v21, %v2294_v48  ;;  %3191 = vmatpush.bf16.msra.mxu3 %v4762_v5  ;;  %v8322_v48 = vrot.slane %v6432_v36, 7  ;;  %v8323_v5 = vrot.slane %v6432_v36, 1  ;;  %v4770_v36 = vld [vmem:[%s8250_s3 + $0x1f0] sm:$0xff] }
 0x266   : > { %v1799_v20 = vadd.f32 %v6972_v13, %v1798_v39  ;;  %v7303_v6 = vpop.f32.mrf.mxu1  ;;  %3377 = vmatpush.bf16.msra.mxu0 %v4770_v36  ;;  %v4761_v36 = vld [vmem:[%s8250_s3 + $0x1a8] sm:$0xff] }
 0x267   : > { %8317 = vst [vmem:[#allocation34_spill] sm:$0xff] %v7298_v56  ;;  %2181 = vmatmul.bf16.vlgmr.msrb.gmra.mxu2 %v8295_v23 }
 0x268   : > { %8319 = vst [vmem:[#allocation36_spill] sm:$0xff] %v7303_v6  ;;  %v7309_v50 = vmax.f32 %v1799_v20, 0.0 }
 0x269   : > { %2875 = vmatmul.bf16.gmra.mxu1 %v7159_v30  ;;  %3192 = vmatpush.bf16.msra.mxu3 %v4761_v36  ;;  %v4773_v36 = vld [vmem:[%s8250_s3 + $0x208] sm:$0xff] }
 0x26a   : > { %v1863_v40 = vrot.slane %v7309_v50, 7  ;;  %v2933_v13 = vrot.slane %v7309_v50, 1  ;;  %4205 = vmatmul.msk.bf16.gmra.mxu3 %vm7102_vm15, %v7027_v44 }
 0x26c   : > { %v1893_v21 = vsel %vm336_vm1, %v1863_v40, %v8322_v48  ;;  %v2555_v20 = vsel %vm336_vm1, %v2554_v29, %v1863_v40  ;;  %v2934_v2 = vsel %vm432_vm2, %v2292_v38, %v2933_v13  ;;  %v2935_v6 = vsel %vm432_vm2, %v2933_v13, %v8323_v5  ;;  %v7346_v48 = vpop.f32.mrf.mxu2  ;;  %v4778_v38 = vld [vmem:[%s8250_s3 + $0x230] sm:$0xff]  ;;  %v4753_v5 = vld [vmem:[%s8250_s3 + $0x168] sm:$0xff] }
 0x26d   : > { %v7339_v30 = vpop.f32.mrf.mxu3  ;;  %v4090_v23 = vpack.c.bf16 %v6475_v16, %v1893_v21  ;;  %v7342_v25 = vpack.c.bf16 %v2555_v20, %v2556_v62  ;;  %v7344_v35 = vpack.c.bf16 %v2935_v6, %v2934_v2  ;;  %3563 = vmatpush.bf16.msra.mxu1 %v4778_v38  ;;  %v4776_v20 = vld [vmem:[%s8250_s3 + $0x220] sm:$0xff]  ;;  %3006 = vmatpush.bf16.msra.mxu2 %v4753_v5  ;;  %v4775_v38 = vld [vmem:[%s8250_s3 + $0x218] sm:$0xff]  ;;  %v4774_v5 = vld [vmem:[%s8250_s3 + $0x210] sm:$0xff] }
 0x26e   : > { %v7348_v54 = vpop.f32.mrf.mxu1 }
 0x26f   : > { %8324 = vst [vmem:[#allocation37_spill] sm:$0xff] %v7344_v35  ;;  %4277 = vmatmul.msk.bf16.vlgmr.msrb.gmra.mxu0 %vm7323_vm0, %v4090_v23 }
 0x270   : > { %8325 = vst [vmem:[#allocation38_spill] sm:$0xff] %v7348_v54 }
 0x274   : > { %v7364_v29 = vpop.f32.mrf.mxu2 }
 0x275   : > { %v7358_v16 = vpop.f32.mrf.mxu3 }
 0x276   : > { %v7360_v6 = vpop.f32.mrf.mxu1 }
 0x277   : > { %8326 = vst [vmem:[#allocation39_spill] sm:$0xff] %v7360_v6  ;;  %4091 = vmatmul.msk.bf16.gmra.mxu2 %vm7323_vm0, %v4090_v23  ;;  %v4777_v23 = vld [vmem:[%s8250_s3 + $0x228] sm:$0xff] }
 0x278   : > { %3564 = vmatpush.bf16.msra.mxu1 %v4777_v23 }
 0x279   : > { %2880 = vmatmul.bf16.gmra.mxu1 %v7197_v49 }
 0x27a   : > { %4208 = vmatmul.msk.bf16.gmra.mxu3 %vm7102_vm15, %v7081_v17 }
 0x27c   : > { %v7380_v13 = vpop.f32.mrf.mxu2  ;;  %3565 = vmatpush.bf16.msra.mxu1 %v4776_v20 }
 0x27d   : > { %v7370_v62 = vpop.f32.mrf.mxu3  ;;  %8328 = vst [vmem:[#allocation41_spill] sm:$0xff] %v7380_v13 }
 0x27e   : > { %v7372_v40 = vpop.f32.mrf.mxu1 }
 0x27f   : > { %8327 = vst [vmem:[#allocation40_spill] sm:$0xff] %v7372_v40  ;;  %4280 = vmatmul.msk.bf16.gmra.mxu0 %vm7323_vm0, %v6602_v43  ;;  %v4769_v40 = vld [vmem:[%s8250_s3 + $0x1e8] sm:$0xff] }
 0x280   : > { %3566 = vmatpush.bf16.msra.mxu1 %v4775_v38  ;;  %3378 = vmatpush.bf16.msra.mxu0 %v4769_v40 }
 0x284   : > { %v7402_v23 = vpop.f32.mrf.mxu2  ;;  %3567 = vmatpush.bf16.msra.mxu1 %v4774_v5  ;;  %v4772_v5 = vld [vmem:[%s8250_s3 + $0x200] sm:$0xff] }
 0x285   : > { %v7382_v21 = vpop.f32.mrf.mxu3  ;;  %8330 = vst [vmem:[#allocation43_spill] sm:$0xff] %v7402_v23 }
 0x286   : > { %v7387_v2 = vpop.f32.mrf.mxu1 }
 0x287   : > { %8329 = vst [vmem:[#allocation42_spill] sm:$0xff] %v7387_v2  ;;  %4094 = vmatmul.msk.bf16.gmra.mxu2 %vm7323_vm0, %v6602_v43 }
 0x288   : > { %3568 = vmatpush.bf16.msra.mxu1 %v4773_v36 }
 0x289   : > { %2885 = vmatmul.bf16.gmra.mxu1 %v7233_v28 }
 0x28a   : > { %4211 = vmatmul.msk.bf16.gmra.mxu3 %vm7102_vm15, %v7123_v57 }
 0x28c   : > { %v7423_v38 = vpop.f32.mrf.mxu2  ;;  %3569 = vmatpush.bf16.msra.mxu1 %v4772_v5 }
 0x28d   : > { %v7407_v20 = vpop.f32.mrf.mxu3  ;;  %8332 = vst [vmem:[#allocation45_spill] sm:$0xff] %v7423_v38 }
 0x28e   : > { %v7415_v2 = vpop.f32.mrf.mxu1 }
 0x28f   : > { %4283 = vmatmul.msk.bf16.gmra.mxu0 %vm7323_vm0, %v6684_v63  ;;  %8331 = vst [vmem:[#allocation44_spill] sm:$0xff] %v7415_v2 }
 0x294   : > { %v7439_v40 = vpop.f32.mrf.mxu2 }
 0x295   : > { %v7425_v28 = vpop.f32.mrf.mxu3  ;;  %8334 = vst [vmem:[#allocation47_spill] sm:$0xff] %v7439_v40  ;;  %v4751_v40 = vld [vmem:[%s8250_s3 + $0x158] sm:$0xff] }
 0x296   : > { %v7437_v2 = vpop.f32.mrf.mxu1 }
 0x297   : > { %4097 = vmatmul.msk.bf16.gmra.mxu2 %vm7323_vm0, %v6684_v63  ;;  %8333 = vst [vmem:[#allocation46_spill] sm:$0xff] %v7437_v2  ;;  %v7457_v2 = vpack.c.bf16 %v7309_v50, %v7290_v9 }
 0x299   : > { %2890 = vmatmul.bf16.gmra.mxu1 %v7270_v18  ;;  %8337 = vst [vmem:[#allocation50_spill] sm:$0xff] %v7457_v2  ;;  %v4752_v18 = vld [vmem:[%s8250_s3 + $0x160] sm:$0xff] }
 0x29a   : > { %4214 = vmatmul.msk.bf16.gmra.mxu3 %vm7102_vm15, %v7154_v41  ;;  %3007 = vmatpush.bf16.msra.mxu2 %v4752_v18  ;;  %v4768_v18 = vld [vmem:[%s8250_s3 + $0x1e0] sm:$0xff] }
 0x29b   : > { %3379 = vmatpush.bf16.msra.mxu0 %v4768_v18  ;;  %v4759_v18 = vld [vmem:[%s8250_s3 + $0x198] sm:$0xff] }
 0x29c   : > { %v7446_v6 = vpop.f32.mrf.mxu2 }
 0x29d   : > { %v7441_v36 = vpop.f32.mrf.mxu3  ;;  %8335 = vst [vmem:[#allocation48_spill] sm:$0xff] %v7446_v6 }
 0x29e   : > { %v7448_v54 = vpop.f32.mrf.mxu1  ;;  %3008 = vmatpush.bf16.msra.mxu2 %v4751_v40 }
 0x29f   : > { %4286 = vmatmul.msk.bf16.gmra.mxu0 %vm7323_vm0, %v6746_v4  ;;  %8336 = vst [vmem:[#allocation49_spill] sm:$0xff] %v7448_v54  ;;  %v4760_v54 = vld [vmem:[%s8250_s3 + $0x1a0] sm:$0xff] }
 0x2a0   : > { %3193 = vmatpush.bf16.msra.mxu3 %v4760_v54 }
 0x2a4   : > { %v7471_v50 = vpop.f32.mrf.mxu2  ;;  %3194 = vmatpush.bf16.msra.mxu3 %v4759_v18 }
 0x2a5   : > { %v7450_v5 = vpop.f32.mrf.mxu3  ;;  %8338 = vst [vmem:[#allocation51_spill] sm:$0xff] %v7471_v50  ;;  %v4757_v50 = vld [vmem:[%s8250_s3 + $0x188] sm:$0xff] }
 0x2a6   : > { %v7473_v9 = vpop.f32.mrf.mxu1 }
 0x2a7   : > { %4100 = vmatmul.msk.bf16.gmra.mxu2 %vm7323_vm0, %v6746_v4  ;;  %8339 = vst [vmem:[#allocation52_spill] sm:$0xff] %v7473_v9 }
 0x2a9   : > { %2895 = vmatmul.bf16.gmra.mxu1 %v7457_v2 }
 0x2aa   : > { %4217 = vmatmul.msk.bf16.gmra.mxu3 %vm7102_vm15, %v7190_v53 }
 0x2ad   : > { %v7469_v49 = vpop.f32.mrf.mxu3 }
 0x2ae   : > { %v7488_v54 = vpop.f32.mrf.mxu1 }
 0x2af   : > { %4289 = vmatmul.msk.bf16.gmra.mxu0 %vm7323_vm0, %v6813_v34  ;;  %8341 = vst [vmem:[#allocation54_spill] sm:$0xff] %v7488_v54  ;;  %v4758_v54 = vld [vmem:[%s8250_s3 + $0x190] sm:$0xff] }
 0x2b0   : > { %3195 = vmatpush.bf16.msra.mxu3 %v4758_v54  ;;  %v4756_v54 = vld [vmem:[%s8250_s3 + $0x180] sm:$0xff] }
 0x2b1   : > { %v7483_v1 = vpop.f32.mrf.mxu2 }
 0x2b2   : > { %8340 = vst [vmem:[#allocation53_spill] sm:$0xff] %v7483_v1 }
 0x2b4   : > { %3196 = vmatpush.bf16.msra.mxu3 %v4757_v50 }
 0x2b5   : > { %v7481_v2 = vpop.f32.mrf.mxu3 }
 0x2b6   : > { %v7512_v6 = vpop.f32.mrf.mxu1 }
 0x2b7   : > { %4103 = vmatmul.msk.bf16.gmra.mxu2 %vm7323_vm0, %v6813_v34  ;;  %8343 = vst [vmem:[#allocation56_spill] sm:$0xff] %v7512_v6 }
 0x2b8   : > { %3197 = vmatpush.bf16.msra.mxu3 %v4756_v54 }
 0x2b9   : > { %4658 = vmatmul.msk.bf16.vlgmr.msra.gmra.mxu1 %vm7102_vm15, %v6651_v52  ;;  %v7507_v1 = vpop.f32.mrf.mxu2 }
 0x2ba   : > { %4220 = vmatmul.msk.bf16.gmra.mxu3 %vm7102_vm15, %v7227_v37  ;;  %8342 = vst [vmem:[#allocation55_spill] sm:$0xff] %v7507_v1 }
 0x2bd   : > { %v7499_v9 = vpop.f32.mrf.mxu3 }
 0x2be   : > { %v7533_v50 = vpop.f32.mrf.mxu1 }
 0x2bf   : > { %4292 = vmatmul.msk.bf16.gmra.mxu0 %vm7323_vm0, %v6869_v61  ;;  %8345 = vst [vmem:[#allocation58_spill] sm:$0xff] %v7533_v50 }
 0x2c5   : > { %v7514_v18 = vpop.f32.mrf.mxu3 }
 0x2c6   : > { %v7547_v35 = vpop.f32.mrf.mxu1 }
 0x2c7   : > { %4106 = vmatmul.msk.bf16.gmra.mxu2 %vm7323_vm0, %v6869_v61  ;;  %8347 = vst [vmem:[#allocation60_spill] sm:$0xff] %v7547_v35 }
 0x2c8   : > { %v7525_v1 = vpop.f32.mrf.mxu2 }
 0x2c9   : > { %8344 = vst [vmem:[#allocation57_spill] sm:$0xff] %v7525_v1  ;;  %4661 = vmatmul.msk.bf16.gmra.mxu1 %vm7102_vm15, %v6723_v59  ;;  %v4767_v1 = vld [vmem:[%s8250_s3 + $0x1d8] sm:$0xff] }
 0x2ca   : > { %4223 = vmatmul.msk.bf16.gmra.mxu3 %vm7102_vm15, %v7261_v15  ;;  %3380 = vmatpush.bf16.msra.mxu0 %v4767_v1 }
 0x2cd   : > { %v7535_v6 = vpop.f32.mrf.mxu3 }
 0x2ce   : > { %v7565_v35 = vpop.f32.mrf.mxu1 }
 0x2cf   : > { %4295 = vmatmul.msk.bf16.gmra.mxu0 %vm7323_vm0, %v6925_v42  ;;  %8349 = vst [vmem:[#allocation62_spill] sm:$0xff] %v7565_v35 }
 0x2d0   : > { %v7543_v38 = vpop.f32.mrf.mxu2 }
 0x2d1   : > { %8346 = vst [vmem:[#allocation59_spill] sm:$0xff] %v7543_v38 }
 0x2d5   : > { %v7545_v40 = vpop.f32.mrf.mxu3 }
 0x2d6   : > { %v7583_v35 = vpop.f32.mrf.mxu1 }
 0x2d7   : > { %4109 = vmatmul.msk.bf16.gmra.mxu2 %vm7323_vm0, %v6925_v42  ;;  %8351 = vst [vmem:[#allocation64_spill] sm:$0xff] %v7583_v35 }
 0x2d9   : > { %4664 = vmatmul.msk.bf16.gmra.mxu1 %vm7102_vm15, %v6784_v27 }
 0x2da   : > { %v7555_v54 = vpop.f32.mrf.mxu2  ;;  %4226 = vmatmul.msk.bf16.gmra.mxu3 %vm7102_vm15, %v7298_v56 }
 0x2db   : > { %8348 = vst [vmem:[#allocation61_spill] sm:$0xff] %v7555_v54  ;;  %v4750_v54 = vld [vmem:[%s8250_s3 + $0x150] sm:$0xff] }
 0x2dc   : > { %3009 = vmatpush.bf16.msra.mxu2 %v4750_v54  ;;  %v4766_v54 = vld [vmem:[%s8250_s3 + $0x1d0] sm:$0xff] }
 0x2dd   : > { %v7563_v1 = vpop.f32.mrf.mxu3  ;;  %3381 = vmatpush.bf16.msra.mxu0 %v4766_v54 }
 0x2df   : > { %4298 = vmatmul.msk.bf16.gmra.mxu0 %vm7323_vm0, %v6997_v45 }
 0x2e2   : > { %v7567_v50 = vpop.f32.mrf.mxu2 }
 0x2e3   : > { %8350 = vst [vmem:[#allocation63_spill] sm:$0xff] %v7567_v50 }
 0x2e5   : > { %v7578_v38 = vpop.f32.mrf.mxu3 }
 0x2e7   : > { %4112 = vmatmul.msk.bf16.gmra.mxu2 %vm7323_vm0, %v6997_v45 }
 0x2e9   : > { %4667 = vmatmul.msk.bf16.gmra.mxu1 %vm7102_vm15, %v6843_v60 }
 0x2ea   : > { %v2182_v27 = vpop.f32.mrf.mxu2  ;;  %4517 = vmatmul.msk.bf16.vlgmr.msra.gmra.mxu3 %vm7323_vm0, %v6602_v43 }
 0x2eb   : > { %v2183_v50 = vadd.f32 %v2182_v27, %v6907_v11  ;;  %v7598_v11 = vpop.f32.mrf.mxu1 }
 0x2ec   : > { %v2634_v23 = vpop.f32.mrf.mxu0  ;;  %8352 = vst [vmem:[#allocation65_spill] sm:$0xff] %v7598_v11 }
 0x2ed   : > { %v2522_v13 = vadd.f32 %v7339_v30, %v2183_v50  ;;  %v7596_v35 = vpop.f32.mrf.mxu3 }
 0x2ef   : > { %v7587_v56 = vadd.f32 %v2634_v23, %v2522_v13  ;;  %4301 = vmatmul.msk.bf16.gmra.mxu0 %vm7323_vm0, %v7053_v32 }
 0x2f2   : > { %v2184_v60 = vpop.f32.mrf.mxu2 }
 0x2f3   : > { %v2185_v43 = vadd.f32 %v2184_v60, %v6940_v55  ;;  %v7616_v54 = vpop.f32.mrf.mxu1 }
 0x2f4   : > { %v2636_v27 = vpop.f32.mrf.mxu0  ;;  %8353 = vst [vmem:[#allocation66_spill] sm:$0xff] %v7616_v54 }
 0x2f5   : > { %v2523_v30 = vadd.f32 %v7358_v16, %v2185_v43  ;;  %v7614_v50 = vpop.f32.mrf.mxu3 }
 0x2f7   : > { %v7601_v13 = vadd.f32 %v2636_v27, %v2523_v30  ;;  %4115 = vmatmul.msk.bf16.gmra.mxu2 %vm7323_vm0, %v7053_v32 }
 0x2f9   : > { %4670 = vmatmul.msk.bf16.gmra.mxu1 %vm7102_vm15, %v6899_v0 }
 0x2fa   : > { %v2187_v23 = vpop.f32.mrf.mxu2  ;;  %4520 = vmatmul.msk.bf16.gmra.mxu3 %vm7323_vm0, %v6684_v63 }
 0x2fb   : > { %v2188_v60 = vadd.f32 %v2187_v23, %v6976_v7 }
 0x2fc   : > { %v2639_v55 = vpop.f32.mrf.mxu0 }
 0x2fd   : > { %v2524_v16 = vadd.f32 %v7370_v62, %v2188_v60  ;;  %v4749_v62 = vld [vmem:[%s8250_s3 + $0x148] sm:$0xff]  ;;  %v7633_v23 = vpop.f32.mrf.mxu3  ;;  %v7635_v60 = vpop.f32.mrf.mxu1 }
 0x2fe   : > { %8354 = vst [vmem:[#allocation67_spill] sm:$0xff] %v7635_v60  ;;  %3010 = vmatpush.bf16.msra.mxu2 %v4749_v62 }
 0x2ff   : > { %v7618_v43 = vadd.f32 %v2639_v55, %v2524_v16  ;;  %4304 = vmatmul.msk.bf16.gmra.mxu0 %vm7323_vm0, %v7095_v31 }
 0x302   : > { %v2189_v27 = vpop.f32.mrf.mxu2 }
 0x303   : > { %v2190_v30 = vadd.f32 %v2189_v27, %v7007_v26  ;;  %v4765_v27 = vld [vmem:[%s8250_s3 + $0x1c8] sm:$0xff] }
 0x304   : > { %v2641_v11 = vpop.f32.mrf.mxu0  ;;  %3382 = vmatpush.bf16.msra.mxu0 %v4765_v27 }
 0x305   : > { %v2525_v63 = vadd.f32 %v7382_v21, %v2190_v30  ;;  %v7653_v30 = vpop.f32.mrf.mxu3 }
 0x307   : > { %v7625_v7 = vadd.f32 %v2641_v11, %v2525_v63  ;;  %4118 = vmatmul.msk.bf16.gmra.mxu2 %vm7323_vm0, %v7095_v31 }
 0x309   : > { %4673 = vmatmul.msk.bf16.gmra.mxu1 %vm7102_vm15, %v6967_v22 }
 0x30a   : > { %v2192_v26 = vpop.f32.mrf.mxu2  ;;  %4523 = vmatmul.msk.bf16.gmra.mxu3 %vm7323_vm0, %v6746_v4  ;;  %v7655_v4 = vpop.f32.mrf.mxu1 }
 0x30b   : > { %v2193_v21 = vadd.f32 %v2192_v26, %v7032_v47  ;;  %8355 = vst [vmem:[#allocation68_spill] sm:$0xff] %v7655_v4 }
 0x30c   : > { %v2644_v11 = vpop.f32.mrf.mxu0 }
 0x30d   : > { %v2526_v55 = vadd.f32 %v7407_v20, %v2193_v21 }
 0x30f   : > { %v7645_v16 = vadd.f32 %v2644_v11, %v2526_v55  ;;  %4307 = vmatmul.msk.bf16.gmra.mxu0 %vm7323_vm0, %v7135_v33  ;;  %v7671_v11 = vpop.f32.mrf.mxu3 }
 0x312   : > { %v2194_v63 = vpop.f32.mrf.mxu2  ;;  %v7673_v55 = vpop.f32.mrf.mxu1 }
 0x313   : > { %v2195_v47 = vadd.f32 %v2194_v63, %v7057_v12  ;;  %8356 = vst [vmem:[#allocation69_spill] sm:$0xff] %v7673_v55 }
 0x314   : > { %v2646_v62 = vpop.f32.mrf.mxu0 }
 0x315   : > { %v2527_v20 = vadd.f32 %v7425_v28, %v2195_v47 }
 0x317   : > { %v7659_v26 = vadd.f32 %v2646_v62, %v2527_v20  ;;  %4121 = vmatmul.msk.bf16.gmra.mxu2 %vm7323_vm0, %v7135_v33 }
 0x319   : > { %4676 = vmatmul.msk.bf16.gmra.mxu1 %vm7102_vm15, %v7027_v44 }
 0x31a   : > { %v2197_v21 = vpop.f32.mrf.mxu2  ;;  %4526 = vmatmul.msk.bf16.gmra.mxu3 %vm7323_vm0, %v6813_v34 }
 0x31b   : > { %v2198_v12 = vadd.f32 %v2197_v21, %v7068_v58  ;;  %v7683_v58 = vpop.f32.mrf.mxu3  ;;  %v7685_v21 = vpop.f32.mrf.mxu1 }
 0x31c   : > { %v2649_v28 = vpop.f32.mrf.mxu0  ;;  %8357 = vst [vmem:[#allocation70_spill] sm:$0xff] %v7685_v21 }
 0x31d   : > { %v2528_v27 = vadd.f32 %v7441_v36, %v2198_v12  ;;  %v4748_v36 = vld [vmem:[%s8250_s3 + $0x140] sm:$0xff] }
 0x31e   : > { %3011 = vmatpush.bf16.msra.mxu2 %v4748_v36 }
 0x31f   : > { %v7676_v63 = vadd.f32 %v2649_v28, %v2528_v27  ;;  %4310 = vmatmul.msk.bf16.gmra.mxu0 %vm7323_vm0, %v7166_v14 }
 0x322   : > { %v2199_v47 = vpop.f32.mrf.mxu2 }
 0x323   : > { %v2200_v62 = vadd.f32 %v2199_v47, %v7083_v8  ;;  %v4764_v47 = vld [vmem:[%s8250_s3 + $0x1c0] sm:$0xff] }
 0x324   : > { %v2651_v20 = vpop.f32.mrf.mxu0  ;;  %3383 = vmatpush.bf16.msra.mxu0 %v4764_v47 }
 0x325   : > { %v2529_v34 = vadd.f32 %v7450_v5, %v2200_v62  ;;  %v7711_v62 = vpop.f32.mrf.mxu3 }
 0x327   : > { %v7687_v4 = vadd.f32 %v2651_v20, %v2529_v34  ;;  %4124 = vmatmul.msk.bf16.gmra.mxu2 %vm7323_vm0, %v7166_v14  ;;  %v7713_v20 = vpop.f32.mrf.mxu1 }
 0x328   : > { %8358 = vst [vmem:[#allocation71_spill] sm:$0xff] %v7713_v20 }
 0x329   : > { %4679 = vmatmul.msk.bf16.gmra.mxu1 %vm7102_vm15, %v7081_v17 }
 0x32a   : > { %v2202_v8 = vpop.f32.mrf.mxu2  ;;  %4529 = vmatmul.msk.bf16.gmra.mxu3 %vm7323_vm0, %v6869_v61 }
 0x32b   : > { %v2203_v5 = vadd.f32 %v2202_v8, %v7097_v51 }
 0x32c   : > { %v2654_v12 = vpop.f32.mrf.mxu0 }
 0x32d   : > { %v2530_v28 = vadd.f32 %v7469_v49, %v2203_v5  ;;  %v7725_v8 = vpop.f32.mrf.mxu3 }
 0x32f   : > { %v7703_v27 = vadd.f32 %v2654_v12, %v2530_v28  ;;  %4313 = vmatmul.msk.bf16.gmra.mxu0 %vm7323_vm0, %v7209_v10 }
 0x332   : > { %v2204_v61 = vpop.f32.mrf.mxu2 }
 0x333   : > { %v2205_v51 = vadd.f32 %v2204_v61, %v7114_v19  ;;  %v7730_v19 = vpop.f32.mrf.mxu1 }
 0x334   : > { %v2656_v34 = vpop.f32.mrf.mxu0  ;;  %8359 = vst [vmem:[#allocation72_spill] sm:$0xff] %v7730_v19 }
 0x335   : > { %v2531_v49 = vadd.f32 %v7481_v2, %v2205_v51  ;;  %v8360_v51 = vld [vmem:[#allocation17_spill] sm:$0xff] }
 0x337   : > { %v7717_v36 = vadd.f32 %v2656_v34, %v2531_v49  ;;  %4127 = vmatmul.msk.bf16.gmra.mxu2 %vm7323_vm0, %v7209_v10  ;;  %v7740_v49 = vpop.f32.mrf.mxu3 }
 0x339   : > { %4682 = vmatmul.msk.bf16.gmra.mxu1 %vm7102_vm15, %v7123_v57 }
 0x33a   : > { %v2207_v5 = vpop.f32.mrf.mxu2  ;;  %4532 = vmatmul.msk.bf16.gmra.mxu3 %vm7323_vm0, %v6925_v42 }
 0x33b   : > { %v2208_v2 = vadd.f32 %v2207_v5, %v7126_v3  ;;  %v7742_v42 = vpop.f32.mrf.mxu1  ;;  %v8362_v5 = vld [vmem:[#allocation18_spill] sm:$0xff] }
 0x33c   : > { %v2659_v12 = vpop.f32.mrf.mxu0  ;;  %8361 = vst [vmem:[#allocation17_spill] sm:$0xff] %v7742_v42 }
 0x33d   : > { %v2532_v28 = vadd.f32 %v7499_v9, %v2208_v2 }
 0x33f   : > { %v7734_v47 = vadd.f32 %v2659_v12, %v2532_v28  ;;  %4316 = vmatmul.msk.bf16.gmra.mxu0 %vm7323_vm0, %v7242_v46 }
 0x342   : > { %v2209_v61 = vpop.f32.mrf.mxu2 }
 0x343   : > { %v2210_v34 = vadd.f32 %v2209_v61, %v8360_v51  ;;  %v8364_v61 = vld [vmem:[#allocation31_spill] sm:$0xff] }
 0x344   : > { %v2661_v20 = vpop.f32.mrf.mxu0 }
 0x345   : > { %v2533_v19 = vadd.f32 %v7514_v18, %v2210_v34  ;;  %v8365_v34 = vld [vmem:[#allocation20_spill] sm:$0xff] }
 0x347   : > { %v7745_v3 = vadd.f32 %v2661_v20, %v2533_v19  ;;  %4130 = vmatmul.msk.bf16.gmra.mxu2 %vm7323_vm0, %v7242_v46  ;;  %v7758_v20 = vpop.f32.mrf.mxu3  ;;  %v7760_v19 = vpop.f32.mrf.mxu1 }
 0x348   : > { %8363 = vst [vmem:[#allocation18_spill] sm:$0xff] %v7760_v19 }
 0x349   : > { %4685 = vmatmul.msk.bf16.gmra.mxu1 %vm7102_vm15, %v7154_v41 }
 0x34a   : > { %v2212_v9 = vpop.f32.mrf.mxu2  ;;  %4535 = vmatmul.msk.bf16.gmra.mxu3 %vm7323_vm0, %v6997_v45 }
 0x34b   : > { %v2213_v2 = vadd.f32 %v2212_v9, %v8362_v5 }
 0x34c   : > { %v2664_v12 = vpop.f32.mrf.mxu0 }
 0x34d   : > { %v2534_v18 = vadd.f32 %v7535_v6, %v2213_v2 }
 0x34f   : > { %v7762_v28 = vadd.f32 %v2664_v12, %v2534_v18  ;;  %4319 = vmatmul.msk.bf16.gmra.mxu0 %vm7323_vm0, %v8364_v61  ;;  %v7774_v6 = vpop.f32.mrf.mxu3  ;;  %v7776_v5 = vpop.f32.mrf.mxu1 }
 0x350   : > { %8366 = vst [vmem:[#allocation31_spill] sm:$0xff] %v7776_v5  ;;  %v8369_v5 = vld [vmem:[#allocation23_spill] sm:$0xff] }
 0x352   : > { %v2214_v51 = vpop.f32.mrf.mxu2 }
 0x353   : > { %v2215_v42 = vadd.f32 %v2214_v51, %v8365_v34 }
 0x354   : > { %v2666_v21 = vpop.f32.mrf.mxu0 }
 0x355   : > { %v2535_v45 = vadd.f32 %v7545_v40, %v2215_v42  ;;  %v8367_v40 = vld [vmem:[#allocation21_spill] sm:$0xff] }
 0x357   : > { %v7769_v9 = vadd.f32 %v2666_v21, %v2535_v45  ;;  %4133 = vmatmul.msk.bf16.gmra.mxu2 %vm7323_vm0, %v8364_v61  ;;  %v7791_v51 = vpop.f32.mrf.mxu3  ;;  %v7793_v45 = vpop.f32.mrf.mxu1 }
 0x359   : > { %4688 = vmatmul.msk.bf16.gmra.mxu1 %vm7102_vm15, %v7190_v53 }
 0x35a   : > { %v2217_v2 = vpop.f32.mrf.mxu2  ;;  %4538 = vmatmul.msk.bf16.gmra.mxu3 %vm7323_vm0, %v7053_v32 }
 0x35b   : > { %v2218_v21 = vadd.f32 %v2217_v2, %v8367_v40  ;;  %v8371_v40 = vld [vmem:[#allocation4_spill] sm:$0xff] }
 0x35c   : > { %v2669_v42 = vpop.f32.mrf.mxu0 }
 0x35d   : > { %v2536_v12 = vadd.f32 %v7563_v1, %v2218_v21  ;;  %v8372_v21 = vld [vmem:[#allocation32_spill] sm:$0xff] }
 0x35f   : > { %v7786_v18 = vadd.f32 %v2669_v42, %v2536_v12  ;;  %4322 = vmatmul.msk.bf16.gmra.mxu0 %vm7323_vm0, %v7342_v25  ;;  %v7809_v42 = vpop.f32.mrf.mxu3 }
 0x361   : > { %8368 = vst [vmem:[#allocation20_spill] sm:$0xff] %v7786_v18 }
 0x362   : > { %v2219_v34 = vpop.f32.mrf.mxu2 }
 0x363   : > { %v2220_v19 = vadd.f32 %v2219_v34, %v8369_v5  ;;  %v8374_v34 = vld [vmem:[#allocation5_spill] sm:$0xff] }
 0x364   : > { %v2671_v55 = vpop.f32.mrf.mxu0 }
 0x365   : > { %v2537_v32 = vadd.f32 %v7578_v38, %v2220_v19 }
 0x367   : > { %v7797_v2 = vadd.f32 %v2671_v55, %v2537_v32  ;;  %4421 = vmatmul.msk.bf16.vlgmr.msra.gmra.mxu2 %vm7102_vm15, %v8371_v40  ;;  %v7811_v55 = vpop.f32.mrf.mxu1  ;;  %v8375_v40 = vld [vmem:[#allocation35_spill] sm:$0xff] }
 0x369   : > { %8370 = vst [vmem:[#allocation21_spill] sm:$0xff] %v7797_v2  ;;  %4691 = vmatmul.msk.bf16.gmra.mxu1 %vm7102_vm15, %v7227_v37 }
 0x36a   : > { %v2222_v1 = vpop.f32.mrf.mxu2  ;;  %4541 = vmatmul.msk.bf16.gmra.mxu3 %vm7323_vm0, %v7095_v31  ;;  %v7819_v31 = vpop.f32.mrf.mxu3 }
 0x36b   : > { %v2223_v5 = vadd.f32 %v2222_v1, %v8372_v21 }
 0x36c   : > { %v2674_v38 = vpop.f32.mrf.mxu0 }
 0x36d   : > { %v2538_v19 = vadd.f32 %v7596_v35, %v2223_v5 }
 0x36f   : > { %v7814_v12 = vadd.f32 %v2674_v38, %v2538_v19  ;;  %3384 = vmatmul.bf16.vlgmr.msra.gmra.mxu0 %v8374_v34  ;;  %v7821_v1 = vpop.f32.mrf.mxu1 }
 0x371   : > { %8373 = vst [vmem:[#allocation23_spill] sm:$0xff] %v7814_v12 }
 0x372   : > { %v2224_v32 = vpop.f32.mrf.mxu2  ;;  %v7839_v38 = vpop.f32.mrf.mxu3 }
 0x373   : > { %v2225_v60 = vadd.f32 %v2224_v32, %v8375_v40 }
 0x374   : > { %v2676_v54 = vpop.f32.mrf.mxu0 }
 0x375   : > { %v2539_v2 = vadd.f32 %v7614_v50, %v2225_v60 }
 0x377   : > { %v7823_v21 = vadd.f32 %v2676_v54, %v2539_v2  ;;  %4424 = vmatmul.msk.bf16.gmra.mxu2 %vm7102_vm15, %v6651_v52  ;;  %v8378_v2 = vld [vmem:[#allocation6_spill] sm:$0xff]  ;;  %v7841_v52 = vpop.f32.mrf.mxu1 }
 0x379   : > { %8376 = vst [vmem:[#allocation4_spill] sm:$0xff] %v7823_v21  ;;  %4694 = vmatmul.msk.bf16.gmra.mxu1 %vm7102_vm15, %v7261_v15 }
 0x37a   : > { %v2227_v35 = vpop.f32.mrf.mxu2  ;;  %4544 = vmatmul.msk.bf16.gmra.mxu3 %vm7323_vm0, %v7135_v33 }
 0x37b   : > { %v2228_v50 = vadd.f32 %v2227_v35, %v7346_v48  ;;  %v8380_v48 = vld [vmem:[#allocation34_spill] sm:$0xff] }
 0x37c   : > { %v2679_v60 = vpop.f32.mrf.mxu0 }
 0x37d   : > { %v2540_v5 = vadd.f32 %v7633_v23, %v2228_v50  ;;  %v7853_v23 = vpop.f32.mrf.mxu3 }
 0x37f   : > { %v7836_v54 = vadd.f32 %v2679_v60, %v2540_v5  ;;  %3389 = vmatmul.bf16.gmra.mxu0 %v8378_v2 }
 0x381   : > { %8377 = vst [vmem:[#allocation32_spill] sm:$0xff] %v7836_v54 }
 0x382   : > { %v2229_v19 = vpop.f32.mrf.mxu2 }
 0x383   : > { %v2230_v34 = vadd.f32 %v2229_v19, %v7364_v29  ;;  %v7858_v29 = vpop.f32.mrf.mxu1 }
 0x384   : > { %v2681_v32 = vpop.f32.mrf.mxu0 }
 0x385   : > { %v2541_v40 = vadd.f32 %v7653_v30, %v2230_v34  ;;  %v8381_v30 = vld [vmem:[#allocation41_spill] sm:$0xff]  ;;  %v8384_v34 = vld [vmem:[#allocation43_spill] sm:$0xff] }
 0x387   : > { %v7845_v33 = vadd.f32 %v2681_v32, %v2541_v40  ;;  %4427 = vmatmul.msk.bf16.gmra.mxu2 %vm7102_vm15, %v6723_v59  ;;  %v8383_v59 = vld [vmem:[#allocation7_spill] sm:$0xff]  ;;  %v7866_v40 = vpop.f32.mrf.mxu3 }
 0x389   : > { %8379 = vst [vmem:[#allocation5_spill] sm:$0xff] %v7845_v33  ;;  %4697 = vmatmul.msk.bf16.gmra.mxu1 %vm7102_vm15, %v8380_v48 }
 0x38a   : > { %v2232_v35 = vpop.f32.mrf.mxu2  ;;  %4547 = vmatmul.msk.bf16.gmra.mxu3 %vm7323_vm0, %v7166_v14 }
 0x38b   : > { %v2233_v50 = vadd.f32 %v2232_v35, %v8381_v30  ;;  %v7868_v54 = vpop.f32.mrf.mxu1  ;;  %v8386_v35 = vld [vmem:[#allocation8_spill] sm:$0xff] }
 0x38c   : > { %v2684_v60 = vpop.f32.mrf.mxu0 }
 0x38d   : > { %v2542_v5 = vadd.f32 %v7671_v11, %v2233_v50  ;;  %v8387_v11 = vld [vmem:[#allocation37_spill] sm:$0xff] }
 0x38e   : > { %v8388_v50 = vld [vmem:[#allocation45_spill] sm:$0xff] }
 0x38f   : > { %v7862_v2 = vadd.f32 %v2684_v60, %v2542_v5  ;;  %3394 = vmatmul.bf16.gmra.mxu0 %v8383_v59 }
 0x391   : > { %8382 = vst [vmem:[#allocation35_spill] sm:$0xff] %v7862_v2 }
 0x392   : > { %v2234_v19 = vpop.f32.mrf.mxu2 }
 0x393   : > { %v2235_v32 = vadd.f32 %v2234_v19, %v8384_v34  ;;  %v7886_v59 = vpop.f32.mrf.mxu1  ;;  %v8390_v34 = vld [vmem:[#allocation9_spill] sm:$0xff] }
 0x394   : > { %v2686_v33 = vpop.f32.mrf.mxu0 }
 0x395   : > { %v2543_v14 = vadd.f32 %v7683_v58, %v2235_v32 }
 0x397   : > { %v7871_v21 = vadd.f32 %v2686_v33, %v2543_v14  ;;  %4430 = vmatmul.msk.bf16.gmra.mxu2 %vm7102_vm15, %v8386_v35  ;;  %v7884_v33 = vpop.f32.mrf.mxu3  ;;  %v8391_v14 = vld [vmem:[#allocation47_spill] sm:$0xff] }
 0x399   : > { %8385 = vst [vmem:[#allocation6_spill] sm:$0xff] %v7871_v21  ;;  %4700 = vmatmul.msk.bf16.gmra.mxu1 %vm7102_vm15, %v8387_v11 }
 0x39a   : > { %v2237_v30 = vpop.f32.mrf.mxu2  ;;  %4550 = vmatmul.msk.bf16.gmra.mxu3 %vm7323_vm0, %v7209_v10 }
 0x39b   : > { %v2238_v60 = vadd.f32 %v2237_v30, %v8388_v50  ;;  %v8393_v30 = vld [vmem:[#allocation10_spill] sm:$0xff]  ;;  %v7900_v50 = vpop.f32.mrf.mxu1 }
 0x39c   : > { %v2689_v5 = vpop.f32.mrf.mxu0 }
 0x39d   : > { %v2544_v58 = vadd.f32 %v7711_v62, %v2238_v60  ;;  %v8394_v60 = vmov 0.0|0.0  }
 0x39f   : > { %v7888_v19 = vadd.f32 %v2689_v5, %v2544_v58  ;;  %3399 = vmatmul.bf16.gmra.mxu0 %v8390_v34  ;;  %v7898_v62 = vpop.f32.mrf.mxu3  ;;  %v8395_v58 = vld [vmem:[#allocation48_spill] sm:$0xff] }
 0x3a1   : > { %8389 = vst [vmem:[#allocation34_spill] sm:$0xff] %v7888_v19 }
 0x3a2   : > { %v2239_v32 = vpop.f32.mrf.mxu2 }
 0x3a3   : > { %v2240_v35 = vadd.f32 %v2239_v32, %v8391_v14  ;;  %v8396_v32 = vld [vmem:[#allocation11_spill] sm:$0xff] }
 0x3a4   : > { %v2691_v21 = vpop.f32.mrf.mxu0 }
 0x3a5   : > { %v2545_v2 = vadd.f32 %v7725_v8, %v2240_v35 }
 0x3a7   : > { %v7893_v10 = vadd.f32 %v2691_v21, %v2545_v2  ;;  %4433 = vmatmul.msk.bf16.gmra.mxu2 %vm7102_vm15, %v8393_v30  ;;  %v7911_v14 = vpop.f32.mrf.mxu3  ;;  %v8397_v30 = vld [vmem:[#allocation51_spill] sm:$0xff] }
 0x3a9   : > { %8392 = vst [vmem:[#allocation41_spill] sm:$0xff] %v7893_v10  ;;  %3645 = vmatmul.bf16.gmra.mxu1 %v8394_v60 }
 0x3aa   : > { %v2242_v5 = vpop.f32.mrf.mxu2  ;;  %4553 = vmatmul.msk.bf16.gmra.mxu3 %vm7323_vm0, %v7242_v46 }
 0x3ab   : > { %v2243_v34 = vadd.f32 %v2242_v5, %v8395_v58 }
 0x3ac   : > { %v2694_v8 = vpop.f32.mrf.mxu0 }
 0x3ad   : > { %v2546_v21 = vadd.f32 %v7740_v49, %v2243_v34  ;;  %v8398_v49 = vld [vmem:[#allocation53_spill] sm:$0xff] }
 0x3af   : > { %v7908_v2 = vadd.f32 %v2694_v8, %v2546_v21  ;;  %3404 = vmatmul.bf16.gmra.mxu0 %v8396_v32  ;;  %v7924_v58 = vpop.f32.mrf.mxu3 }
 0x3b2   : > { %v2244_v35 = vpop.f32.mrf.mxu2 }
 0x3b3   : > { %v2245_v10 = vadd.f32 %v2244_v35, %v8397_v30 }
 0x3b4   : > { %v2696_v19 = vpop.f32.mrf.mxu0 }
 0x3b5   : > { %v2547_v12 = vadd.f32 %v7758_v20, %v2245_v10  ;;  %v8399_v20 = vld [vmem:[#allocation12_spill] sm:$0xff] }
 0x3b7   : > { %v7915_v18 = vadd.f32 %v2696_v19, %v2547_v12  ;;  %4436 = vmatmul.msk.bf16.gmra.mxu2 %vm7102_vm15, %v6899_v0  ;;  %v8400_v19 = vld [vmem:[#allocation55_spill] sm:$0xff]  ;;  %v7932_v35 = vpop.f32.mrf.mxu3 }
 0x3ba   : > { %v2247_v46 = vpop.f32.mrf.mxu2  ;;  %4556 = vmatmul.msk.bf16.gmra.mxu3 %vm7323_vm0, %v8364_v61 }
 0x3bb   : > { %v2248_v5 = vadd.f32 %v2247_v46, %v8398_v49 }
 0x3bc   : > { %v2699_v34 = vpop.f32.mrf.mxu0 }
 0x3bd   : > { %v2548_v8 = vadd.f32 %v7774_v6, %v2248_v5  ;;  %v8401_v6 = vld [vmem:[#allocation57_spill] sm:$0xff] }
 0x3bf   : > { %v7927_v21 = vadd.f32 %v2699_v34, %v2548_v8  ;;  %3409 = vmatmul.bf16.gmra.mxu0 %v8399_v20  ;;  %v7947_v8 = vpop.f32.mrf.mxu3 }
 0x3c2   : > { %v2249_v12 = vpop.f32.mrf.mxu2 }
 0x3c3   : > { %v2250_v10 = vadd.f32 %v2249_v12, %v8400_v19  ;;  %v8403_v12 = vld [vmem:[#allocation59_spill] sm:$0xff] }
 0x3c4   : > { %v2701_v0 = vpop.f32.mrf.mxu0 }
 0x3c5   : > { %v2549_v32 = vadd.f32 %v7791_v51, %v2250_v10  ;;  %v8402_v51 = vld [vmem:[#allocation13_spill] sm:$0xff] }
 0x3c7   : > { %v7934_v61 = vadd.f32 %v2701_v0, %v2549_v32  ;;  %4439 = vmatmul.msk.bf16.gmra.mxu2 %vm7102_vm15, %v6967_v22 }
 0x3ca   : > { %v2252_v30 = vpop.f32.mrf.mxu2  ;;  %4559 = vmatmul.msk.bf16.gmra.mxu3 %vm7323_vm0, %v7342_v25  ;;  %v7956_v25 = vpop.f32.mrf.mxu3 }
 0x3cb   : > { %v2253_v46 = vadd.f32 %v2252_v30, %v8401_v6 }
 0x3cc   : > { %v2704_v49 = vpop.f32.mrf.mxu0 }
 0x3cd   : > { %v2550_v5 = vadd.f32 %v7809_v42, %v2253_v46  ;;  %v8404_v42 = vld [vmem:[#allocation61_spill] sm:$0xff] }
 0x3cf   : > { %v7944_v34 = vadd.f32 %v2704_v49, %v2550_v5  ;;  %3414 = vmatmul.bf16.gmra.mxu0 %v8402_v51  ;;  %v8405_v49 = vld [vmem:[#allocation14_spill] sm:$0xff]  ;;  %v8406_v5 = vld [vmem:[#allocation63_spill] sm:$0xff] }
 0x3d2   : > { %v2254_v20 = vpop.f32.mrf.mxu2 }
 0x3d3   : > { %v2255_v19 = vadd.f32 %v2254_v20, %v8403_v12 }
 0x3d4   : > { %v2706_v22 = vpop.f32.mrf.mxu0 }
 0x3d5   : > { %v2551_v10 = vadd.f32 %v7819_v31, %v2255_v19  ;;  %v8407_v19 = vld [vmem:[#allocation24_spill] sm:$0xff] }
 0x3d7   : > { %v7951_v0 = vadd.f32 %v2706_v22, %v2551_v10  ;;  %4442 = vmatmul.msk.bf16.gmra.mxu2 %vm7102_vm15, %v7027_v44 }
 0x3da   : > { %v2257_v39 = vpop.f32.mrf.mxu2  ;;  %3273 = vmatmul.bf16.gmra.mxu3 %v8394_v60 }
 0x3db   : > { %v2258_v32 = vadd.f32 %v2257_v39, %v8404_v42 }
 0x3dc   : > { %v2709_v30 = vpop.f32.mrf.mxu0 }
 0x3dd   : > { %v2552_v6 = vadd.f32 %v7839_v38, %v2258_v32  ;;  %v2901_v38 = vadd.f32 %v8407_v19, %v7587_v56 }
 0x3df   : > { %v7961_v46 = vadd.f32 %v2709_v30, %v2552_v6  ;;  %3419 = vmatmul.bf16.gmra.mxu0 %v8405_v49  ;;  %v8408_v30 = vld [vmem:[#allocation15_spill] sm:$0xff] }
 0x3e2   : > { %v2259_v31 = vpop.f32.mrf.mxu2 }
 0x3e3   : > { %v2260_v51 = vadd.f32 %v2259_v31, %v8406_v5 }
 0x3e4   : > { %v2711_v20 = vpop.f32.mrf.mxu0 }
 0x3e5   : > { %v2553_v44 = vadd.f32 %v7853_v23, %v2260_v51  ;;  %v7977_v23 = vld [vmem:[%s8251_s4] ss:$0 sm:$0xff] }
 0x3e7   : > { %v7966_v12 = vadd.f32 %v2711_v20, %v2553_v44  ;;  %4445 = vmatmul.msk.bf16.gmra.mxu2 %vm7102_vm15, %v7081_v17  ;;  %v8409_v17 = vld [vmem:[#allocation25_spill] sm:$0xff]  ;;  %v8410_v44 = vld [vmem:[#allocation27_spill] sm:$0xff] }
 0x3e8   : > { %v2902_v49 = vadd.f32 %v8409_v17, %v7601_v13  ;;  %v2903_v19 = vadd.f32 %v8410_v44, %v7618_v43 }
 0x3ea   : > { %v3013_v22 = vpop.f32.mrf.mxu2 }
 0x3eb   : > { %v3093_v10 = vadd.f32 %v3013_v22, %v2901_v38 }
 0x3ec   : > { %v3385_v39 = vpop.f32.mrf.mxu0 }
 0x3ed   : > { %v3279_v42 = vadd.f32 %v7866_v40, %v3093_v10 }
 0x3ef   : > { %v3465_v32 = vadd.f32 %v3385_v39, %v3279_v42  ;;  %3424 = vmatmul.bf16.gmra.mxu0 %v8408_v30  ;;  %v8411_v30 = vld [vmem:[#allocation16_spill] sm:$0xff] }
 0x3f1   : > { %v3651_v6 = vadd.f32 %v7793_v45, %v3465_v32 }
 0x3f2   : > { %v3015_v31 = vpop.f32.mrf.mxu2 }
 0x3f3   : > { %v3687_v56 = vadd.f32 %v7977_v23, %v3651_v6  ;;  %v3094_v5 = vadd.f32 %v3015_v31, %v2902_v49  ;;  %v8003_v6 = vpop.f32.mrf.mxu3 }
 0x3f4   : > { %v3387_v40 = vpop.f32.mrf.mxu0 }
 0x3f5   : > { %v3719_v51 = vmax.f32 %v3687_v56, 0.0  ;;  %v3280_v20 = vadd.f32 %v7884_v33, %v3094_v5  ;;  %v8009_v56 = vpop.f32.mrf.mxu1 }
 0x3f7   : > { %3751 = vst [vmem:[%s7989_s10] sm:$0xff] %v3719_v51  ;;  %v3466_v45 = vadd.f32 %v3387_v40, %v3280_v20  ;;  %4448 = vmatmul.msk.bf16.gmra.mxu2 %vm7102_vm15, %v7123_v57 }
 0x3f9   : > { %v3652_v13 = vadd.f32 %v7811_v55, %v3466_v45  ;;  %v8412_v55 = vld [vmem:[#allocation28_spill] sm:$0xff] }
 0x3fa   : > { %v3018_v38 = vpop.f32.mrf.mxu2  ;;  %v2904_v43 = vadd.f32 %v8412_v55, %v7625_v7 }
 0x3fb   : > { %v3688_v22 = vadd.f32 %v7977_v23, %v3652_v13  ;;  %v3095_v10 = vadd.f32 %v3018_v38, %v2903_v19  ;;  %v8019_v44 = vpop.f32.mrf.mxu3 }
 0x3fc   : > { %v3390_v39 = vpop.f32.mrf.mxu0 }
 0x3fd   : > { %v3720_v42 = vmax.f32 %v3688_v22, 0.0  ;;  %v3281_v33 = vadd.f32 %v7898_v62, %v3095_v10 }
 0x3ff   : > { %3752 = vst [vmem:[%s7989_s10 + $0x8] sm:$0xff] %v3720_v42  ;;  %v3467_v32 = vadd.f32 %v3390_v39, %v3281_v33  ;;  %3429 = vmatmul.bf16.gmra.mxu0 %v8411_v30  ;;  %v8023_v39 = vpop.f32.mrf.mxu1 }
 0x401   : > { %v3653_v57 = vadd.f32 %v7821_v1, %v3467_v32  ;;  %v8413_v1 = vld [vmem:[#allocation30_spill] sm:$0xff]  ;;  %v8414_v32 = vld [vmem:[#allocation19_spill] sm:$0xff] }
 0x402   : > { %v3020_v17 = vpop.f32.mrf.mxu2  ;;  %v2905_v13 = vadd.f32 %v8413_v1, %v7645_v16 }
 0x403   : > { %v3689_v49 = vadd.f32 %v7977_v23, %v3653_v57  ;;  %v3096_v31 = vadd.f32 %v3020_v17, %v2904_v43  ;;  %v8415_v57 = vld [vmem:[#allocation33_spill] sm:$0xff] }
 0x404   : > { %v3392_v5 = vpop.f32.mrf.mxu0  ;;  %v2906_v55 = vadd.f32 %v8415_v57, %v7659_v26 }
 0x405   : > { %v3721_v40 = vmax.f32 %v3689_v49, 0.0  ;;  %v3282_v62 = vadd.f32 %v7911_v14, %v3096_v31 }
 0x407   : > { %3753 = vst [vmem:[%s7989_s10 + $0x10] sm:$0xff] %v3721_v40  ;;  %v3783_v20 = vmax.f32 %v3719_v51, %v3721_v40  ;;  %v3468_v45 = vadd.f32 %v3392_v5, %v3282_v62  ;;  %4451 = vmatmul.msk.bf16.gmra.mxu2 %vm7102_vm15, %v7154_v41  ;;  %v8035_v5 = vpop.f32.mrf.mxu3  ;;  %v8041_v1 = vpop.f32.mrf.mxu1 }
 0x409   : > { %v3654_v7 = vadd.f32 %v7841_v52, %v3468_v45  ;;  %v3799_v52 = vrot.slane %v3783_v20, 1 }
 0x40a   : > { %v3023_v19 = vpop.f32.mrf.mxu2 }
 0x40b   : > { %v3690_v38 = vadd.f32 %v7977_v23, %v3654_v7  ;;  %v3097_v22 = vadd.f32 %v3023_v19, %v2905_v13 }
 0x40c   : > { %v3395_v10 = vpop.f32.mrf.mxu0 }
 0x40d   : > { %v3722_v14 = vmax.f32 %v3690_v38, 0.0  ;;  %v3283_v51 = vadd.f32 %v7924_v58, %v3097_v22 }
 0x40f   : > { %3754 = vst [vmem:[%s7989_s10 + $0x18] sm:$0xff] %v3722_v14  ;;  %v3784_v33 = vmax.f32 %v3720_v42, %v3722_v14  ;;  %v3469_v41 = vadd.f32 %v3395_v10, %v3283_v51  ;;  %3434 = vmatmul.bf16.gmra.mxu0 %v8414_v32  ;;  %v8055_v51 = vpop.f32.mrf.mxu3  ;;  %v8419_v32 = vld [vmem:[#allocation38_spill] sm:$0xff] }
 0x411   : > { %v3807_v30 = vrot.slane %v3784_v33, 1  ;;  %v3655_v16 = vadd.f32 %v7858_v29, %v3469_v41 }
 0x412   : > { %v3025_v43 = vpop.f32.mrf.mxu2 }
 0x413   : > { %v3815_v49 = vsel %vm432_vm2, %v3799_v52, %v3807_v30  ;;  %v3823_v58 = vsel %vm432_vm2, %v3807_v30, %v3799_v52  ;;  %v3691_v42 = vadd.f32 %v7977_v23, %v3655_v16  ;;  %v3098_v31 = vadd.f32 %v3025_v43, %v2906_v55  ;;  %v8063_v30 = vpop.f32.mrf.mxu1 }
 0x414   : > { %v3831_v40 = vmax.f32 %v3783_v20, %v3815_v49  ;;  %v3832_v62 = vmax.f32 %v3784_v33, %v3823_v58  ;;  %v3397_v29 = vpop.f32.mrf.mxu0  ;;  %v8417_v20 = vld [vmem:[#allocation36_spill] sm:$0xff]  ;;  %v8418_v33 = vld [vmem:[#allocation22_spill] sm:$0xff]  ;;  %v2908_v52 = vadd.f32 %v8419_v32, %v7687_v4 }
 0x415   : > { %v3723_v45 = vmax.f32 %v3691_v42, 0.0  ;;  %v3284_v26 = vadd.f32 %v7932_v35, %v3098_v31  ;;  %v2907_v19 = vadd.f32 %v8417_v20, %v7676_v63  ;;  %v8420_v31 = vld [vmem:[#allocation39_spill] sm:$0xff] }
 0x416   : > { %3847 = vst [vmem:[#allocation2] sm:$0xff] %v3831_v40  ;;  %v2909_v40 = vadd.f32 %v8420_v31, %v7703_v27  ;;  %v8422_v27 = vld [vmem:[#allocation40_spill] sm:$0xff] }
 0x417   : > { %3848 = vst [vmem:[#allocation2 + $0x8] sm:$0xff] %v3832_v62  ;;  %v3470_v7 = vadd.f32 %v3397_v29, %v3284_v26  ;;  %4454 = vmatmul.msk.bf16.gmra.mxu2 %vm7102_vm15, %v7190_v53 }
 0x418   : > { %3755 = vst [vmem:[%s7989_s10 + $0x20] sm:$0xff] %v3723_v45 }
 0x419   : > { %v3656_v13 = vadd.f32 %v7868_v54, %v3470_v7 }
 0x41a   : > { %v3028_v38 = vpop.f32.mrf.mxu2 }
 0x41b   : > { %v3692_v35 = vadd.f32 %v7977_v23, %v3656_v13  ;;  %v3099_v22 = vadd.f32 %v3028_v38, %v2907_v19  ;;  %v8077_v7 = vpop.f32.mrf.mxu1  ;;  %v8421_v19 = vld [vmem:[#allocation26_spill] sm:$0xff] }
 0x41c   : > { %v3400_v53 = vpop.f32.mrf.mxu0 }
 0x41d   : > { %v3724_v10 = vmax.f32 %v3692_v35, 0.0  ;;  %v3285_v14 = vadd.f32 %v7947_v8, %v3099_v22  ;;  %v2910_v22 = vadd.f32 %v8422_v27, %v7717_v36 }
 0x41e   : > { %v3863_v54 = vld [vmem:[#allocation2] ss:$2 sm:$0xff] }
 0x41f   : > { %3878 = vst [vmem:[%s8052_s13] sm:$0xff] %v3863_v54  ;;  %v3471_v63 = vadd.f32 %v3400_v53, %v3285_v14  ;;  %3439 = vmatmul.bf16.gmra.mxu0 %v8418_v33 }
 0x420   : > { %3756 = vst [vmem:[%s7989_s10 + $0x28] sm:$0xff] %v3724_v10 }
 0x421   : > { %v3657_v41 = vadd.f32 %v7886_v59, %v3471_v63  ;;  %v8071_v59 = vpop.f32.mrf.mxu3 }
 0x422   : > { %v3030_v16 = vpop.f32.mrf.mxu2 }
 0x423   : > { %v3693_v57 = vadd.f32 %v7977_v23, %v3657_v41  ;;  %v3100_v8 = vadd.f32 %v3030_v16, %v2908_v52  ;;  %v8093_v36 = vpop.f32.mrf.mxu1 }
 0x424   : > { %v3402_v55 = vpop.f32.mrf.mxu0 }
 0x425   : > { %v3725_v43 = vmax.f32 %v3693_v57, 0.0  ;;  %v3286_v49 = vadd.f32 %v7956_v25, %v3100_v8  ;;  %v8423_v8 = vld [vmem:[#allocation42_spill] sm:$0xff] }
 0x427   : > { %3757 = vst [vmem:[%s7989_s10 + $0x30] sm:$0xff] %v3725_v43  ;;  %v3785_v58 = vmax.f32 %v3723_v45, %v3725_v43  ;;  %v3472_v42 = vadd.f32 %v3402_v55, %v3286_v49  ;;  %4457 = vmatmul.msk.bf16.gmra.mxu2 %vm7102_vm15, %v7227_v37  ;;  %v2911_v55 = vadd.f32 %v8423_v8, %v7734_v47 }
 0x429   : > { %v3658_v4 = vadd.f32 %v7900_v50, %v3472_v42  ;;  %v3800_v38 = vrot.slane %v3785_v58, 1  ;;  %v8085_v53 = vpop.f32.mrf.mxu3 }
 0x42a   : > { %v3033_v62 = vpop.f32.mrf.mxu2 }
 0x42b   : > { %v3694_v29 = vadd.f32 %v7977_v23, %v3658_v4  ;;  %v3101_v26 = vadd.f32 %v3033_v62, %v2909_v40  ;;  %v8424_v62 = vld [vmem:[#allocation29_spill] sm:$0xff] }
 0x42c   : > { %v3405_v25 = vpop.f32.mrf.mxu0 }
 0x42d   : > { %v3726_v45 = vmax.f32 %v3694_v29, 0.0  ;;  %v3287_v13 = vadd.f32 %v8003_v6, %v3101_v26  ;;  %v8425_v29 = vld [vmem:[#allocation44_spill] sm:$0xff] }
 0x42e   : > { %v2912_v26 = vadd.f32 %v8425_v29, %v7745_v3  ;;  %v8426_v3 = vld [vmem:[#allocation46_spill] sm:$0xff] }
 0x42f   : > { %3758 = vst [vmem:[%s7989_s10 + $0x38] sm:$0xff] %v3726_v45  ;;  %v3786_v20 = vmax.f32 %v3724_v10, %v3726_v45  ;;  %v3473_v37 = vadd.f32 %v3405_v25, %v3287_v13  ;;  %3444 = vmatmul.bf16.gmra.mxu0 %v8421_v19 }
 0x431   : > { %v3808_v50 = vrot.slane %v3786_v20, 1  ;;  %v3659_v35 = vadd.f32 %v8009_v56, %v3473_v37 }
 0x432   : > { %v3035_v14 = vpop.f32.mrf.mxu2 }
 0x433   : > { %v3816_v54 = vsel %vm432_vm2, %v3800_v38, %v3808_v50  ;;  %v3824_v6 = vsel %vm432_vm2, %v3808_v50, %v3800_v38  ;;  %v3695_v10 = vadd.f32 %v7977_v23, %v3659_v35  ;;  %v3102_v63 = vadd.f32 %v3035_v14, %v2910_v22 }
 0x434   : > { %v3833_v33 = vmax.f32 %v3785_v58, %v3816_v54  ;;  %v3834_v41 = vmax.f32 %v3786_v20, %v3824_v6  ;;  %v3407_v32 = vpop.f32.mrf.mxu0  ;;  %v8103_v58 = vpop.f32.mrf.mxu3  ;;  %v2913_v35 = vadd.f32 %v8426_v3, %v7762_v28  ;;  %v8428_v28 = vld [vmem:[#allocation49_spill] sm:$0xff] }
 0x435   : > { %v3727_v56 = vmax.f32 %v3695_v10, 0.0  ;;  %v3288_v52 = vadd.f32 %v8019_v44, %v3102_v63 }
 0x436   : > { %3849 = vst [vmem:[#allocation2 + $0x10] sm:$0xff] %v3833_v33 }
 0x437   : > { %3850 = vst [vmem:[#allocation2 + $0x18] sm:$0xff] %v3834_v41  ;;  %v3474_v16 = vadd.f32 %v3407_v32, %v3288_v52  ;;  %4460 = vmatmul.msk.bf16.gmra.mxu2 %vm7102_vm15, %v7261_v15  ;;  %v8427_v41 = vld [vmem:[#allocation50_spill] sm:$0xff]  ;;  %v2914_v52 = vadd.f32 %v8428_v28, %v7769_v9 }
 0x438   : > { %3759 = vst [vmem:[%s7989_s10 + $0x40] sm:$0xff] %v3727_v56 }
 0x439   : > { %v3660_v57 = vadd.f32 %v8023_v39, %v3474_v16  ;;  %v8108_v39 = vpop.f32.mrf.mxu1 }
 0x43a   : > { %v3038_v43 = vpop.f32.mrf.mxu2 }
 0x43b   : > { %v3696_v44 = vadd.f32 %v7977_v23, %v3660_v57  ;;  %v3103_v49 = vadd.f32 %v3038_v43, %v2911_v55 }
 0x43c   : > { %v3410_v42 = vpop.f32.mrf.mxu0  ;;  %v3236_v19 = vpop.f32.mrf.mxu3 }
 0x43d   : > { %v3728_v4 = vmax.f32 %v3696_v44, 0.0  ;;  %v3289_v31 = vadd.f32 %v8035_v5, %v3103_v49 }
 0x43e   : > { %v3865_v40 = vld [vmem:[#allocation2 + $0x10] ss:$2 sm:$0xff] }
 0x43f   : > { %3879 = vst [vmem:[%s8052_s13 + $0x8] sm:$0xff] %v3865_v40  ;;  %v3475_v15 = vadd.f32 %v3410_v42, %v3289_v31  ;;  %3449 = vmatmul.bf16.gmra.mxu0 %v8424_v62  ;;  %v8429_v40 = vld [vmem:[#allocation20_spill] sm:$0xff] }
 0x440   : > { %3760 = vst [vmem:[%s7989_s10 + $0x48] sm:$0xff] %v3728_v4 }
 0x441   : > { %v3661_v47 = vadd.f32 %v8041_v1, %v3475_v15  ;;  %v3608_v27 = vpop.f32.mrf.mxu1  ;;  %v8430_v15 = vld [vmem:[#allocation52_spill] sm:$0xff] }
 0x442   : > { %v3040_v25 = vpop.f32.mrf.mxu2  ;;  %v2915_v62 = vadd.f32 %v8430_v15, %v8429_v40 }
 0x443   : > { %v3697_v45 = vadd.f32 %v7977_v23, %v3661_v47  ;;  %v3104_v13 = vadd.f32 %v3040_v25, %v2912_v26 }
 0x444   : > { %v3412_v20 = vpop.f32.mrf.mxu0 }
 0x445   : > { %v3729_v5 = vmax.f32 %v3697_v45, 0.0  ;;  %v3290_v37 = vadd.f32 %v8055_v51, %v3104_v13 }
 0x447   : > { %3761 = vst [vmem:[%s7989_s10 + $0x50] sm:$0xff] %v3729_v5  ;;  %v3787_v38 = vmax.f32 %v3727_v56, %v3729_v5  ;;  %v3476_v50 = vadd.f32 %v3412_v20, %v3290_v37  ;;  %4463 = vmatmul.msk.bf16.gmra.mxu2 %vm7102_vm15, %v8380_v48  ;;  %v3239_v48 = vpop.f32.mrf.mxu3  ;;  %v8431_v5 = vld [vmem:[#allocation21_spill] sm:$0xff]  ;;  %v8432_v37 = vld [vmem:[#allocation54_spill] sm:$0xff] }
 0x449   : > { %v3662_v1 = vadd.f32 %v8063_v30, %v3476_v50  ;;  %v3801_v32 = vrot.slane %v3787_v38, 1  ;;  %v3611_v43 = vpop.f32.mrf.mxu1 }
 0x44a   : > { %v3043_v22 = vpop.f32.mrf.mxu2 }
 0x44b   : > { %v3698_v14 = vadd.f32 %v7977_v23, %v3662_v1  ;;  %v3105_v54 = vadd.f32 %v3043_v22, %v2913_v35 }
 0x44c   : > { %v3415_v6 = vpop.f32.mrf.mxu0 }
 0x44d   : > { %v3730_v51 = vmax.f32 %v3698_v14, 0.0  ;;  %v3291_v10 = vadd.f32 %v8071_v59, %v3105_v54 }
 0x44f   : > { %3762 = vst [vmem:[%s7989_s10 + $0x58] sm:$0xff] %v3730_v51  ;;  %v3788_v63 = vmax.f32 %v3728_v4, %v3730_v51  ;;  %v3477_v33 = vadd.f32 %v3415_v6, %v3291_v10  ;;  %3454 = vmatmul.bf16.gmra.mxu0 %v8427_v41  ;;  %v3241_v47 = vpop.f32.mrf.mxu3  ;;  %v8433_v10 = vld [vmem:[#allocation23_spill] sm:$0xff] }
 0x451   : > { %v3809_v30 = vrot.slane %v3788_v63, 1  ;;  %v3663_v56 = vadd.f32 %v8077_v7, %v3477_v33  ;;  %v3613_v20 = vpop.f32.mrf.mxu1 }
 0x452   : > { %v3045_v16 = vpop.f32.mrf.mxu2 }
 0x453   : > { %v3817_v57 = vsel %vm432_vm2, %v3801_v32, %v3809_v30  ;;  %v3825_v59 = vsel %vm432_vm2, %v3809_v30, %v3801_v32  ;;  %v3699_v8 = vadd.f32 %v7977_v23, %v3663_v56  ;;  %v3106_v55 = vadd.f32 %v3045_v16, %v2914_v52 }
 0x454   : > { %v3835_v44 = vmax.f32 %v3787_v38, %v3817_v57  ;;  %v3836_v49 = vmax.f32 %v3788_v63, %v3825_v59  ;;  %v3417_v42 = vpop.f32.mrf.mxu0  ;;  %v2916_v38 = vadd.f32 %v8432_v37, %v8431_v5  ;;  %v8434_v63 = vld [vmem:[#allocation56_spill] sm:$0xff] }
 0x455   : > { %v3731_v4 = vmax.f32 %v3699_v8, 0.0  ;;  %v3292_v7 = vadd.f32 %v8085_v53, %v3106_v55  ;;  %v8435_v55 = vld [vmem:[#allocation4_spill] sm:$0xff] }
 0x456   : > { %3851 = vst [vmem:[#allocation2 + $0x20] sm:$0xff] %v3835_v44  ;;  %v8436_v44 = vld [vmem:[#allocation58_spill] sm:$0xff] }
 0x457   : > { %3852 = vst [vmem:[#allocation2 + $0x28] sm:$0xff] %v3836_v49  ;;  %v3478_v9 = vadd.f32 %v3417_v42, %v3292_v7  ;;  %4466 = vmatmul.msk.bf16.gmra.mxu2 %vm7102_vm15, %v8387_v11  ;;  %v3244_v35 = vpop.f32.mrf.mxu3 }
 0x458   : > { %3763 = vst [vmem:[%s7989_s10 + $0x60] sm:$0xff] %v3731_v4 }
 0x459   : > { %v3664_v31 = vadd.f32 %v8093_v36, %v3478_v9  ;;  %v3616_v51 = vpop.f32.mrf.mxu1 }
 0x45a   : > { %v3048_v29 = vpop.f32.mrf.mxu2 }
 0x45b   : > { %v3700_v26 = vadd.f32 %v7977_v23, %v3664_v31  ;;  %v3107_v53 = vadd.f32 %v3048_v29, %v2915_v62 }
 0x45c   : > { %v3420_v25 = vpop.f32.mrf.mxu0 }
 0x45d   : > { %v3732_v45 = vmax.f32 %v3700_v26, 0.0  ;;  %v3293_v13 = vadd.f32 %v8103_v58, %v3107_v53 }
 0x45e   : > { %v3867_v24 = vld [vmem:[#allocation2 + $0x20] ss:$2 sm:$0xff] }
 0x45f   : > { %3880 = vst [vmem:[%s8052_s13 + $0x10] sm:$0xff] %v3867_v24  ;;  %v3479_v11 = vadd.f32 %v3420_v25, %v3293_v13  ;;  %3459 = vmatmul.bf16.gmra.mxu0 %v8394_v60  ;;  %v3246_v52 = vpop.f32.mrf.mxu3  ;;  %v8437_v25 = vld [vmem:[#allocation32_spill] sm:$0xff] }
 0x460   : > { %3764 = vst [vmem:[%s7989_s10 + $0x68] sm:$0xff] %v3732_v45 }
 0x461   : > { %v3665_v36 = vadd.f32 %v8108_v39, %v3479_v11  ;;  %v2917_v39 = vadd.f32 %v8434_v63, %v8433_v10  ;;  %v3618_v49 = vpop.f32.mrf.mxu1 }
 0x462   : > { %v3050_v50 = vpop.f32.mrf.mxu2 }
 0x463   : > { %v3701_v1 = vadd.f32 %v7977_v23, %v3665_v36  ;;  %v3108_v3 = vadd.f32 %v3050_v50, %v2916_v38 }
 0x464   : > { %v3422_v22 = vpop.f32.mrf.mxu0 }
 0x465   : > { %v3733_v58 = vmax.f32 %v3701_v1, 0.0  ;;  %v3294_v14 = vadd.f32 %v3236_v19, %v3108_v3 }
 0x467   : > { %3765 = vst [vmem:[%s7989_s10 + $0x70] sm:$0xff] %v3733_v58  ;;  %v3789_v54 = vmax.f32 %v3731_v4, %v3733_v58  ;;  %v3480_v6 = vadd.f32 %v3422_v22, %v3294_v14  ;;  %v3249_v26 = vpop.f32.mrf.mxu3  ;;  %v8439_v22 = vld [vmem:[#allocation5_spill] sm:$0xff]  ;;  %v8440_v58 = vld [vmem:[#allocation62_spill] sm:$0xff] }
 0x469   : > { %v3666_v60 = vadd.f32 %v3608_v27, %v3480_v6  ;;  %v3802_v19 = vrot.slane %v3789_v54, 1  ;;  %v2918_v27 = vadd.f32 %v8436_v44, %v8435_v55  ;;  %v3621_v5 = vpop.f32.mrf.mxu1 }
 0x46a   : > { %v3053_v33 = vpop.f32.mrf.mxu2 }
 0x46b   : > { %v3702_v41 = vadd.f32 %v7977_v23, %v3666_v60  ;;  %v3109_v32 = vadd.f32 %v3053_v33, %v2917_v39 }
 0x46c   : > { %v3425_v30 = vpop.f32.mrf.mxu0 }
 0x46d   : > { %v3734_v56 = vmax.f32 %v3702_v41, 0.0  ;;  %v3295_v28 = vadd.f32 %v3239_v48, %v3109_v32 }
 0x46f   : > { %3766 = vst [vmem:[%s7989_s10 + $0x78] sm:$0xff] %v3734_v56  ;;  %v3790_v16 = vmax.f32 %v3732_v45, %v3734_v56  ;;  %v3481_v57 = vadd.f32 %v3425_v30, %v3295_v28  ;;  %v8438_v45 = vld [vmem:[#allocation60_spill] sm:$0xff]  ;;  %v3251_v14 = vpop.f32.mrf.mxu3  ;;  %v8441_v30 = vld [vmem:[#allocation35_spill] sm:$0xff] }
 0x470   : > { %v2919_v13 = vadd.f32 %v8438_v45, %v8437_v25  ;;  %v8442_v56 = vld [vmem:[#allocation64_spill] sm:$0xff] }
 0x471   : > { %v3810_v59 = vrot.slane %v3790_v16, 1  ;;  %v3667_v8 = vadd.f32 %v3611_v43, %v3481_v57  ;;  %v3623_v33 = vpop.f32.mrf.mxu1 }
 0x472   : > { %v3055_v42 = vpop.f32.mrf.mxu2 }
 0x473   : > { %v3818_v4 = vsel %vm432_vm2, %v3802_v19, %v3810_v59  ;;  %v3826_v7 = vsel %vm432_vm2, %v3810_v59, %v3802_v19  ;;  %v3703_v48 = vadd.f32 %v7977_v23, %v3667_v8  ;;  %v3110_v9 = vadd.f32 %v3055_v42, %v2918_v27 }
 0x474   : > { %v3837_v31 = vmax.f32 %v3789_v54, %v3818_v4  ;;  %v3838_v40 = vmax.f32 %v3790_v16, %v3826_v7  ;;  %v3427_v15 = vpop.f32.mrf.mxu0 }
 0x475   : > { %v3735_v62 = vmax.f32 %v3703_v48, 0.0  ;;  %v3296_v43 = vadd.f32 %v3241_v47, %v3110_v9  ;;  %v8443_v48 = vld [vmem:[#allocation6_spill] sm:$0xff] }
 0x476   : > { %3853 = vst [vmem:[#allocation2 + $0x30] sm:$0xff] %v3837_v31 }
 0x477   : > { %3854 = vst [vmem:[#allocation2 + $0x38] sm:$0xff] %v3838_v40  ;;  %v3482_v29 = vadd.f32 %v3427_v15, %v3296_v43  ;;  %v3254_v19 = vpop.f32.mrf.mxu3 }
 0x478   : > { %3767 = vst [vmem:[%s7989_s10 + $0x80] sm:$0xff] %v3735_v62 }
 0x479   : > { %v3668_v53 = vadd.f32 %v3613_v20, %v3482_v29  ;;  %v2920_v20 = vadd.f32 %v8440_v58, %v8439_v22 }
 0x47a   : > { %v3058_v24 = vpop.f32.mrf.mxu2 }
 0x47b   : > { %v3704_v11 = vadd.f32 %v7977_v23, %v3668_v53  ;;  %v3111_v36 = vadd.f32 %v3058_v24, %v2919_v13 }
 0x47c   : > { %v3430_v37 = vpop.f32.mrf.mxu0 }
 0x47d   : > { %v3736_v38 = vmax.f32 %v3704_v11, 0.0  ;;  %v3297_v47 = vadd.f32 %v3244_v35, %v3111_v36  ;;  %v8445_v36 = vld [vmem:[#allocation34_spill] sm:$0xff] }
 0x47e   : > { %v3869_v50 = vld [vmem:[#allocation2 + $0x30] ss:$2 sm:$0xff] }
 0x47f   : > { %3881 = vst [vmem:[%s8052_s13 + $0x18] sm:$0xff] %v3869_v50  ;;  %v3483_v1 = vadd.f32 %v3430_v37, %v3297_v47  ;;  %v3256_v13 = vpop.f32.mrf.mxu3 }
 0x480   : > { %3768 = vst [vmem:[%s7989_s10 + $0x88] sm:$0xff] %v3736_v38 }
 0x481   : > { %v3669_v3 = vadd.f32 %v3616_v51, %v3483_v1  ;;  %v2921_v51 = vadd.f32 %v8442_v56, %v8441_v30 }
 0x482   : > { %v3060_v54 = vpop.f32.mrf.mxu2 }
 0x483   : > { %v3705_v6 = vadd.f32 %v7977_v23, %v3669_v3  ;;  %v3112_v60 = vadd.f32 %v3060_v54, %v2920_v20 }
 0x484   : > { %v3432_v10 = vpop.f32.mrf.mxu0 }
 0x485   : > { %v3737_v63 = vmax.f32 %v3705_v6, 0.0  ;;  %v3298_v39 = vadd.f32 %v3246_v52, %v3112_v60  ;;  %v3626_v52 = vpop.f32.mrf.mxu1  ;;  %v8447_v60 = vld [vmem:[#allocation41_spill] sm:$0xff] }
 0x487   : > { %3769 = vst [vmem:[%s7989_s10 + $0x90] sm:$0xff] %v3737_v63  ;;  %v3791_v35 = vmax.f32 %v3735_v62, %v3737_v63  ;;  %v3484_v41 = vadd.f32 %v3432_v10, %v3298_v39  ;;  %v3259_v54 = vpop.f32.mrf.mxu3  ;;  %v8448_v10 = vld [vmem:[#allocation67_spill] sm:$0xff] }
 0x488   : > { %v2924_v63 = vadd.f32 %v8448_v10, %v8447_v60  ;;  %v8452_v60 = vld [vmem:[#allocation71_spill] sm:$0xff] }
 0x489   : > { %v3670_v32 = vadd.f32 %v3618_v49, %v3484_v41  ;;  %v3803_v42 = vrot.slane %v3791_v35, 1  ;;  %v8444_v49 = vld [vmem:[#allocation65_spill] sm:$0xff]  ;;  %v2928_v10 = vadd.f32 %v8452_v60, %v7934_v61 }
 0x48a   : > { %v3063_v28 = vpop.f32.mrf.mxu2  ;;  %v2922_v9 = vadd.f32 %v8444_v49, %v8443_v48 }
 0x48b   : > { %v3706_v16 = vadd.f32 %v7977_v23, %v3670_v32  ;;  %v3113_v57 = vadd.f32 %v3063_v28, %v2921_v51 }
 0x48c   : > { %v3435_v59 = vpop.f32.mrf.mxu0 }
 0x48d   : > { %v3738_v8 = vmax.f32 %v3706_v16, 0.0  ;;  %v3299_v55 = vadd.f32 %v3249_v26, %v3113_v57  ;;  %v8449_v57 = vld [vmem:[#allocation68_spill] sm:$0xff] }
 0x48f   : > { %3770 = vst [vmem:[%s7989_s10 + $0x98] sm:$0xff] %v3738_v8  ;;  %v3792_v44 = vmax.f32 %v3736_v38, %v3738_v8  ;;  %v3485_v27 = vadd.f32 %v3435_v59, %v3299_v55  ;;  %v3628_v38 = vpop.f32.mrf.mxu1  ;;  %v3261_v59 = vpop.f32.mrf.mxu3 }
 0x491   : > { %v3811_v4 = vrot.slane %v3792_v44, 1  ;;  %v3671_v7 = vadd.f32 %v3621_v5, %v3485_v27  ;;  %v8446_v5 = vld [vmem:[#allocation66_spill] sm:$0xff] }
 0x492   : > { %v3065_v31 = vpop.f32.mrf.mxu2  ;;  %v2923_v37 = vadd.f32 %v8446_v5, %v8445_v36 }
 0x493   : > { %v3819_v40 = vsel %vm432_vm2, %v3803_v42, %v3811_v4  ;;  %v3827_v15 = vsel %vm432_vm2, %v3811_v4, %v3803_v42  ;;  %v3707_v62 = vadd.f32 %v7977_v23, %v3671_v7  ;;  %v3114_v43 = vadd.f32 %v3065_v31, %v2922_v9 }
 0x494   : > { %v3839_v29 = vmax.f32 %v3791_v35, %v3819_v40  ;;  %v3840_v26 = vmax.f32 %v3792_v44, %v3827_v15  ;;  %v3437_v53 = vpop.f32.mrf.mxu0  ;;  %v8450_v40 = vld [vmem:[#allocation69_spill] sm:$0xff] }
 0x495   : > { %v3739_v25 = vmax.f32 %v3707_v62, 0.0  ;;  %v3300_v45 = vadd.f32 %v3251_v14, %v3114_v43  ;;  %v2926_v15 = vadd.f32 %v8450_v40, %v7915_v18 }
 0x496   : > { %3855 = vst [vmem:[#allocation2 + $0x40] sm:$0xff] %v3839_v29 }
 0x497   : > { %3856 = vst [vmem:[#allocation2 + $0x48] sm:$0xff] %v3840_v26  ;;  %v3486_v24 = vadd.f32 %v3437_v53, %v3300_v45  ;;  %v3631_v41 = vpop.f32.mrf.mxu1  ;;  %v3264_v53 = vpop.f32.mrf.mxu3 }
 0x498   : > { %3771 = vst [vmem:[%s7989_s10 + $0xa0] sm:$0xff] %v3739_v25 }
 0x499   : > { %v3672_v11 = vadd.f32 %v3623_v33, %v3486_v24 }
 0x49a   : > { %v3068_v47 = vpop.f32.mrf.mxu2 }
 0x49b   : > { %v3708_v50 = vadd.f32 %v7977_v23, %v3672_v11  ;;  %v3115_v1 = vadd.f32 %v3068_v47, %v2923_v37  ;;  %v8451_v37 = vld [vmem:[#allocation70_spill] sm:$0xff] }
 0x49c   : > { %v3440_v3 = vpop.f32.mrf.mxu0 }
 0x49d   : > { %v3740_v22 = vmax.f32 %v3708_v50, 0.0  ;;  %v3301_v58 = vadd.f32 %v3254_v19, %v3115_v1  ;;  %v2925_v19 = vadd.f32 %v8449_v57, %v7908_v2 }
 0x49e   : > { %v3871_v20 = vld [vmem:[#allocation2 + $0x40] ss:$2 sm:$0xff] }
 0x49f   : > { %3882 = vst [vmem:[%s8052_s13 + $0x20] sm:$0xff] %v3871_v20  ;;  %v3487_v14 = vadd.f32 %v3440_v3, %v3301_v58  ;;  %v3633_v4 = vpop.f32.mrf.mxu1  ;;  %v3266_v20 = vpop.f32.mrf.mxu3 }
 0x4a0   : > { %3772 = vst [vmem:[%s7989_s10 + $0xa8] sm:$0xff] %v3740_v22 }
 0x4a1   : > { %v3673_v6 = vadd.f32 %v3626_v52, %v3487_v14 }
 0x4a2   : > { %v3070_v39 = vpop.f32.mrf.mxu2 }
 0x4a3   : > { %v3709_v33 = vadd.f32 %v7977_v23, %v3673_v6  ;;  %v3116_v35 = vadd.f32 %v3070_v39, %v2924_v63 }
 0x4a4   : > { %v3442_v32 = vpop.f32.mrf.mxu0 }
 0x4a5   : > { %v3741_v30 = vmax.f32 %v3709_v33, 0.0  ;;  %v3302_v56 = vadd.f32 %v3256_v13, %v3116_v35 }
 0x4a7   : > { %3773 = vst [vmem:[%s7989_s10 + $0xb0] sm:$0xff] %v3741_v30  ;;  %v3793_v51 = vmax.f32 %v3739_v25, %v3741_v30  ;;  %v3488_v28 = vadd.f32 %v3442_v32, %v3302_v56  ;;  %v3636_v36 = vpop.f32.mrf.mxu1 }
 0x4a9   : > { %v3674_v16 = vadd.f32 %v3628_v38, %v3488_v28  ;;  %v3804_v49 = vrot.slane %v3793_v51, 1  ;;  %v2927_v38 = vadd.f32 %v8451_v37, %v7927_v21 }
 0x4aa   : > { %v3073_v8 = vpop.f32.mrf.mxu2 }
 0x4ab   : > { %v3710_v55 = vadd.f32 %v7977_v23, %v3674_v16  ;;  %v3117_v44 = vadd.f32 %v3073_v8, %v2925_v19  ;;  %v8453_v16 = vld [vmem:[#allocation72_spill] sm:$0xff] }
 0x4ac   : > { %v3445_v27 = vpop.f32.mrf.mxu0  ;;  %v2929_v57 = vadd.f32 %v8453_v16, %v7944_v34 }
 0x4ad   : > { %v3742_v52 = vmax.f32 %v3710_v55, 0.0  ;;  %v3303_v42 = vadd.f32 %v3259_v54, %v3117_v44 }
 0x4af   : > { %3774 = vst [vmem:[%s7989_s10 + $0xb8] sm:$0xff] %v3742_v52  ;;  %v3794_v7 = vmax.f32 %v3740_v22, %v3742_v52  ;;  %v3489_v48 = vadd.f32 %v3445_v27, %v3303_v42  ;;  %v3638_v63 = vpop.f32.mrf.mxu1 }
 0x4b1   : > { %v3812_v9 = vrot.slane %v3794_v7, 1  ;;  %v3675_v31 = vadd.f32 %v3631_v41, %v3489_v48 }
 0x4b2   : > { %v3075_v2 = vpop.f32.mrf.mxu2 }
 0x4b3   : > { %v3820_v62 = vsel %vm432_vm2, %v3804_v49, %v3812_v9  ;;  %v3828_v43 = vsel %vm432_vm2, %v3812_v9, %v3804_v49  ;;  %v3711_v29 = vadd.f32 %v7977_v23, %v3675_v31  ;;  %v3118_v26 = vadd.f32 %v3075_v2, %v2926_v15  ;;  %v8454_v49 = vld [vmem:[#allocation17_spill] sm:$0xff] }
 0x4b4   : > { %v3841_v25 = vmax.f32 %v3793_v51, %v3820_v62  ;;  %v3842_v45 = vmax.f32 %v3794_v7, %v3828_v43  ;;  %v3447_v13 = vpop.f32.mrf.mxu0  ;;  %v3269_v51 = vpop.f32.mrf.mxu3  ;;  %v2930_v9 = vadd.f32 %v8454_v49, %v7951_v0 }
 0x4b5   : > { %v3743_v24 = vmax.f32 %v3711_v29, 0.0  ;;  %v3304_v11 = vadd.f32 %v3261_v59, %v3118_v26 }
 0x4b6   : > { %3857 = vst [vmem:[#allocation2 + $0x50] sm:$0xff] %v3841_v25 }
 0x4b7   : > { %3858 = vst [vmem:[#allocation2 + $0x58] sm:$0xff] %v3842_v45  ;;  %v3490_v18 = vadd.f32 %v3447_v13, %v3304_v11  ;;  %v3641_v8 = vpop.f32.mrf.mxu1 }
 0x4b8   : > { %3775 = vst [vmem:[%s7989_s10 + $0xc0] sm:$0xff] %v3743_v24 }
 0x4b9   : > { %v3676_v5 = vadd.f32 %v3633_v4, %v3490_v18 }
 0x4ba   : > { %v3078_v47 = vpop.f32.mrf.mxu2 }
 0x4bb   : > { %v3712_v50 = vadd.f32 %v7977_v23, %v3676_v5  ;;  %v3119_v1 = vadd.f32 %v3078_v47, %v2927_v38 }
 0x4bc   : > { %v3450_v3 = vpop.f32.mrf.mxu0  ;;  %v3271_v31 = vpop.f32.mrf.mxu3 }
 0x4bd   : > { %v3744_v22 = vmax.f32 %v3712_v50, 0.0  ;;  %v3305_v58 = vadd.f32 %v3264_v53, %v3119_v1 }
 0x4be   : > { %v3873_v14 = vld [vmem:[#allocation2 + $0x50] ss:$2 sm:$0xff] }
 0x4bf   : > { %3883 = vst [vmem:[%s8052_s13 + $0x28] sm:$0xff] %v3873_v14  ;;  %v3491_v54 = vadd.f32 %v3450_v3, %v3305_v58  ;;  %v3643_v45 = vpop.f32.mrf.mxu1 }
 0x4c0   : > { %3776 = vst [vmem:[%s7989_s10 + $0xc8] sm:$0xff] %v3744_v22 }
 0x4c1   : > { %v3677_v6 = vadd.f32 %v3636_v36, %v3491_v54 }
 0x4c2   : > { %v3080_v39 = vpop.f32.mrf.mxu2 }
 0x4c3   : > { %v3713_v21 = vadd.f32 %v7977_v23, %v3677_v6  ;;  %v3120_v33 = vadd.f32 %v3080_v39, %v2928_v10 }
 0x4c4   : > { %v3452_v35 = vpop.f32.mrf.mxu0  ;;  %v3274_v18 = vpop.f32.mrf.mxu3 }
 0x4c5   : > { %v3745_v41 = vmax.f32 %v3713_v21, 0.0  ;;  %v3306_v32 = vadd.f32 %v3266_v20, %v3120_v33  ;;  %v8456_v20 = vld [vmem:[#allocation31_spill] sm:$0xff] }
 0x4c6   : > { %v2932_v14 = vadd.f32 %v8456_v20, %v7966_v12 }
 0x4c7   : > { %3777 = vst [vmem:[%s7989_s10 + $0xd0] sm:$0xff] %v3745_v41  ;;  %v3795_v30 = vmax.f32 %v3743_v24, %v3745_v41  ;;  %v3492_v56 = vadd.f32 %v3452_v35, %v3306_v32  ;;  %v8455_v24 = vld [vmem:[#allocation18_spill] sm:$0xff]  ;;  %v3646_v3 = vpop.f32.mrf.mxu1 }
 0x4c8   : > { %v2931_v11 = vadd.f32 %v8455_v24, %v7961_v46 }
 0x4c9   : > { %v3678_v28 = vadd.f32 %v3638_v63, %v3492_v56  ;;  %v3805_v4 = vrot.slane %v3795_v30, 1 }
 0x4ca   : > { %v3083_v19 = vpop.f32.mrf.mxu2 }
 0x4cb   : > { %v3714_v61 = vadd.f32 %v7977_v23, %v3678_v28  ;;  %v3121_v59 = vadd.f32 %v3083_v19, %v2929_v57 }
 0x4cc   : > { %v3455_v55 = vpop.f32.mrf.mxu0  ;;  %v3276_v60 = vpop.f32.mrf.mxu3 }
 0x4cd   : > { %v3746_v44 = vmax.f32 %v3714_v61, 0.0  ;;  %v3307_v27 = vadd.f32 %v3269_v51, %v3121_v59 }
 0x4cf   : > { %3778 = vst [vmem:[%s7989_s10 + $0xd8] sm:$0xff] %v3746_v44  ;;  %v3796_v52 = vmax.f32 %v3744_v22, %v3746_v44  ;;  %v3493_v42 = vadd.f32 %v3455_v55, %v3307_v27  ;;  %v3648_v35 = vpop.f32.mrf.mxu1 }
 0x4d1   : > { %v3813_v7 = vrot.slane %v3796_v52, 1  ;;  %v3679_v48 = vadd.f32 %v3641_v8, %v3493_v42 }
 0x4d2   : > { %v3085_v34 = vpop.f32.mrf.mxu2 }
 0x4d3   : > { %v3821_v40 = vsel %vm432_vm2, %v3805_v4, %v3813_v7  ;;  %v3829_v15 = vsel %vm432_vm2, %v3813_v7, %v3805_v4  ;;  %v3715_v2 = vadd.f32 %v7977_v23, %v3679_v48  ;;  %v3122_v62 = vadd.f32 %v3085_v34, %v2930_v9 }
 0x4d4   : > { %v3843_v43 = vmax.f32 %v3795_v30, %v3821_v40  ;;  %v3844_v29 = vmax.f32 %v3796_v52, %v3829_v15  ;;  %v3457_v26 = vpop.f32.mrf.mxu0 }
 0x4d5   : > { %v3747_v53 = vmax.f32 %v3715_v2, 0.0  ;;  %v3308_v25 = vadd.f32 %v3271_v31, %v3122_v62 }
 0x4d6   : > { %3859 = vst [vmem:[#allocation2 + $0x60] sm:$0xff] %v3843_v43 }
 0x4d7   : > { %3860 = vst [vmem:[#allocation2 + $0x68] sm:$0xff] %v3844_v29  ;;  %v3494_v0 = vadd.f32 %v3457_v26, %v3308_v25 }
 0x4d8   : > { %3779 = vst [vmem:[%s7989_s10 + $0xe0] sm:$0xff] %v3747_v53 }
 0x4d9   : > { %v3680_v13 = vadd.f32 %v3643_v45, %v3494_v0 }
 0x4da   : > { %v3088_v36 = vpop.f32.mrf.mxu2 }
 0x4db   : > { %v3716_v5 = vadd.f32 %v7977_v23, %v3680_v13  ;;  %v3123_v37 = vadd.f32 %v3088_v36, %v2931_v11 }
 0x4dc   : > { %v3460_v38 = vpop.f32.mrf.mxu0 }
 0x4dd   : > { %v3748_v47 = vmax.f32 %v3716_v5, 0.0  ;;  %v3309_v50 = vadd.f32 %v3274_v18, %v3123_v37 }
 0x4de   : > { %v3875_v1 = vld [vmem:[#allocation2 + $0x60] ss:$2 sm:$0xff] }
 0x4df   : > { %3884 = vst [vmem:[%s8052_s13 + $0x30] sm:$0xff] %v3875_v1  ;;  %v3495_v22 = vadd.f32 %v3460_v38, %v3309_v50 }
 0x4e0   : > { %3780 = vst [vmem:[%s7989_s10 + $0xe8] sm:$0xff] %v3748_v47 }
 0x4e1   : > { %v3681_v58 = vadd.f32 %v3646_v3, %v3495_v22 }
 0x4e2   : > { %v3090_v46 = vpop.f32.mrf.mxu2 }
 0x4e3   : > { %v3717_v54 = vadd.f32 %v7977_v23, %v3681_v58  ;;  %v3124_v6 = vadd.f32 %v3090_v46, %v2932_v14 }
 0x4e4   : > { %v3462_v39 = vpop.f32.mrf.mxu0 }
 0x4e5   : > { %v3749_v10 = vmax.f32 %v3717_v54, 0.0  ;;  %v3310_v63 = vadd.f32 %v3276_v60, %v3124_v6 }
 0x4e7   : > { %3781 = vst [vmem:[%s7989_s10 + $0xf0] sm:$0xff] %v3749_v10  ;;  %v3797_v21 = vmax.f32 %v3747_v53, %v3749_v10  ;;  %v3496_v33 = vadd.f32 %v3462_v39, %v3310_v63 }
 0x4e9   : > { %v3682_v41 = vadd.f32 %v3648_v35, %v3496_v33  ;;  %v3806_v12 = vrot.slane %v3797_v21, 1 }
 0x4eb   : > { %v3718_v32 = vadd.f32 %v7977_v23, %v3682_v41 }
 0x4ed   : > { %v3750_v30 = vmax.f32 %v3718_v32, 0.0 }
 0x4ef   : > { %3782 = vst [vmem:[%s7989_s10 + $0xf8] sm:$0xff] %v3750_v30  ;;  %v3798_v56 = vmax.f32 %v3748_v47, %v3750_v30 }
 0x4f1   : > { %v3814_v51 = vrot.slane %v3798_v56, 1 }
 0x4f3   : > { %v3822_v28 = vsel %vm432_vm2, %v3806_v12, %v3814_v51  ;;  %v3830_v16 = vsel %vm432_vm2, %v3814_v51, %v3806_v12 }
 0x4f4   : > { %v3845_v57 = vmax.f32 %v3797_v21, %v3822_v28  ;;  %v3846_v19 = vmax.f32 %v3798_v56, %v3830_v16 }
 0x4f6   : > { %3861 = vst [vmem:[#allocation2 + $0x70] sm:$0xff] %v3845_v57 }
 0x4f7   : > { %3862 = vst [vmem:[#allocation2 + $0x78] sm:$0xff] %v3846_v19 }
 0x4fe   : > { %v3877_v61 = vld [vmem:[#allocation2 + $0x70] ss:$2 sm:$0xff] }
 0x4ff   : > { %3885 = vst [vmem:[%s8052_s13 + $0x38] sm:$0xff] %v3877_v61 }
 0x500 PF: > { %s17_s21 = sadd.s32 1, %s5435_s21  }
 0x501   : > { %p14_p4 = scmp.ge.s32.totalorder %s17_s21, 4  }
 0x503   :  { %16 = sbr.rel (!%p14_p4) target bundleno = 1 (0x1), region = 97 }

</bundles_post_ra>
